<compile_context>
chip_gen: v7x
topology: tpu7x:2x2x1
jax: 0.10.0
libtpu: 0.0.40
codegen_flags: <defaults>
</compile_context>

<pallas_src>
import functools

import numpy as np
import jax
import jax.numpy as jnp
from jax.experimental import pallas as pl
from jax.experimental.pallas import tpu as pltpu

# ----------------------------- problem sizes --------------------------------
NUM_BATCH = 8          # num_batch
NUM = 16               # num (== nvar)
T = 0.1                # t
NVAR = NUM
NUM_STEERDOT = NUM - 1
NUM_STEERDDOT = NUM - 2
NC = 2 * NUM + 2 * NUM_STEERDOT + 2 * NUM_STEERDDOT   # 90 real constraints
NC_PAD = 128                                          # lane-aligned padding
MAXITER = 5
RHO = 1.0
RHO_PROJ = 1.0

# mlp_init: 2-layer MLP  (D_IN -> HIDDEN -> NVAR + NC)
D_IN = 16
HIDDEN = 32
OUT_DIM = NVAR + NC

# ------------- row offsets inside the packed constant slabs ------------------
# (all offsets are multiples of 8 sublanes so every ref slice is tile-aligned)

# mlp_slab: lane width = HIDDEN
MLP_W1 = 0                       # (D_IN, HIDDEN)
MLP_B1 = 16                      # (1, HIDDEN)
MLP_ROWS = 17

# slab16: lane width = NVAR
S16_W2L = 0                      # (HIDDEN, NVAR)   lamda head of the MLP
S16_A = 32                       # (NC_PAD, NVAR)   rho * zero-padded A_control
S16_B2L = 160                    # (1, NVAR)        lamda-head bias
S16_ROWS = 161

# slab128: lane width = NC_PAD
S128_W2S = 0                     # (HIDDEN, NC_PAD) s head of the MLP (zero-padded cols)
S128_MA = 32                     # (NVAR, NC_PAD)   M @ A^T
S128_AMA = 48                    # (NC_PAD, NC_PAD) rho * (A @ M @ A^T)
S128_RAX = 176                   # (1, NC_PAD)      r @ A^T
S128_B2S = 184                   # (1, NC_PAD)      s-head bias (zero-padded)
S128_MASK = 192                  # (8, NC_PAD)      signed b_control masks (rows 6,7 zero)
S128_ROWS = 200

# output slab lane layout (one lane-dense (8,128) output)
OUT_STEER = 0                    # lanes [0, 16)
OUT_PRIM = NVAR                  # lanes [16, 21)
OUT_FIX = NVAR + MAXITER         # lanes [21, 26)
OUT_ACC_P = NVAR + 2 * MAXITER   # lane 26
OUT_ACC_F = OUT_ACC_P + 1        # lane 27
OUT_PAD = NC_PAD - (NVAR + 2 * MAXITER + 2)

_HIGHEST = jax.lax.Precision.HIGHEST


def _dot_ref(a, b):
    return jnp.dot(a, b, preferred_element_type=jnp.float32, precision=_HIGHEST)


# ------------------------------ Pallas kernel --------------------------------
def qp_kernel(scal_ref, data_ref, mlp_ref, slab16_ref, slab128_ref, out_ref,
              *, minor_precision):
    # big-magnitude AMA dots stay at HIGHEST; small 16/32-wide dots use the
    # (validated) cheaper precision.
    def dot_hi(a, b):
        return jnp.dot(a, b, preferred_element_type=jnp.float32,
                       precision=_HIGHEST)

    def dot_lo(a, b):
        return jnp.dot(a, b, preferred_element_type=jnp.float32,
                       precision=minor_precision)

    inp = data_ref[0:NUM_BATCH, :]                          # (B, D_IN)
    steer_samples = data_ref[NUM_BATCH:2 * NUM_BATCH, :]    # (B, NVAR)

    # ---- mlp_init(inp): lane-aligned lamda / s heads ----
    h = jnp.maximum(dot_lo(inp, mlp_ref[MLP_W1:MLP_W1 + D_IN, :])
                    + mlp_ref[MLP_B1:MLP_B1 + 1, :], 0.0)
    lamda0 = (dot_lo(h, slab16_ref[S16_W2L:S16_W2L + HIDDEN, :])
              + slab16_ref[S16_B2L:S16_B2L + 1, :])
    s = jnp.maximum(dot_lo(h, slab128_ref[S128_W2S:S128_W2S + HIDDEN, :])
                    + slab128_ref[S128_B2S:S128_B2S + 1, :], 0.0)

    # ---- b_control / b_eq built in-kernel from SMEM scalars + signed masks ----
    # scal = [steer_init, steer_max, steer_min, sdot_max, sdot_min, sddot_max, sddot_min, 0]
    masks = slab128_ref[S128_MASK:S128_MASK + 8, :]          # (8, NC_PAD), one vreg
    b_control = (scal_ref[1] * masks[0:1, :] + scal_ref[2] * masks[1:2, :]
                 + scal_ref[3] * masks[2:3, :] + scal_ref[4] * masks[3:4, :]
                 + scal_ref[5] * masks[4:5, :] + scal_ref[6] * masks[5:6, :])  # (1, NC_PAD)
    # b_eq * (r @ A^T)  (b_eq = steer_init, same for every batch row)
    ax_const = scal_ref[0] * slab128_ref[S128_RAX:S128_RAX + 1, :]             # (1, NC_PAD)

    # ---- startup: ax_0 = q0 @ (M A^T) + d0 @ (rho A M A^T) + b_eq (r A^T) ----
    # rho_projection == 1.0 and rho are folded offline into the slabs.
    q0 = lamda0 + steer_samples
    d0 = b_control - s
    ax = (dot_lo(q0, slab128_ref[S128_MA:S128_MA + NVAR, :])
          + dot_hi(d0, slab128_ref[S128_AMA:S128_AMA + NC_PAD, :])
          + ax_const)

    res_cols, fix_cols = [], []

    # maxiter = 5 fixed-point iterations (statically unrolled).  Only the AMA
    # matmul below is on the loop-carried critical path.
    for it in range(MAXITER):
        s_new = jnp.maximum(b_control - ax, 0.0)
        res_vec = ax - b_control + s_new
        res_cols.append(jnp.sqrt(jnp.sum(res_vec * res_vec, axis=1,
                                         keepdims=True)))
        # lamda_{n+1} - lamda_n = -res_vec @ (rho*A); only its norm is needed,
        # so this 16-wide dot is off the carried path.
        dl = dot_lo(res_vec, slab16_ref[S16_A:S16_A + NC_PAD, :])
        ds = s - s_new
        fix_cols.append(jnp.sqrt(jnp.sum(ds * ds, axis=1, keepdims=True))
                        + jnp.sqrt(jnp.sum(dl * dl, axis=1, keepdims=True)))
        if it < MAXITER - 1:
            # ax_{n+1} = ax_n + ((s_n - s_{n+1}) - res_vec_n) @ (rho*AMA)
            ax = ax + dot_hi(ds - res_vec,
                             slab128_ref[S128_AMA:S128_AMA + NC_PAD, :])
        s = s_new

    res_primal = jnp.concatenate(res_cols, axis=1)           # (B, MAXITER)
    res_fixed = jnp.concatenate(fix_cols, axis=1)            # (B, MAXITER)
    acc_p = jnp.sum(res_primal, axis=1, keepdims=True) * (1.0 / MAXITER)
    acc_f = jnp.sum(res_fixed, axis=1, keepdims=True) * (1.0 / MAXITER)

    # steer_projected == ax[:, :NVAR] because the first NVAR rows of A_control
    # are the identity (A @ steer_projected keeps steer_projected in lanes 0:16).
    out_ref[...] = jnp.concatenate(
        [ax[:, :NVAR], res_primal, res_fixed, acc_p, acc_f,
         jnp.zeros((NUM_BATCH, OUT_PAD), jnp.float32)], axis=1)


# ------------------------------ constant setup -------------------------------
def build_constants():
    """Constant QP matrices + offline-folded products (float64 -> float32)."""
    p_steer = np.eye(NUM)
    p_steerdot = np.diff(p_steer, axis=0) / T
    p_steerddot = np.diff(p_steerdot, axis=0) / T
    a_eq = p_steer[0].reshape(1, NUM)
    a_control = np.vstack((p_steer, -p_steer,
                           p_steerdot, -p_steerdot,
                           p_steerddot, -p_steerddot))           # (NC, NVAR)

    cost = RHO_PROJ * np.eye(NUM) + RHO * a_control.T @ a_control
    cost_mat = np.block([[cost, a_eq.T],
                         [a_eq, np.zeros((1, 1))]])              # (NVAR+1, NVAR+1)
    # TODO(synk): torch.linalg.solve on the constant cost_mat is replaced by a
    # precomputed inverse whose blocks are folded into the kernel's constants.
    cost_inv_t = np.linalg.inv(cost_mat).T

    m_block = cost_inv_t[:NVAR, :NVAR]                           # (NVAR, NVAR)
    r_row = cost_inv_t[NVAR:NVAR + 1, :NVAR]                     # (1, NVAR)
    a_pad = np.zeros((NC_PAD, NVAR))
    a_pad[:NC] = a_control
    m_a = m_block @ a_pad.T                                      # (NVAR, NC_PAD)
    a_m_a = a_pad @ m_a                                          # (NC_PAD, NC_PAD)
    r_ax = r_row @ a_pad.T                                       # (1, NC_PAD)

    f32 = lambda x: np.asarray(x, np.float32)
    folded = dict(a_pad=f32(a_pad), m_a=f32(m_a), a_m_a=f32(a_m_a),
                  r_ax=f32(r_ax))
    return f32(a_control), f32(cost_inv_t), folded


def build_bound_masks():
    """Signed indicator rows so b_control = sum_j scalar_j * mask_j in-kernel."""
    m = np.zeros((8, NC_PAD), np.float32)
    off = 0
    for row, n, sgn in ((0, NUM, 1.0), (1, NUM, -1.0),
                        (2, NUM_STEERDOT, 1.0), (3, NUM_STEERDOT, -1.0),
                        (4, NUM_STEERDDOT, 1.0), (5, NUM_STEERDDOT, -1.0)):
        m[row, off:off + n] = sgn
        off += n
    assert off == NC
    return m


def build_kernel_slabs(folded, w1, b1, w2, b2):
    """Pack MLP weights + folded QP constants into three lane-grouped slabs."""
    w1 = np.asarray(w1, np.float32)
    b1 = np.asarray(b1, np.float32)
    w2 = np.asarray(w2, np.float32)
    b2 = np.asarray(b2, np.float32)

    mlp_slab = np.zeros((MLP_ROWS, HIDDEN), np.float32)
    mlp_slab[MLP_W1:MLP_W1 + D_IN] = w1
    mlp_slab[MLP_B1] = b1[0]

    slab16 = np.zeros((S16_ROWS, NVAR), np.float32)
    slab16[S16_W2L:S16_W2L + HIDDEN] = w2[:, :NVAR]
    slab16[S16_A:S16_A + NC_PAD] = RHO * folded["a_pad"]       # rho folded offline
    slab16[S16_B2L] = b2[0, :NVAR]

    slab128 = np.zeros((S128_ROWS, NC_PAD), np.float32)
    slab128[S128_W2S:S128_W2S + HIDDEN, :NC] = w2[:, NVAR:]
    slab128[S128_MA:S128_MA + NVAR] = folded["m_a"]
    slab128[S128_AMA:S128_AMA + NC_PAD] = RHO * folded["a_m_a"]  # rho folded offline
    slab128[S128_RAX] = folded["r_ax"][0]
    slab128[S128_B2S, :NC] = b2[0, NVAR:]
    slab128[S128_MASK:S128_MASK + 8] = build_bound_masks()

    # Padding invariants: lanes/rows >= NC must stay exactly zero, otherwise the
    # 128-lane norms / matmuls silently diverge from the 90-constraint reference.
    assert np.all(slab128[S128_W2S:S128_W2S + HIDDEN, NC:] == 0.0)
    assert np.all(slab128[S128_B2S, NC:] == 0.0)
    assert np.all(slab128[S128_MASK:S128_MASK + 8, NC:] == 0.0)
    assert np.all(slab128[S128_RAX, NC:] == 0.0)
    assert np.all(slab16[S16_A + NC:S16_A + NC_PAD] == 0.0)

    return jnp.asarray(mlp_slab), jnp.asarray(slab16), jnp.asarray(slab128)


def build_b_control(steer_max, steer_min, steerdot_max, steerdot_min,
                    steerddot_max, steerddot_min):
    """Reference-only b_control (the kernel builds it from SMEM scalars)."""
    one = jnp.ones
    b_vel = jnp.concatenate([steer_max * one(NUM), -steer_min * one(NUM)])
    b_acc = jnp.concatenate([steerdot_max * one(NUM_STEERDOT),
                             -steerdot_min * one(NUM_STEERDOT)])
    b_jerk = jnp.concatenate([steerddot_max * one(NUM_STEERDDOT),
                              -steerddot_min * one(NUM_STEERDDOT)])
    return jnp.concatenate([b_vel, b_acc, b_jerk]).astype(jnp.float32)[None, :]


def init_mlp_params(key):
    k1, k2 = jax.random.split(key)
    w1 = jax.random.normal(k1, (D_IN, HIDDEN), jnp.float32) * 0.1
    b1 = jnp.zeros((1, HIDDEN), jnp.float32)
    w2 = jax.random.normal(k2, (HIDDEN, OUT_DIM), jnp.float32) * 0.1
    b2 = jnp.zeros((1, OUT_DIM), jnp.float32)
    return w1, b1, w2, b2


# ------------------------------ wrapper / glue --------------------------------
def build_forward(minor_precision):
    kernel = functools.partial(qp_kernel, minor_precision=minor_precision)
    vmem = pl.BlockSpec(memory_space=pltpu.MemorySpace.VMEM)
    smem = pl.BlockSpec(memory_space=pltpu.MemorySpace.SMEM)
    call = pl.pallas_call(
        kernel,
        out_shape=jax.ShapeDtypeStruct((NUM_BATCH, NC_PAD), jnp.float32),
        in_specs=[smem, vmem, vmem, vmem, vmem],
        out_specs=vmem,
    )

    @jax.jit
    def forward(inp, steer_init, steer_samples,
                steer_max, steer_min, steerdot_max, steerdot_min,
                steerddot_max, steerddot_min, median_, iqr_,
                mlp_slab, slab16, slab128):
        # forward(): inp_norm = (inp - median_)/iqr_ is immediately overwritten
        # by inp in the reference module, so the MLP consumes raw inp.
        del median_, iqr_
        scal = jnp.stack([steer_init, steer_max, steer_min,
                          steerdot_max, steerdot_min,
                          steerddot_max, steerddot_min,
                          jnp.float32(0.0)]).astype(jnp.float32)       # SMEM (8,)
        data = jnp.concatenate([inp.astype(jnp.float32),
                                steer_samples.astype(jnp.float32)], axis=0)

        slab = call(scal, data, mlp_slab, slab16, slab128)             # (B, 128)

        # match torch output conventions
        steer_projected = slab[:, OUT_STEER:OUT_STEER + NVAR]          # (B, nvar)
        res_primal = slab[:, OUT_PRIM:OUT_PRIM + MAXITER].T            # (maxiter, B)
        res_fixed = slab[:, OUT_FIX:OUT_FIX + MAXITER].T               # (maxiter, B)
        acc_primal = slab[:, OUT_ACC_P]                                # (B,)
        acc_fixed = slab[:, OUT_ACC_F]                                 # (B,)
        return steer_projected, res_primal, res_fixed, acc_primal, acc_fixed

    return forward


# --------------------------- pure-JAX reference -------------------------------
def reference_forward(inp, steer_init, steer_samples,
                      steer_max, steer_min, steerdot_max, steerdot_min,
                      steerddot_max, steerddot_min,
                      w1, b1, w2, b2, a_control, cost_inv_t):
    a_control = jnp.asarray(a_control)
    cost_inv_t = jnp.asarray(cost_inv_t)
    h = jnp.maximum(_dot_ref(inp, w1) + b1, 0.0)
    out = _dot_ref(h, w2) + b2
    lamda = out[:, :NVAR]
    s = jnp.maximum(out[:, NVAR:NVAR + NC], 0.0)

    b_eq = steer_init * jnp.ones((NUM_BATCH, 1), jnp.float32)
    b_control = build_b_control(steer_max, steer_min, steerdot_max,
                                steerdot_min, steerddot_max, steerddot_min)

    primal_list, fixed_list = [], []
    steer_proj = jnp.zeros((NUM_BATCH, NVAR), jnp.float32)
    for _ in range(MAXITER):
        lamda_prev, s_prev = lamda, s
        b_control_aug = b_control - s
        lincost = (-lamda - RHO_PROJ * steer_samples
                   - RHO * _dot_ref(b_control_aug, a_control))
        rhs = jnp.concatenate([-lincost, b_eq], axis=1)
        sol = _dot_ref(rhs, cost_inv_t)
        steer_proj = sol[:, :NVAR]
        ax = _dot_ref(steer_proj, a_control.T)
        s = jnp.maximum(jnp.zeros_like(ax), -ax + b_control)
        res_vec = ax - b_control + s
        res_norm = jnp.linalg.norm(res_vec, axis=1)
        lamda = lamda - RHO * _dot_ref(res_vec, a_control)
        fixed = (jnp.linalg.norm(s_prev - s, axis=1)
                 + jnp.linalg.norm(lamda_prev - lamda, axis=1))
        primal_list.append(res_norm)
        fixed_list.append(fixed)

    res_primal_stack = jnp.stack(primal_list)
    res_fixed_stack = jnp.stack(fixed_list)
    return (steer_proj, res_primal_stack, res_fixed_stack,
            jnp.sum(res_primal_stack, axis=0) / MAXITER,
            jnp.sum(res_fixed_stack, axis=0) / MAXITER)


def _outputs_match(outs, refs, rtol=1e-3, atol=1e-3):
    for got, want in zip(outs, refs):
        if got.shape != want.shape:
            return False
        if not bool(jnp.allclose(got, want, rtol=rtol, atol=atol)):
            return False
    return True


# ---------------------------------- main --------------------------------------
if __name__ == "__main__":
    key = jax.random.PRNGKey(0)
    k_mlp, k_inp, k_samp = jax.random.split(key, 3)

    w1, b1, w2, b2 = init_mlp_params(k_mlp)
    a_control, cost_inv_t, folded = build_constants()
    mlp_slab, slab16, slab128 = build_kernel_slabs(folded, w1, b1, w2, b2)

    inp = jax.random.normal(k_inp, (NUM_BATCH, D_IN), jnp.float32)
    steer_samples = 0.3 * jax.random.normal(k_samp, (NUM_BATCH, NUM), jnp.float32)

    steer_init = jnp.float32(0.05)
    steer_max, steer_min = jnp.float32(0.6), jnp.float32(-0.6)
    steerdot_max, steerdot_min = jnp.float32(0.3), jnp.float32(-0.3)
    steerddot_max, steerddot_min = jnp.float32(0.2), jnp.float32(-0.2)
    median_ = jnp.zeros((1, D_IN), jnp.float32)
    iqr_ = jnp.ones((1, D_IN), jnp.float32)

    args = (inp, steer_init, steer_samples,
            steer_max, steer_min, steerdot_max, steerdot_min,
            steerddot_max, steerddot_min, median_, iqr_,
            mlp_slab, slab16, slab128)

    refs = jax.block_until_ready(reference_forward(
        inp, steer_init, steer_samples,
        steer_max, steer_min, steerdot_max, steerdot_min,
        steerddot_max, steerddot_min,
        w1, b1, w2, b2, a_control, cost_inv_t))

    # Fast path: Precision.HIGH on the small 16/32-wide dots (AMA dots stay at
    # HIGHEST).  If the Pallas lowering rejects HIGH, or accuracy drifts past
    # 1e-3 vs the f32 reference, fall back to HIGHEST everywhere.  The fallback
    # is asserted against the reference, so a genuine kernel bug still fails
    # loudly instead of being hidden by the fast-path try/except.
    outs = None
    try:
        candidate = jax.block_until_ready(
            build_forward(jax.lax.Precision.HIGH)(*args))
        if _outputs_match(candidate, refs):
            outs = candidate
    except Exception:
        outs = None
    if outs is None:
        outs = jax.block_until_ready(
            build_forward(jax.lax.Precision.HIGHEST)(*args))
        assert _outputs_match(outs, refs), \
            "Pallas kernel does not match the f32 reference"

    print("KERNEL_OK")
</pallas_src>

<mosaic_0001>
module attributes {stable_mosaic.version = 11 : i64} {
  func.func @qp_kernel(%arg0: memref<8xf32, #tpu.memory_space<smem>>, %arg1: memref<16x16xf32, #tpu.memory_space<vmem>>, %arg2: memref<17x32xf32, #tpu.memory_space<vmem>>, %arg3: memref<161x16xf32, #tpu.memory_space<vmem>>, %arg4: memref<200x128xf32, #tpu.memory_space<vmem>>, %arg5: memref<8x128xf32, #tpu.memory_space<vmem>>) attributes {dimension_semantics = [], scalar_prefetch = 0 : i64, scratch_operands = 0 : i64, tpu.core_type = #tpu.core_type<tc>} {
    %c0 = arith.constant 0 : index
    %c0_0 = arith.constant 0 : index
    %0 = vector.load %arg1[%c0, %c0_0] : memref<16x16xf32, #tpu.memory_space<vmem>>, vector<8x16xf32>
    %c8 = arith.constant 8 : index
    %c0_1 = arith.constant 0 : index
    %1 = vector.load %arg1[%c8, %c0_1] : memref<16x16xf32, #tpu.memory_space<vmem>>, vector<8x16xf32>
    %c0_2 = arith.constant 0 : index
    %c0_3 = arith.constant 0 : index
    %2 = vector.load %arg2[%c0_2, %c0_3] : memref<17x32xf32, #tpu.memory_space<vmem>>, vector<16x32xf32>
    %cst = arith.constant dense<0.000000e+00> : vector<8x32xf32>
    %3 = tpu.matmul %0, %2, %cst {dimension_numbers = #tpu.dot_dimension_numbers<[1], [0], [0], [1], [0, 0, 1, 1], [], []>, precision = #tpu.contract_precision<fp32>} : vector<8x16xf32>, vector<16x32xf32>, vector<8x32xf32> -> vector<8x32xf32>
    %c16 = arith.constant 16 : index
    %c0_4 = arith.constant 0 : index
    %4 = vector.load %arg2[%c16, %c0_4] : memref<17x32xf32, #tpu.memory_space<vmem>>, vector<1x32xf32>
    %5 = vector.broadcast %4 : vector<1x32xf32> to vector<8x32xf32>
    %6 = arith.addf %3, %5 : vector<8x32xf32>
    %cst_5 = arith.constant 0.000000e+00 : f32
    %7 = vector.broadcast %cst_5 : f32 to vector<8x32xf32>
    %8 = arith.maximumf %6, %7 : vector<8x32xf32>
    %c0_6 = arith.constant 0 : index
    %c0_7 = arith.constant 0 : index
    %9 = vector.load %arg3[%c0_6, %c0_7] : memref<161x16xf32, #tpu.memory_space<vmem>>, vector<32x16xf32>
    %cst_8 = arith.constant dense<0.000000e+00> : vector<8x16xf32>
    %10 = tpu.matmul %8, %9, %cst_8 {dimension_numbers = #tpu.dot_dimension_numbers<[1], [0], [0], [1], [0, 0, 1, 1], [], []>, precision = #tpu.contract_precision<fp32>} : vector<8x32xf32>, vector<32x16xf32>, vector<8x16xf32> -> vector<8x16xf32>
    %c160 = arith.constant 160 : index
    %c0_9 = arith.constant 0 : index
    %11 = vector.load %arg3[%c160, %c0_9] : memref<161x16xf32, #tpu.memory_space<vmem>>, vector<1x16xf32>
    %12 = vector.broadcast %11 : vector<1x16xf32> to vector<8x16xf32>
    %13 = arith.addf %10, %12 : vector<8x16xf32>
    %c0_10 = arith.constant 0 : index
    %c0_11 = arith.constant 0 : index
    %14 = vector.load %arg4[%c0_10, %c0_11] : memref<200x128xf32, #tpu.memory_space<vmem>>, vector<32x128xf32>
    %cst_12 = arith.constant dense<0.000000e+00> : vector<8x128xf32>
    %15 = tpu.matmul %8, %14, %cst_12 {dimension_numbers = #tpu.dot_dimension_numbers<[1], [0], [0], [1], [0, 0, 1, 1], [], []>, precision = #tpu.contract_precision<fp32>} : vector<8x32xf32>, vector<32x128xf32>, vector<8x128xf32> -> vector<8x128xf32>
    %c184 = arith.constant 184 : index
    %c0_13 = arith.constant 0 : index
    %16 = vector.load %arg4[%c184, %c0_13] : memref<200x128xf32, #tpu.memory_space<vmem>>, vector<1x128xf32>
    %17 = vector.broadcast %16 : vector<1x128xf32> to vector<8x128xf32>
    %18 = arith.addf %15, %17 : vector<8x128xf32>
    %cst_14 = arith.constant 0.000000e+00 : f32
    %19 = vector.broadcast %cst_14 : f32 to vector<8x128xf32>
    %20 = arith.maximumf %18, %19 : vector<8x128xf32>
    %c192 = arith.constant 192 : index
    %c0_15 = arith.constant 0 : index
    %21 = vector.load %arg4[%c192, %c0_15] : memref<200x128xf32, #tpu.memory_space<vmem>>, vector<8x128xf32>
    %c1 = arith.constant 1 : index
    %22 = memref.load %arg0[%c1] : memref<8xf32, #tpu.memory_space<smem>>
    %23 = vector.extract_strided_slice %21 {offsets = [0, 0], sizes = [1, 128], strides = [1, 1]} : vector<8x128xf32> to vector<1x128xf32>
    %24 = vector.broadcast %22 : f32 to vector<1x128xf32>
    %25 = arith.mulf %24, %23 : vector<1x128xf32>
    %c2 = arith.constant 2 : index
    %26 = memref.load %arg0[%c2] : memref<8xf32, #tpu.memory_space<smem>>
    %27 = vector.extract_strided_slice %21 {offsets = [1, 0], sizes = [1, 128], strides = [1, 1]} : vector<8x128xf32> to vector<1x128xf32>
    %28 = vector.broadcast %26 : f32 to vector<1x128xf32>
    %29 = arith.mulf %28, %27 : vector<1x128xf32>
    %30 = arith.addf %25, %29 : vector<1x128xf32>
    %c3 = arith.constant 3 : index
    %31 = memref.load %arg0[%c3] : memref<8xf32, #tpu.memory_space<smem>>
    %32 = vector.extract_strided_slice %21 {offsets = [2, 0], sizes = [1, 128], strides = [1, 1]} : vector<8x128xf32> to vector<1x128xf32>
    %33 = vector.broadcast %31 : f32 to vector<1x128xf32>
    %34 = arith.mulf %33, %32 : vector<1x128xf32>
    %35 = arith.addf %30, %34 : vector<1x128xf32>
    %c4 = arith.constant 4 : index
    %36 = memref.load %arg0[%c4] : memref<8xf32, #tpu.memory_space<smem>>
    %37 = vector.extract_strided_slice %21 {offsets = [3, 0], sizes = [1, 128], strides = [1, 1]} : vector<8x128xf32> to vector<1x128xf32>
    %38 = vector.broadcast %36 : f32 to vector<1x128xf32>
    %39 = arith.mulf %38, %37 : vector<1x128xf32>
    %40 = arith.addf %35, %39 : vector<1x128xf32>
    %c5 = arith.constant 5 : index
    %41 = memref.load %arg0[%c5] : memref<8xf32, #tpu.memory_space<smem>>
    %42 = vector.extract_strided_slice %21 {offsets = [4, 0], sizes = [1, 128], strides = [1, 1]} : vector<8x128xf32> to vector<1x128xf32>
    %43 = vector.broadcast %41 : f32 to vector<1x128xf32>
    %44 = arith.mulf %43, %42 : vector<1x128xf32>
    %45 = arith.addf %40, %44 : vector<1x128xf32>
    %c6 = arith.constant 6 : index
    %46 = memref.load %arg0[%c6] : memref<8xf32, #tpu.memory_space<smem>>
    %47 = vector.extract_strided_slice %21 {offsets = [5, 0], sizes = [1, 128], strides = [1, 1]} : vector<8x128xf32> to vector<1x128xf32>
    %48 = vector.broadcast %46 : f32 to vector<1x128xf32>
    %49 = arith.mulf %48, %47 : vector<1x128xf32>
    %50 = arith.addf %45, %49 : vector<1x128xf32>
    %c0_16 = arith.constant 0 : index
    %51 = memref.load %arg0[%c0_16] : memref<8xf32, #tpu.memory_space<smem>>
    %c176 = arith.constant 176 : index
    %c0_17 = arith.constant 0 : index
    %52 = vector.load %arg4[%c176, %c0_17] : memref<200x128xf32, #tpu.memory_space<vmem>>, vector<1x128xf32>
    %53 = vector.broadcast %51 : f32 to vector<1x128xf32>
    %54 = arith.mulf %53, %52 : vector<1x128xf32>
    %55 = arith.addf %13, %1 : vector<8x16xf32>
    %56 = vector.broadcast %50 : vector<1x128xf32> to vector<8x128xf32>
    %57 = arith.subf %56, %20 : vector<8x128xf32>
    %c32 = arith.constant 32 : index
    %c0_18 = arith.constant 0 : index
    %58 = vector.load %arg4[%c32, %c0_18] : memref<200x128xf32, #tpu.memory_space<vmem>>, vector<16x128xf32>
    %cst_19 = arith.constant dense<0.000000e+00> : vector<8x128xf32>
    %59 = tpu.matmul %55, %58, %cst_19 {dimension_numbers = #tpu.dot_dimension_numbers<[1], [0], [0], [1], [0, 0, 1, 1], [], []>, precision = #tpu.contract_precision<fp32>} : vector<8x16xf32>, vector<16x128xf32>, vector<8x128xf32> -> vector<8x128xf32>
    %c48 = arith.constant 48 : index
    %c0_20 = arith.constant 0 : index
    %60 = vector.load %arg4[%c48, %c0_20] : memref<200x128xf32, #tpu.memory_space<vmem>>, vector<128x128xf32>
    %cst_21 = arith.constant dense<0.000000e+00> : vector<8x128xf32>
    %61 = tpu.matmul %57, %60, %cst_21 {dimension_numbers = #tpu.dot_dimension_numbers<[1], [0], [0], [1], [0, 0, 1, 1], [], []>, precision = #tpu.contract_precision<fp32>} : vector<8x128xf32>, vector<128x128xf32>, vector<8x128xf32> -> vector<8x128xf32>
    %62 = arith.addf %59, %61 : vector<8x128xf32>
    %63 = vector.broadcast %54 : vector<1x128xf32> to vector<8x128xf32>
    %64 = arith.addf %62, %63 : vector<8x128xf32>
    %65 = vector.broadcast %50 : vector<1x128xf32> to vector<8x128xf32>
    %66 = arith.subf %65, %64 : vector<8x128xf32>
    %cst_22 = arith.constant 0.000000e+00 : f32
    %67 = vector.broadcast %cst_22 : f32 to vector<8x128xf32>
    %68 = arith.maximumf %66, %67 : vector<8x128xf32>
    %69 = vector.broadcast %50 : vector<1x128xf32> to vector<8x128xf32>
    %70 = arith.subf %64, %69 : vector<8x128xf32>
    %71 = arith.addf %70, %68 : vector<8x128xf32>
    %72 = arith.mulf %71, %71 : vector<8x128xf32>
    %cst_23 = arith.constant dense<0.000000e+00> : vector<8xf32>
    %73 = vector.multi_reduction <add>, %72, %cst_23 [1] : vector<8x128xf32> to vector<8xf32>
    %74 = vector.shape_cast %73 : vector<8xf32> to vector<8x1xf32>
    %75 = math.sqrt %74 : vector<8x1xf32>
    %c32_24 = arith.constant 32 : index
    %c0_25 = arith.constant 0 : index
    %76 = vector.load %arg3[%c32_24, %c0_25] : memref<161x16xf32, #tpu.memory_space<vmem>>, vector<128x16xf32>
    %cst_26 = arith.constant dense<0.000000e+00> : vector<8x16xf32>
    %77 = tpu.matmul %71, %76, %cst_26 {dimension_numbers = #tpu.dot_dimension_numbers<[1], [0], [0], [1], [0, 0, 1, 1], [], []>, precision = #tpu.contract_precision<fp32>} : vector<8x128xf32>, vector<128x16xf32>, vector<8x16xf32> -> vector<8x16xf32>
    %78 = arith.subf %20, %68 : vector<8x128xf32>
    %79 = arith.mulf %78, %78 : vector<8x128xf32>
    %cst_27 = arith.constant dense<0.000000e+00> : vector<8xf32>
    %80 = vector.multi_reduction <add>, %79, %cst_27 [1] : vector<8x128xf32> to vector<8xf32>
    %81 = vector.shape_cast %80 : vector<8xf32> to vector<8x1xf32>
    %82 = math.sqrt %81 : vector<8x1xf32>
    %83 = arith.mulf %77, %77 : vector<8x16xf32>
    %cst_28 = arith.constant dense<0.000000e+00> : vector<8xf32>
    %84 = vector.multi_reduction <add>, %83, %cst_28 [1] : vector<8x16xf32> to vector<8xf32>
    %85 = vector.shape_cast %84 : vector<8xf32> to vector<8x1xf32>
    %86 = math.sqrt %85 : vector<8x1xf32>
    %87 = arith.addf %82, %86 : vector<8x1xf32>
    %88 = arith.subf %78, %71 : vector<8x128xf32>
    %c48_29 = arith.constant 48 : index
    %c0_30 = arith.constant 0 : index
    %89 = vector.load %arg4[%c48_29, %c0_30] : memref<200x128xf32, #tpu.memory_space<vmem>>, vector<128x128xf32>
    %cst_31 = arith.constant dense<0.000000e+00> : vector<8x128xf32>
    %90 = tpu.matmul %88, %89, %cst_31 {dimension_numbers = #tpu.dot_dimension_numbers<[1], [0], [0], [1], [0, 0, 1, 1], [], []>, precision = #tpu.contract_precision<fp32>} : vector<8x128xf32>, vector<128x128xf32>, vector<8x128xf32> -> vector<8x128xf32>
    %91 = arith.addf %64, %90 : vector<8x128xf32>
    %92 = vector.broadcast %50 : vector<1x128xf32> to vector<8x128xf32>
    %93 = arith.subf %92, %91 : vector<8x128xf32>
    %cst_32 = arith.constant 0.000000e+00 : f32
    %94 = vector.broadcast %cst_32 : f32 to vector<8x128xf32>
    %95 = arith.maximumf %93, %94 : vector<8x128xf32>
    %96 = vector.broadcast %50 : vector<1x128xf32> to vector<8x128xf32>
    %97 = arith.subf %91, %96 : vector<8x128xf32>
    %98 = arith.addf %97, %95 : vector<8x128xf32>
    %99 = arith.mulf %98, %98 : vector<8x128xf32>
    %cst_33 = arith.constant dense<0.000000e+00> : vector<8xf32>
    %100 = vector.multi_reduction <add>, %99, %cst_33 [1] : vector<8x128xf32> to vector<8xf32>
    %101 = vector.shape_cast %100 : vector<8xf32> to vector<8x1xf32>
    %102 = math.sqrt %101 : vector<8x1xf32>
    %c32_34 = arith.constant 32 : index
    %c0_35 = arith.constant 0 : index
    %103 = vector.load %arg3[%c32_34, %c0_35] : memref<161x16xf32, #tpu.memory_space<vmem>>, vector<128x16xf32>
    %cst_36 = arith.constant dense<0.000000e+00> : vector<8x16xf32>
    %104 = tpu.matmul %98, %103, %cst_36 {dimension_numbers = #tpu.dot_dimension_numbers<[1], [0], [0], [1], [0, 0, 1, 1], [], []>, precision = #tpu.contract_precision<fp32>} : vector<8x128xf32>, vector<128x16xf32>, vector<8x16xf32> -> vector<8x16xf32>
    %105 = arith.subf %68, %95 : vector<8x128xf32>
    %106 = arith.mulf %105, %105 : vector<8x128xf32>
    %cst_37 = arith.constant dense<0.000000e+00> : vector<8xf32>
    %107 = vector.multi_reduction <add>, %106, %cst_37 [1] : vector<8x128xf32> to vector<8xf32>
    %108 = vector.shape_cast %107 : vector<8xf32> to vector<8x1xf32>
    %109 = math.sqrt %108 : vector<8x1xf32>
    %110 = arith.mulf %104, %104 : vector<8x16xf32>
    %cst_38 = arith.constant dense<0.000000e+00> : vector<8xf32>
    %111 = vector.multi_reduction <add>, %110, %cst_38 [1] : vector<8x16xf32> to vector<8xf32>
    %112 = vector.shape_cast %111 : vector<8xf32> to vector<8x1xf32>
    %113 = math.sqrt %112 : vector<8x1xf32>
    %114 = arith.addf %109, %113 : vector<8x1xf32>
    %115 = arith.subf %105, %98 : vector<8x128xf32>
    %c48_39 = arith.constant 48 : index
    %c0_40 = arith.constant 0 : index
    %116 = vector.load %arg4[%c48_39, %c0_40] : memref<200x128xf32, #tpu.memory_space<vmem>>, vector<128x128xf32>
    %cst_41 = arith.constant dense<0.000000e+00> : vector<8x128xf32>
    %117 = tpu.matmul %115, %116, %cst_41 {dimension_numbers = #tpu.dot_dimension_numbers<[1], [0], [0], [1], [0, 0, 1, 1], [], []>, precision = #tpu.contract_precision<fp32>} : vector<8x128xf32>, vector<128x128xf32>, vector<8x128xf32> -> vector<8x128xf32>
    %118 = arith.addf %91, %117 : vector<8x128xf32>
    %119 = vector.broadcast %50 : vector<1x128xf32> to vector<8x128xf32>
    %120 = arith.subf %119, %118 : vector<8x128xf32>
    %cst_42 = arith.constant 0.000000e+00 : f32
    %121 = vector.broadcast %cst_42 : f32 to vector<8x128xf32>
    %122 = arith.maximumf %120, %121 : vector<8x128xf32>
    %123 = vector.broadcast %50 : vector<1x128xf32> to vector<8x128xf32>
    %124 = arith.subf %118, %123 : vector<8x128xf32>
    %125 = arith.addf %124, %122 : vector<8x128xf32>
    %126 = arith.mulf %125, %125 : vector<8x128xf32>
    %cst_43 = arith.constant dense<0.000000e+00> : vector<8xf32>
    %127 = vector.multi_reduction <add>, %126, %cst_43 [1] : vector<8x128xf32> to vector<8xf32>
    %128 = vector.shape_cast %127 : vector<8xf32> to vector<8x1xf32>
    %129 = math.sqrt %128 : vector<8x1xf32>
    %c32_44 = arith.constant 32 : index
    %c0_45 = arith.constant 0 : index
    %130 = vector.load %arg3[%c32_44, %c0_45] : memref<161x16xf32, #tpu.memory_space<vmem>>, vector<128x16xf32>
    %cst_46 = arith.constant dense<0.000000e+00> : vector<8x16xf32>
    %131 = tpu.matmul %125, %130, %cst_46 {dimension_numbers = #tpu.dot_dimension_numbers<[1], [0], [0], [1], [0, 0, 1, 1], [], []>, precision = #tpu.contract_precision<fp32>} : vector<8x128xf32>, vector<128x16xf32>, vector<8x16xf32> -> vector<8x16xf32>
    %132 = arith.subf %95, %122 : vector<8x128xf32>
    %133 = arith.mulf %132, %132 : vector<8x128xf32>
    %cst_47 = arith.constant dense<0.000000e+00> : vector<8xf32>
    %134 = vector.multi_reduction <add>, %133, %cst_47 [1] : vector<8x128xf32> to vector<8xf32>
    %135 = vector.shape_cast %134 : vector<8xf32> to vector<8x1xf32>
    %136 = math.sqrt %135 : vector<8x1xf32>
    %137 = arith.mulf %131, %131 : vector<8x16xf32>
    %cst_48 = arith.constant dense<0.000000e+00> : vector<8xf32>
    %138 = vector.multi_reduction <add>, %137, %cst_48 [1] : vector<8x16xf32> to vector<8xf32>
    %139 = vector.shape_cast %138 : vector<8xf32> to vector<8x1xf32>
    %140 = math.sqrt %139 : vector<8x1xf32>
    %141 = arith.addf %136, %140 : vector<8x1xf32>
    %142 = arith.subf %132, %125 : vector<8x128xf32>
    %c48_49 = arith.constant 48 : index
    %c0_50 = arith.constant 0 : index
    %143 = vector.load %arg4[%c48_49, %c0_50] : memref<200x128xf32, #tpu.memory_space<vmem>>, vector<128x128xf32>
    %cst_51 = arith.constant dense<0.000000e+00> : vector<8x128xf32>
    %144 = tpu.matmul %142, %143, %cst_51 {dimension_numbers = #tpu.dot_dimension_numbers<[1], [0], [0], [1], [0, 0, 1, 1], [], []>, precision = #tpu.contract_precision<fp32>} : vector<8x128xf32>, vector<128x128xf32>, vector<8x128xf32> -> vector<8x128xf32>
    %145 = arith.addf %118, %144 : vector<8x128xf32>
    %146 = vector.broadcast %50 : vector<1x128xf32> to vector<8x128xf32>
    %147 = arith.subf %146, %145 : vector<8x128xf32>
    %cst_52 = arith.constant 0.000000e+00 : f32
    %148 = vector.broadcast %cst_52 : f32 to vector<8x128xf32>
    %149 = arith.maximumf %147, %148 : vector<8x128xf32>
    %150 = vector.broadcast %50 : vector<1x128xf32> to vector<8x128xf32>
    %151 = arith.subf %145, %150 : vector<8x128xf32>
    %152 = arith.addf %151, %149 : vector<8x128xf32>
    %153 = arith.mulf %152, %152 : vector<8x128xf32>
    %cst_53 = arith.constant dense<0.000000e+00> : vector<8xf32>
    %154 = vector.multi_reduction <add>, %153, %cst_53 [1] : vector<8x128xf32> to vector<8xf32>
    %155 = vector.shape_cast %154 : vector<8xf32> to vector<8x1xf32>
    %156 = math.sqrt %155 : vector<8x1xf32>
    %c32_54 = arith.constant 32 : index
    %c0_55 = arith.constant 0 : index
    %157 = vector.load %arg3[%c32_54, %c0_55] : memref<161x16xf32, #tpu.memory_space<vmem>>, vector<128x16xf32>
    %cst_56 = arith.constant dense<0.000000e+00> : vector<8x16xf32>
    %158 = tpu.matmul %152, %157, %cst_56 {dimension_numbers = #tpu.dot_dimension_numbers<[1], [0], [0], [1], [0, 0, 1, 1], [], []>, precision = #tpu.contract_precision<fp32>} : vector<8x128xf32>, vector<128x16xf32>, vector<8x16xf32> -> vector<8x16xf32>
    %159 = arith.subf %122, %149 : vector<8x128xf32>
    %160 = arith.mulf %159, %159 : vector<8x128xf32>
    %cst_57 = arith.constant dense<0.000000e+00> : vector<8xf32>
    %161 = vector.multi_reduction <add>, %160, %cst_57 [1] : vector<8x128xf32> to vector<8xf32>
    %162 = vector.shape_cast %161 : vector<8xf32> to vector<8x1xf32>
    %163 = math.sqrt %162 : vector<8x1xf32>
    %164 = arith.mulf %158, %158 : vector<8x16xf32>
    %cst_58 = arith.constant dense<0.000000e+00> : vector<8xf32>
    %165 = vector.multi_reduction <add>, %164, %cst_58 [1] : vector<8x16xf32> to vector<8xf32>
    %166 = vector.shape_cast %165 : vector<8xf32> to vector<8x1xf32>
    %167 = math.sqrt %166 : vector<8x1xf32>
    %168 = arith.addf %163, %167 : vector<8x1xf32>
    %169 = arith.subf %159, %152 : vector<8x128xf32>
    %c48_59 = arith.constant 48 : index
    %c0_60 = arith.constant 0 : index
    %170 = vector.load %arg4[%c48_59, %c0_60] : memref<200x128xf32, #tpu.memory_space<vmem>>, vector<128x128xf32>
    %cst_61 = arith.constant dense<0.000000e+00> : vector<8x128xf32>
    %171 = tpu.matmul %169, %170, %cst_61 {dimension_numbers = #tpu.dot_dimension_numbers<[1], [0], [0], [1], [0, 0, 1, 1], [], []>, precision = #tpu.contract_precision<fp32>} : vector<8x128xf32>, vector<128x128xf32>, vector<8x128xf32> -> vector<8x128xf32>
    %172 = arith.addf %145, %171 : vector<8x128xf32>
    %173 = vector.broadcast %50 : vector<1x128xf32> to vector<8x128xf32>
    %174 = arith.subf %173, %172 : vector<8x128xf32>
    %cst_62 = arith.constant 0.000000e+00 : f32
    %175 = vector.broadcast %cst_62 : f32 to vector<8x128xf32>
    %176 = arith.maximumf %174, %175 : vector<8x128xf32>
    %177 = vector.broadcast %50 : vector<1x128xf32> to vector<8x128xf32>
    %178 = arith.subf %172, %177 : vector<8x128xf32>
    %179 = arith.addf %178, %176 : vector<8x128xf32>
    %180 = arith.mulf %179, %179 : vector<8x128xf32>
    %cst_63 = arith.constant dense<0.000000e+00> : vector<8xf32>
    %181 = vector.multi_reduction <add>, %180, %cst_63 [1] : vector<8x128xf32> to vector<8xf32>
    %182 = vector.shape_cast %181 : vector<8xf32> to vector<8x1xf32>
    %183 = math.sqrt %182 : vector<8x1xf32>
    %c32_64 = arith.constant 32 : index
    %c0_65 = arith.constant 0 : index
    %184 = vector.load %arg3[%c32_64, %c0_65] : memref<161x16xf32, #tpu.memory_space<vmem>>, vector<128x16xf32>
    %cst_66 = arith.constant dense<0.000000e+00> : vector<8x16xf32>
    %185 = tpu.matmul %179, %184, %cst_66 {dimension_numbers = #tpu.dot_dimension_numbers<[1], [0], [0], [1], [0, 0, 1, 1], [], []>, precision = #tpu.contract_precision<fp32>} : vector<8x128xf32>, vector<128x16xf32>, vector<8x16xf32> -> vector<8x16xf32>
    %186 = arith.subf %149, %176 : vector<8x128xf32>
    %187 = arith.mulf %186, %186 : vector<8x128xf32>
    %cst_67 = arith.constant dense<0.000000e+00> : vector<8xf32>
    %188 = vector.multi_reduction <add>, %187, %cst_67 [1] : vector<8x128xf32> to vector<8xf32>
    %189 = vector.shape_cast %188 : vector<8xf32> to vector<8x1xf32>
    %190 = math.sqrt %189 : vector<8x1xf32>
    %191 = arith.mulf %185, %185 : vector<8x16xf32>
    %cst_68 = arith.constant dense<0.000000e+00> : vector<8xf32>
    %192 = vector.multi_reduction <add>, %191, %cst_68 [1] : vector<8x16xf32> to vector<8xf32>
    %193 = vector.shape_cast %192 : vector<8xf32> to vector<8x1xf32>
    %194 = math.sqrt %193 : vector<8x1xf32>
    %195 = arith.addf %190, %194 : vector<8x1xf32>
    %196 = tpu.concatenate %75, %102, %129, %156, %183 in 1 : vector<8x1xf32>, vector<8x1xf32>, vector<8x1xf32>, vector<8x1xf32>, vector<8x1xf32> -> vector<8x5xf32>
    %197 = tpu.concatenate %87, %114, %141, %168, %195 in 1 : vector<8x1xf32>, vector<8x1xf32>, vector<8x1xf32>, vector<8x1xf32>, vector<8x1xf32> -> vector<8x5xf32>
    %cst_69 = arith.constant dense<0.000000e+00> : vector<8xf32>
    %198 = vector.multi_reduction <add>, %196, %cst_69 [1] : vector<8x5xf32> to vector<8xf32>
    %199 = vector.shape_cast %198 : vector<8xf32> to vector<8x1xf32>
    %cst_70 = arith.constant 2.000000e-01 : f32
    %200 = vector.broadcast %cst_70 : f32 to vector<8x1xf32>
    %201 = arith.mulf %199, %200 : vector<8x1xf32>
    %cst_71 = arith.constant dense<0.000000e+00> : vector<8xf32>
    %202 = vector.multi_reduction <add>, %197, %cst_71 [1] : vector<8x5xf32> to vector<8xf32>
    %203 = vector.shape_cast %202 : vector<8xf32> to vector<8x1xf32>
    %cst_72 = arith.constant 2.000000e-01 : f32
    %204 = vector.broadcast %cst_72 : f32 to vector<8x1xf32>
    %205 = arith.mulf %203, %204 : vector<8x1xf32>
    %206 = vector.extract_strided_slice %172 {offsets = [0, 0], sizes = [8, 16], strides = [1, 1]} : vector<8x128xf32> to vector<8x16xf32>
    %cst_73 = arith.constant 0.000000e+00 : f32
    %207 = vector.broadcast %cst_73 : f32 to vector<8x100xf32>
    %208 = tpu.concatenate %206, %196, %197, %201, %205, %207 in 1 : vector<8x16xf32>, vector<8x5xf32>, vector<8x5xf32>, vector<8x1xf32>, vector<8x1xf32>, vector<8x100xf32> -> vector<8x128xf32>
    %c0_74 = arith.constant 0 : index
    %c0_75 = arith.constant 0 : index
    %209 = vector.load %arg5[%c0_74, %c0_75] : memref<8x128xf32, #tpu.memory_space<vmem>>, vector<8x128xf32>
    tpu.vector_store %arg5[%c0_74, %c0_75], %208 {strides = array<i32>} : memref<8x128xf32, #tpu.memory_space<vmem>>, vector<8x128xf32>,
    return
  }
}

</mosaic_0001>

<bundles_post_ra>
// kernel: forward.1
= control target key start
LH: loop header
LB: loop body
LE: loop exit
PB: predicated region body
PF: predicated region fallthrough
CT: control target
= control target key end

     0   :  { %10 = vsyncpa [#allocation3], 0  ;;  %s16082_s0 = inlined_call_operand.vmem [shape: f32[8], index: 0, kind: input, shape index: {}]   ;;  %s16083_s1 = inlined_call_operand.vmem [shape: f32[16,16], index: 1, kind: input, shape index: {}]   ;;  %s16084_s2 = inlined_call_operand.vmem [shape: f32[17,32], index: 2, kind: input, shape index: {}]   ;;  %s16085_s3 = inlined_call_operand.vmem [shape: f32[161,16], index: 3, kind: input, shape index: {}]   ;;  %s16086_s4 = inlined_call_operand.vmem [shape: f32[200,128], index: 4, kind: input, shape index: {}]   ;;  %s16087_s5 = inlined_call_operand.vmem [shape: f32[8,128], index: 5, kind: output, shape index: {}]  }
   0x1   :  { %s17_s20 = sshll.u32 %s16082_s0, 4  ;;  %s18_s20 = int_to_ptr.vmem [resolvable:$true] %s17_s20 }
   0x2   :  { %s13793_s21 = scalar_lea.vmem %s18_s20, 16  ;;  %p13798_p1 = scmp.lt.s32.totalorder %s18_s20, %s18_s20 }
   0x3   :  { %p13794_p0 = scmp.ne.s32.totalorder %s18_s20, %s13793_s21  ;;  %p13799_p2 = scmp.lt.s32.totalorder %s13793_s21, %s13793_s21 }
   0x5   :  { %p13800_p3 = por %p13799_p2, %p13798_p1 }
   0x7   :  { %p13801_p4 = pnand %p13800_p3, %p13794_p0 }
   0x9   :  { %13804 = shalt.err (!%p13801_p4)
}
   0xa   :  { %s13807_s22 = smov [#allocation2]  }
   0xb   :  { %20 = dma.vmem_to_smem %s18_s20, 16, %s13807_s22, [#allocation3]  }
   0xc   :  { %13805 = dma.done.wait [#allocation3], 16  }
   0xd   :  { %13806 = vsyncadd [#allocation3], 4294967280 }
   0xe   :  { %32 = sfence }
   0xf   :  { %v35_v0 = vld [vmem:[%s16084_s2] sm:$0xff]  ;;  %v36_v1 = vld [vmem:[%s16084_s2 + $0x8] sm:$0xff]  ;;  %v16104_v3 = vmov 0.0|0.0   ;;  %vm13809_vm0 = vmmov 0   ;;  %v16106_v6 = vmov 0.0   ;;  %vm42_vm1 = vcmask 130048  }
  0x10   :  { %v33_v2 = vld [vmem:[%s16083_s1] sm:$0xff]  ;;  %12137 = vmatprep.subr.bf16.mxu0 %v16104_v3  ;;  %v47_v4 = vand.u32 4294901760, %v35_v0  ;;  %v50_v5 = vand.u32 4294901760, %v36_v1  ;;  %9825 = vmatprep.mubr.msk.f32.mxu0 %vm13809_vm0, %v16106_v6  ;;  %v507_v26 = vld [vmem:[%s16085_s3 + $0x8] sm:$0xff]  ;;  %v508_v30 = vld [vmem:[%s16085_s3 + $0x10] sm:$0xff]  ;;  %vm515_vm2 = vcmask 261120  }
  0x11   :  { %v44_v7 = vsel %vm42_vm1, %v33_v2, 0  ;;  %12155 = vmatprep.subr.bf16.mxu1 %v16104_v3  ;;  %9871 = vmatprep.mubr.msk.f32.mxu1 %vm13809_vm0, %v16106_v6  ;;  %v506_v25 = vld [vmem:[%s16085_s3] sm:$0xff]  ;;  %v523_v28 = vand.u32 4294901760, %v507_v26  ;;  %v509_v31 = vld [vmem:[%s16085_s3 + $0x18] sm:$0xff]  ;;  %v526_v32 = vand.u32 4294901760, %v508_v30  ;;  %s8700_s0 = sld [smem:[#allocation2 + $0x2]] }
  0x12   :  { %v12138_v8 = vpack.c.bf16 %v50_v5, %v47_v4  ;;  %v125_v9 = vsub.f32 %v35_v0, %v47_v4  ;;  %v132_v10 = vsub.f32 %v36_v1, %v50_v5  ;;  %v113_v11 = vand.u32 4294901760, %v44_v7  ;;  %v8696_v57 = vld [vmem:[%s16084_s2 + $0x10] ss:$0 sm:$0xff]  ;;  %v1004_v5 = vld [vmem:[%s16086_s4] sm:$0xff]  ;;  %s8699_s27 = sld [smem:[#allocation2 + $0x1]]  ;;  %s8701_s28 = sld [smem:[#allocation2 + $0x3]] }
  0x13   :  { %v520_v27 = vand.u32 4294901760, %v506_v25  ;;  %v529_v33 = vand.u32 4294901760, %v509_v31  ;;  %v607_v35 = vsub.f32 %v507_v26, %v523_v28  ;;  %v614_v37 = vsub.f32 %v508_v30, %v526_v32  ;;  %s8702_s6 = sld [smem:[#allocation2 + $0x4]]  ;;  %s8703_s7 = sld [smem:[#allocation2 + $0x5]] }
  0x14   :  { %12139 = vmatpush3.bf16.msra.mxu0 %v12138_v8  ;;  %v114_v12 = vsub.f32 %v44_v7, %v113_v11  ;;  %v126_v13 = vand.u32 4294901760, %v125_v9  ;;  %v133_v14 = vand.u32 4294901760, %v132_v10  ;;  %v12144_v23 = vpack.c.bf16 %v132_v10, %v125_v9  ;;  %v1005_v7 = vld [vmem:[%s16086_s4 + $0x8] sm:$0xff]  ;;  %s8704_s8 = sld [smem:[#allocation2 + $0x6]]  ;;  %s13812_s21 = smov 21  }
  0x15   :  { %12140 = vmatprep.subr.bf16.mxu0 %v16104_v3  ;;  %v12156_v29 = vpack.c.bf16 %v523_v28, %v520_v27  ;;  %v600_v34 = vsub.f32 %v506_v25, %v520_v27  ;;  %v12159_v36 = vpack.c.bf16 %v529_v33, %v526_v32  ;;  %v621_v38 = vsub.f32 %v509_v31, %v529_v33 }
  0x16   :  { %v115_v15 = vand.u32 4294901760, %v114_v12  ;;  %v127_v16 = vsub.f32 %v125_v9, %v126_v13  ;;  %v134_v17 = vsub.f32 %v132_v10, %v133_v14  ;;  %v12150_v24 = vpack.c.bf16 %v133_v14, %v126_v13  ;;  %v1006_v10 = vld [vmem:[%s16086_s4 + $0x10] sm:$0xff] }
  0x17   :  { %12157 = vmatpush3.bf16.msra.mxu1 %v12156_v29  ;;  %v601_v39 = vand.u32 4294901760, %v600_v34  ;;  %v608_v40 = vand.u32 4294901760, %v607_v35  ;;  %v615_v45 = vand.u32 4294901760, %v614_v37  ;;  %v622_v46 = vand.u32 4294901760, %v621_v38 }
  0x18   :  { %v116_v18 = vsub.f32 %v114_v12, %v115_v15  ;;  %v128_v19 = vand.u32 4294901760, %v127_v16  ;;  %v135_v20 = vand.u32 4294901760, %v134_v17  ;;  %12158 = vmatprep.subr.bf16.mxu1 %v16104_v3  ;;  %v12168_v53 = vpack.c.bf16 %v607_v35, %v600_v34 }
  0x19   :  { %v602_v41 = vsub.f32 %v600_v34, %v601_v39  ;;  %v609_v42 = vsub.f32 %v607_v35, %v608_v40  ;;  %v616_v48 = vsub.f32 %v614_v37, %v615_v45  ;;  %v623_v49 = vsub.f32 %v621_v38, %v622_v46 }
  0x1a   :  { %v117_v21 = vand.u32 4294901760, %v116_v18  ;;  %v12141_v22 = vpack.c.bf16 %v135_v20, %v128_v19  ;;  %v12171_v54 = vpack.c.bf16 %v621_v38, %v614_v37  ;;  %v12180_v55 = vpack.c.bf16 %v608_v40, %v601_v39  ;;  %v13978_v38 = vld [vmem:[%s16086_s4 + $0x30] sm:$0xff]  ;;  %v13983_v39 = vld [vmem:[%s16086_s4 + $0x38] sm:$0xff]  ;;  %v13988_v40 = vld [vmem:[%s16086_s4 + $0x40] sm:$0xff] }
  0x1b   :  { %12160 = vmatpush3.bf16.msra.mxu1 %v12159_v36  ;;  %v603_v43 = vand.u32 4294901760, %v602_v41  ;;  %v610_v44 = vand.u32 4294901760, %v609_v42  ;;  %v617_v50 = vand.u32 4294901760, %v616_v48  ;;  %v624_v51 = vand.u32 4294901760, %v623_v49 }
  0x1c   :  { %9826 = vmatmul.mubr.f32.vlgmr.msra.gmra.mrb[0].mxu0 %v117_v21  ;;  %12161 = vmatprep.subr.bf16.mxu1 %v16104_v3  ;;  %v12183_v56 = vpack.c.bf16 %v622_v46, %v615_v45  ;;  %v1017_v9 = vand.u32 4294901760, %v1005_v7  ;;  %v1020_v14 = vand.u32 4294901760, %v1006_v10  ;;  %v1567_v41 = vand.u32 4294901760, %v13978_v38  ;;  %v14002_v46 = vld [vmem:[%s16086_s4 + $0x50] sm:$0xff] }
  0x1d   :  { %12142 = vmatpush3.bf16.msra.mxu0 %v12141_v22  ;;  %9832 = vmatprep.mubr.msk.f32.mxu0 %vm13809_vm0, %v16106_v6  ;;  %v12162_v47 = vpack.c.bf16 %v610_v44, %v603_v43  ;;  %v12165_v52 = vpack.c.bf16 %v624_v51, %v617_v50  ;;  %v1570_v42 = vand.u32 4294901760, %v13983_v39  ;;  %v13995_v43 = vld [vmem:[%s16086_s4 + $0x48] sm:$0xff]  ;;  %v1573_v44 = vand.u32 4294901760, %v13988_v40 }
  0x1e   :  { %12143 = vmatprep.subr.bf16.mxu0 %v16104_v3  ;;  %v1101_v13 = vsub.f32 %v1005_v7, %v1017_v9  ;;  %v1108_v16 = vsub.f32 %v1006_v10, %v1020_v14  ;;  %v1576_v45 = vand.u32 4294901760, %v13995_v43  ;;  %v1579_v50 = vand.u32 4294901760, %v14002_v46  ;;  %v14115_v7 = vld [vmem:[%s16086_s4 + $0x98] sm:$0xff] }
  0x1f   :  { %v14013_v48 = vpack.c.bf16 %v1570_v42, %v1567_v41  ;;  %vm8652_vm11 = vcmask 7168  }
  0x20   :  { %v1102_v19 = vand.u32 4294901760, %v1101_v13  ;;  %v14020_v49 = vpack.c.bf16 %v1576_v45, %v1573_v44 }
  0x22   :  { %v1103_v22 = vsub.f32 %v1101_v13, %v1102_v19 }
  0x24   :  { %9833 = vmatmul.mubr.f32.vlgmr.msra.gmra.mrb[0].mxu0 %v113_v11  ;;  %v1104_v27 = vand.u32 4294901760, %v1103_v22  ;;  %v14172_v22 = vsub.f32 %v13988_v40, %v1573_v44 }
  0x25   :  { %12145 = vmatpush3.bf16.msra.mxu0 %v12144_v23  ;;  %9839 = vmatprep.mubr.msk.f32.mxu0 %vm13809_vm0, %v16106_v6  ;;  %v1109_v23 = vand.u32 4294901760, %v1108_v16 }
  0x26   :  { %12146 = vmatprep.subr.bf16.mxu0 %v16104_v3 }
  0x27   :  { %v1110_v28 = vsub.f32 %v1108_v16, %v1109_v23 }
  0x29   :  { %v1111_v31 = vand.u32 4294901760, %v1110_v28 }
  0x2c   :  { %9840 = vmatmul.mubr.f32.vlgmr.msra.gmra.mrb[0].mxu0 %v114_v12 }
  0x2d   :  { %12148 = vmatpush3.bf16.msra.mxu0 %v12138_v8  ;;  %9846 = vmatprep.mubr.msk.f32.mxu0 %vm13809_vm0, %v16106_v6 }
  0x2e   :  { %12149 = vmatprep.subr.bf16.mxu0 %v16104_v3 }
  0x34   :  { %9847 = vmatmul.mubr.f32.vlgmr.msra.gmra.mrb[0].mxu0 %v115_v15 }
  0x35   :  { %12151 = vmatpush3.bf16.msra.mxu0 %v12150_v24  ;;  %9853 = vmatprep.mubr.msk.f32.mxu0 %vm13809_vm0, %v16106_v6 }
  0x36   :  { %12152 = vmatprep.subr.bf16.mxu0 %v16104_v3 }
  0x3c   :  { %9854 = vmatmul.mubr.f32.vlgmr.msra.gmra.mrb[0].mxu0 %v113_v11 }
  0x3d   :  { %12154 = vmatpush3.bf16.msra.mxu0 %v12138_v8  ;;  %9860 = vmatprep.mubr.msk.f32.mxu0 %vm13809_vm0, %v16106_v6  ;;  %v1014_v8 = vand.u32 4294901760, %v1004_v5 }
  0x3e   :  { %12173 = vmatprep.subr.bf16.mxu0 %v16104_v3 }
  0x3f   :  { %v1094_v12 = vsub.f32 %v1004_v5, %v1014_v8  ;;  %v12192_v20 = vpack.c.bf16 %v1017_v9, %v1014_v8  ;;  %v14110_v5 = vld [vmem:[%s16086_s4 + $0x90] sm:$0xff]  ;;  %v1606_v9 = vand.u32 4294901760, %v14115_v7 }
  0x40   :  { %v1603_v8 = vand.u32 4294901760, %v14110_v5 }
  0x41   :  { %v1095_v18 = vand.u32 4294901760, %v1094_v12  ;;  %v12204_v34 = vpack.c.bf16 %v1101_v13, %v1094_v12 }
  0x42   :  { %v14123_v10 = vpack.c.bf16 %v1606_v9, %v1603_v8 }
  0x43   :  { %v1096_v21 = vsub.f32 %v1094_v12, %v1095_v18  ;;  %v14133_v12 = vld [vmem:[%s16086_s4 + $0xa8] sm:$0xff] }
  0x44   :  { %9861 = vmatmul.mubr.f32.vlgmr.msra.gmra.mrb[0].mxu0 %v113_v11  ;;  %v1007_v11 = vld [vmem:[%s16086_s4 + $0x18] sm:$0xff]  ;;  %16239 = vst [vmem:[#allocation9_spill] sm:$0xff] %v14123_v10 }
  0x45   :  { %9904 = vmatprep.mubr.msk.f32.mxu0 %vm13809_vm0, %v16106_v6  ;;  %12175 = vmatpush3.bf16.msra.mxu0 %v12156_v29  ;;  %v1023_v15 = vand.u32 4294901760, %v1007_v11  ;;  %v1097_v26 = vand.u32 4294901760, %v1096_v21 }
  0x46   :  { %12176 = vmatprep.subr.bf16.mxu0 %v16104_v3 }
  0x47   :  { %v1115_v17 = vsub.f32 %v1007_v11, %v1023_v15  ;;  %v12195_v25 = vpack.c.bf16 %v1023_v15, %v1020_v14  ;;  %v12198_v30 = vpack.c.bf16 %v1104_v27, %v1097_v26  ;;  %v14128_v11 = vld [vmem:[%s16086_s4 + $0xa0] sm:$0xff]  ;;  %v1612_v14 = vand.u32 4294901760, %v14133_v12 }
  0x48   :  { %v1609_v13 = vand.u32 4294901760, %v14128_v11  ;;  %v16101_v26 = vand.u32 4294901760, %v14172_v22 }
  0x49   :  { %12178 = vmatpush3.bf16.msra.mxu0 %v12159_v36  ;;  %v1116_v24 = vand.u32 4294901760, %v1115_v17  ;;  %v12207_v35 = vpack.c.bf16 %v1115_v17, %v1108_v16  ;;  %v14153_v16 = vsub.f32 %v13978_v38, %v1567_v41 }
  0x4a   :  { %12185 = vmatprep.subr.bf16.mxu0 %v16104_v3  ;;  %v14145_v15 = vpack.c.bf16 %v1612_v14, %v1609_v13 }
  0x4b   :  { %v12219_v37 = vpack.c.bf16 %v1116_v24, %v1109_v23  ;;  %v14177_v23 = vsub.f32 %v13995_v43, %v1576_v45 }
  0x4c   :  { %16240 = vst [vmem:[#allocation10_spill] sm:$0xff] %v14145_v15 }
  0x4d   :  { %v16100_v27 = vand.u32 4294901760, %v14177_v23 }
 0x117   :  { %v501_v58 = vpop.f32.mrb[0].mxu0 }
 0x118   :  { %v13685_v59 = vadd.f32 %v8696_v57, %v501_v58  ;;  %v9862_v60 = vpop.f32.mrb[1].mxu0  ;;  %v14052_v57 = vld [vmem:[%s16086_s4 + $0x70] sm:$0xff]  ;;  %v14057_v58 = vld [vmem:[%s16086_s4 + $0x78] sm:$0xff] }
 0x119   :  { %v1591_v60 = vand.u32 4294901760, %v14052_v57 }
 0x11a   :  { %v505_v61 = vmax.f32 %v13685_v59, 0.0 }
 0x11c   :  { %v517_v62 = vsel %vm515_vm2, %v505_v61, 0  ;;  %v1594_v61 = vand.u32 4294901760, %v14057_v58  ;;  %vm8654_vm2 = vcmask 15360  }
 0x11d   :  { %v13899_v63 = vand.u32 4294901760, %v517_v62 }
 0x11f   :  { %v13902_v0 = vsub.f32 %v517_v62, %v13899_v63  ;;  %v14074_v62 = vld [vmem:[%s16086_s4 + $0x80] sm:$0xff] }
 0x121   :  { %v13905_v1 = vand.u32 4294901760, %v13902_v0 }
 0x123   :  { %9905 = vmatmul.mubr.f32.vlgmr.msra.gmra.mrb[2].mxu0 %v13905_v1  ;;  %v591_v2 = vsub.f32 %v13902_v0, %v13905_v1 }
 0x124   :  { %12187 = vmatpush3.bf16.msra.mxu0 %v12156_v29  ;;  %9926 = vmatprep.mubr.msk.f32.mxu0 %vm13809_vm0, %v16106_v6  ;;  %v1117_v29 = vsub.f32 %v1115_v17, %v1116_v24  ;;  %v14158_v17 = vsub.f32 %v13983_v39, %v1570_v42 }
 0x125   :  { %12188 = vmatprep.subr.bf16.mxu0 %v16104_v3  ;;  %v592_v4 = vand.u32 4294901760, %v591_v2 }
 0x126   :  { %v1118_v32 = vand.u32 4294901760, %v1117_v29  ;;  %v1675_v29 = vsub.f32 %v14172_v22, %v16101_v26 }
 0x127   :  { %9872 = vmatmul.mubr.f32.vlgmr.msra.gmra.mrb[0].mxu1 %v592_v4 }
 0x128   :  { %12163 = vmatpush3.bf16.msra.mxu1 %v12162_v47  ;;  %12190 = vmatpush3.bf16.msra.mxu0 %v12159_v36  ;;  %v12201_v33 = vpack.c.bf16 %v1118_v32, %v1111_v31  ;;  %v12216_v36 = vpack.c.bf16 %v1102_v19, %v1095_v18  ;;  %v14007_v47 = vld [vmem:[%s16086_s4 + $0x58] sm:$0xff]  ;;  %v16103_v18 = vand.u32 4294901760, %v14153_v16  ;;  %v16102_v19 = vand.u32 4294901760, %v14158_v17 }
 0x129   :  { %12164 = vmatprep.subr.bf16.mxu1 %v16104_v3  ;;  %9882 = vmatprep.mubr.msk.f32.mxu1 %vm13809_vm0, %v16106_v6  ;;  %v1582_v51 = vand.u32 4294901760, %v14007_v47  ;;  %v14192_v31 = vsub.f32 %v14002_v46, %v1579_v50 }
 0x12a   :  { %12347 = vmatprep.subr.bf16.mxu0 %v16104_v3  ;;  %v1668_v21 = vsub.f32 %v14158_v17, %v16102_v19 }
 0x12b   :  { %9927 = vmatmul.mubr.f32.vlgmr.msra.gmra.mrb[4].mxu0 %v13899_v63  ;;  %v14197_v32 = vsub.f32 %v14007_v47, %v1582_v51 }
 0x12c   :  { %12166 = vmatpush3.bf16.msra.mxu1 %v12165_v52  ;;  %10202 = vmatprep.mubr.msk.f32.mxu0 %vm13809_vm0, %v16106_v6  ;;  %v14030_v52 = vld [vmem:[%s16086_s4 + $0x60] sm:$0xff] }
 0x12d   :  { %12167 = vmatprep.subr.bf16.mxu1 %v16104_v3  ;;  %12349 = vmatpush3.bf16.msra.mxu0 %v14013_v48 }
 0x12e   :  { %12350 = vmatprep.subr.bf16.mxu0 %v16104_v3 }
 0x12f   :  { %9883 = vmatmul.mubr.f32.vlgmr.msra.gmra.mrb[2].mxu1 %v13899_v63 }
 0x130   :  { %12169 = vmatpush3.bf16.msra.mxu1 %v12168_v53  ;;  %9893 = vmatprep.mubr.msk.f32.mxu1 %vm13809_vm0, %v16106_v6  ;;  %v14035_v53 = vld [vmem:[%s16086_s4 + $0x68] sm:$0xff] }
 0x131   :  { %12170 = vmatprep.subr.bf16.mxu1 %v16104_v3  ;;  %12352 = vmatpush3.bf16.msra.mxu0 %v14020_v49 }
 0x132   :  { %12353 = vmatprep.subr.bf16.mxu0 %v16104_v3 }
 0x134   :  { %12172 = vmatpush3.bf16.msra.mxu1 %v12171_v54  ;;  %v14042_v54 = vpack.c.bf16 %v1582_v51, %v1579_v50  ;;  %v14229_v50 = vsub.f32 %v14052_v57, %v1591_v60  ;;  %v14234_v51 = vsub.f32 %v14057_v58, %v1594_v61 }
 0x135   :  { %12179 = vmatprep.subr.bf16.mxu1 %v16104_v3 }
 0x136   :  { %16235 = vst [vmem:[#allocation5_spill] sm:$0xff] %v14042_v54  ;;  %12355 = vmatpush3.bf16.msra.mxu0 %v14042_v54 }
 0x137   :  { %9894 = vmatmul.mubr.f32.vlgmr.msra.gmra.mrb[4].mxu1 %v13902_v0  ;;  %12356 = vmatprep.subr.bf16.mxu0 %v16104_v3 }
 0x138   :  { %12181 = vmatpush3.bf16.msra.mxu1 %v12180_v55  ;;  %9915 = vmatprep.mubr.msk.f32.mxu1 %vm13809_vm0, %v16106_v6  ;;  %v1585_v55 = vand.u32 4294901760, %v14030_v52 }
 0x139   :  { %12182 = vmatprep.subr.bf16.mxu1 %v16104_v3 }
 0x13a   :  { %v14212_v40 = vsub.f32 %v14030_v52, %v1585_v55 }
 0x13c   :  { %12184 = vmatpush3.bf16.msra.mxu1 %v12183_v56  ;;  %v1588_v56 = vand.u32 4294901760, %v14035_v53  ;;  %v16097_v44 = vand.u32 4294901760, %v14212_v40 }
 0x13d   :  { %12191 = vmatprep.subr.bf16.mxu1 %v16104_v3 }
 0x13e   :  { %v14064_v59 = vpack.c.bf16 %v1588_v56, %v1585_v55  ;;  %v14217_v41 = vsub.f32 %v14035_v53, %v1588_v56  ;;  %v1703_v47 = vsub.f32 %v14212_v40, %v16097_v44  ;;  %v16095_v55 = vand.u32 4294901760, %v14229_v50 }
 0x13f   :  { %9916 = vmatmul.mubr.f32.vlgmr.msra.gmra.mrb[6].mxu1 %v13899_v63  ;;  %v16094_v56 = vand.u32 4294901760, %v14234_v51 }
 0x140   :  { %12193 = vmatpush3.bf16.msra.mxu1 %v12192_v20  ;;  %9937 = vmatprep.mubr.msk.f32.mxu1 %vm13809_vm0, %v16106_v6  ;;  %16236 = vst [vmem:[#allocation6_spill] sm:$0xff] %v14064_v59  ;;  %v16096_v45 = vand.u32 4294901760, %v14217_v41  ;;  %v1704_v53 = vand.u32 4294901760, %v1703_v47  ;;  %v1717_v57 = vsub.f32 %v14229_v50, %v16095_v55 }
 0x141   :  { %12194 = vmatprep.subr.bf16.mxu1 %v16104_v3  ;;  %12358 = vmatpush3.bf16.msra.mxu0 %v14064_v59 }
 0x142   :  { %12359 = vmatprep.subr.bf16.mxu0 %v16104_v3  ;;  %v1710_v52 = vsub.f32 %v14217_v41, %v16096_v45 }
 0x144   :  { %12196 = vmatpush3.bf16.msra.mxu1 %v12195_v25 }
 0x145   :  { %12197 = vmatprep.subr.bf16.mxu1 %v16104_v3 }
 0x147   :  { %9938 = vmatmul.mubr.f32.vlgmr.msra.gmra.mrb[8].mxu1 %v592_v4 }
 0x148   :  { %12199 = vmatpush3.bf16.msra.mxu1 %v12198_v30  ;;  %9948 = vmatprep.mubr.msk.f32.mxu1 %vm13809_vm0, %v16106_v6  ;;  %v1682_v30 = vsub.f32 %v14177_v23, %v16100_v27 }
 0x149   :  { %12200 = vmatprep.subr.bf16.mxu1 %v16104_v3 }
 0x14c   :  { %12202 = vmatpush3.bf16.msra.mxu1 %v12201_v33  ;;  %v1676_v33 = vand.u32 4294901760, %v1675_v29 }
 0x14d   :  { %12203 = vmatprep.subr.bf16.mxu1 %v16104_v3 }
 0x14f   :  { %9949 = vmatmul.mubr.f32.vlgmr.msra.gmra.mrb[8].mxu1 %v13899_v63 }
 0x150   :  { %12205 = vmatpush3.bf16.msra.mxu1 %v12204_v34  ;;  %9959 = vmatprep.mubr.msk.f32.mxu1 %vm13809_vm0, %v16106_v6  ;;  %v1683_v34 = vand.u32 4294901760, %v1682_v30 }
 0x151   :  { %12206 = vmatprep.subr.bf16.mxu1 %v16104_v3 }
 0x154   :  { %12208 = vmatpush3.bf16.msra.mxu1 %v12207_v35  ;;  %v16099_v35 = vand.u32 4294901760, %v14192_v31 }
 0x155   :  { %12209 = vmatprep.subr.bf16.mxu1 %v16104_v3 }
 0x156   :  { %v1689_v38 = vsub.f32 %v14192_v31, %v16099_v35  ;;  %v1532_v35 = vstv %s8704_s8 }
 0x157   :  { %9960 = vmatmul.mubr.f32.vlgmr.msra.gmra.mrb[8].mxu1 %v13902_v0  ;;  %v14086_v0 = vpack.c.bf16 %v1594_v61, %v1591_v60  ;;  %v1724_v60 = vsub.f32 %v14234_v51, %v16094_v56  ;;  %v1504_v56 = vstv %s8700_s0 }
 0x158   :  { %12211 = vmatpush3.bf16.msra.mxu1 %v12192_v20  ;;  %9970 = vmatprep.mubr.msk.f32.mxu1 %vm13809_vm0, %v16106_v6  ;;  %v1690_v42 = vand.u32 4294901760, %v1689_v38 }
 0x159   :  { %12212 = vmatprep.subr.bf16.mxu1 %v16104_v3  ;;  %16237 = vst [vmem:[#allocation7_spill] sm:$0xff] %v14086_v0  ;;  %12361 = vmatpush3.bf16.msra.mxu0 %v14086_v0 }
 0x15a   :  { %12362 = vmatprep.subr.bf16.mxu0 %v16104_v3 }
 0x15c   :  { %12214 = vmatpush3.bf16.msra.mxu1 %v12195_v25 }
 0x15d   :  { %12215 = vmatprep.subr.bf16.mxu1 %v16104_v3 }
 0x15f   :  { %9971 = vmatmul.mubr.f32.vlgmr.msra.gmra.mrb[8].mxu1 %v13905_v1  ;;  %v1597_v1 = vand.u32 4294901760, %v14074_v62 }
 0x160   :  { %12217 = vmatpush3.bf16.msra.mxu1 %v12216_v36  ;;  %9981 = vmatprep.mubr.msk.f32.mxu1 %vm13809_vm0, %v16106_v6  ;;  %v16098_v36 = vand.u32 4294901760, %v14197_v32 }
 0x161   :  { %12218 = vmatprep.subr.bf16.mxu1 %v16104_v3  ;;  %v14250_v58 = vsub.f32 %v14074_v62, %v1597_v1 }
 0x162   :  { %v1696_v39 = vsub.f32 %v14197_v32, %v16098_v36 }
 0x163   :  { %v16093_v29 = vand.u32 4294901760, %v14250_v58 }
 0x164   :  { %12220 = vmatpush3.bf16.msra.mxu1 %v12219_v37  ;;  %v14201_v37 = vpack.c.bf16 %v1683_v34, %v1676_v33  ;;  %v1697_v43 = vand.u32 4294901760, %v1696_v39 }
 0x165   :  { %12221 = vmatprep.subr.bf16.mxu1 %v16104_v3  ;;  %v1731_v62 = vsub.f32 %v14250_v58, %v16093_v29 }
 0x166   :  { %v14221_v46 = vpack.c.bf16 %v1697_v43, %v1690_v42 }
 0x167   :  { %9982 = vmatmul.mubr.f32.vlgmr.msra.gmra.mrb[8].mxu1 %v13899_v63  ;;  %v1732_v34 = vand.u32 4294901760, %v1731_v62 }
 0x168   :  { %12223 = vmatpush3.bf16.msra.mxu1 %v12192_v20  ;;  %9992 = vmatprep.mubr.msk.f32.mxu1 %vm13809_vm0, %v16106_v6  ;;  %v1661_v20 = vsub.f32 %v14153_v16, %v16103_v18 }
 0x169   :  { %12224 = vmatprep.subr.bf16.mxu1 %v16104_v3 }
 0x16a   :  { %v1662_v24 = vand.u32 4294901760, %v1661_v20  ;;  %v1711_v20 = vand.u32 4294901760, %v1710_v52 }
 0x16c   :  { %12226 = vmatpush3.bf16.msra.mxu1 %v12195_v25  ;;  %v1669_v25 = vand.u32 4294901760, %v1668_v21  ;;  %v14257_v21 = vpack.c.bf16 %v1711_v20, %v1704_v53 }
 0x16d   :  { %12227 = vmatprep.subr.bf16.mxu1 %v16104_v3 }
 0x16e   :  { %v14181_v28 = vpack.c.bf16 %v1669_v25, %v1662_v24  ;;  %v1718_v24 = vand.u32 4294901760, %v1717_v57  ;;  %v1725_v25 = vand.u32 4294901760, %v1724_v60 }
 0x16f   :  { %9993 = vmatmul.mubr.f32.vlgmr.msra.gmra.mrb[8].mxu1 %v13899_v63  ;;  %v14079_v63 = vld [vmem:[%s16086_s4 + $0x88] sm:$0xff] }
 0x170   :  { %10027 = vmatprep.mubr.msk.f32.mxu1 %vm13809_vm0, %v16106_v6  ;;  %12229 = vmatpush3.bf16.msra.mxu1 %v14013_v48  ;;  %v1600_v2 = vand.u32 4294901760, %v14079_v63  ;;  %v14261_v33 = vpack.c.bf16 %v1725_v25, %v1718_v24  ;;  %v14313_v24 = vpack.c.bf16 %v14158_v17, %v14153_v16  ;;  %v14317_v25 = vpack.c.bf16 %v14177_v23, %v14172_v22 }
 0x171   :  { %12230 = vmatprep.subr.bf16.mxu1 %v16104_v3 }
 0x172   :  { %v14098_v4 = vpack.c.bf16 %v1600_v2, %v1597_v1  ;;  %v14255_v61 = vsub.f32 %v14079_v63, %v1600_v2  ;;  %v14272_v63 = vsub.f32 %v14110_v5, %v1603_v8  ;;  %v14277_v2 = vsub.f32 %v14115_v7, %v1606_v9 }
 0x173   :  { %v14289_v5 = vsub.f32 %v14128_v11, %v1609_v13  ;;  %v14294_v7 = vsub.f32 %v14133_v12, %v1612_v14 }
 0x174   :  { %12232 = vmatpush3.bf16.msra.mxu1 %v14020_v49  ;;  %16238 = vst [vmem:[#allocation8_spill] sm:$0xff] %v14098_v4  ;;  %12364 = vmatpush3.bf16.msra.mxu0 %v14098_v4  ;;  %v16092_v30 = vand.u32 4294901760, %v14255_v61  ;;  %v16091_v39 = vand.u32 4294901760, %v14272_v63  ;;  %v16090_v42 = vand.u32 4294901760, %v14277_v2 }
 0x175   :  { %12233 = vmatprep.subr.bf16.mxu1 %v16104_v3  ;;  %12365 = vmatprep.subr.bf16.mxu0 %v16104_v3  ;;  %v16089_v52 = vand.u32 4294901760, %v14289_v5  ;;  %v16088_v53 = vand.u32 4294901760, %v14294_v7 }
 0x176   :  { %v1738_v1 = vsub.f32 %v14255_v61, %v16092_v30  ;;  %v1745_v47 = vsub.f32 %v14272_v63, %v16091_v39  ;;  %v1752_v8 = vsub.f32 %v14277_v2, %v16090_v42 }
 0x177   :  { %v1759_v11 = vsub.f32 %v14289_v5, %v16089_v52  ;;  %v1766_v13 = vsub.f32 %v14294_v7, %v16088_v53  ;;  %v14340_v52 = vpack.c.bf16 %v14277_v2, %v14272_v63 }
 0x178   :  { %12235 = vmatpush3.bf16.msra.mxu1 %v14042_v54  ;;  %12367 = vmatpush3.bf16.msra.mxu0 %v14123_v10  ;;  %v1739_v38 = vand.u32 4294901760, %v1738_v1  ;;  %v1746_v9 = vand.u32 4294901760, %v1745_v47  ;;  %v1753_v20 = vand.u32 4294901760, %v1752_v8  ;;  %v14325_v8 = vpack.c.bf16 %v14217_v41, %v14212_v40 }
 0x179   :  { %12236 = vmatprep.subr.bf16.mxu1 %v16104_v3  ;;  %12368 = vmatprep.subr.bf16.mxu0 %v16104_v3  ;;  %v1760_v14 = vand.u32 4294901760, %v1759_v11  ;;  %v1767_v57 = vand.u32 4294901760, %v1766_v13  ;;  %16244 = vst [vmem:[#allocation14_spill] sm:$0xff] %v14340_v52 }
 0x17a   :  { %v14281_v43 = vpack.c.bf16 %v1739_v38, %v1732_v34  ;;  %v14307_v12 = vpack.c.bf16 %v1753_v20, %v1746_v9  ;;  %v14321_v34 = vpack.c.bf16 %v14197_v32, %v14192_v31  ;;  %16241 = vst [vmem:[#allocation11_spill] sm:$0xff] %v14325_v8  ;;  %v8697_v9 = vld [vmem:[%s16085_s3 + $0xa0] ss:$0 sm:$0xff] }
 0x17b   :  { %v14309_v60 = vpack.c.bf16 %v1767_v57, %v1760_v14  ;;  %v14332_v14 = vpack.c.bf16 %v14234_v51, %v14229_v50 }
 0x17c   :  { %12238 = vmatpush3.bf16.msra.mxu1 %v14064_v59  ;;  %12370 = vmatpush3.bf16.msra.mxu0 %v14145_v15 }
 0x17d   :  { %12239 = vmatprep.subr.bf16.mxu1 %v16104_v3  ;;  %12389 = vmatprep.subr.bf16.mxu0 %v16104_v3  ;;  %16242 = vst [vmem:[#allocation12_spill] sm:$0xff] %v14332_v14 }
 0x180   :  { %12241 = vmatpush3.bf16.msra.mxu1 %v14086_v0 }
 0x181   :  { %12242 = vmatprep.subr.bf16.mxu1 %v16104_v3 }
 0x184   :  { %12244 = vmatpush3.bf16.msra.mxu1 %v14098_v4 }
 0x185   :  { %12245 = vmatprep.subr.bf16.mxu1 %v16104_v3 }
 0x188   :  { %12247 = vmatpush3.bf16.msra.mxu1 %v14123_v10 }
 0x189   :  { %12248 = vmatprep.subr.bf16.mxu1 %v16104_v3 }
 0x18c   :  { %12250 = vmatpush3.bf16.msra.mxu1 %v14145_v15 }
 0x18d   :  { %12251 = vmatprep.subr.bf16.mxu1 %v16104_v3 }
 0x1f6   :  { %v842_v62 = vpop.f32.mrb[2].mxu0 }
 0x1f7   :  { %v9906_v1 = vpop.f32.mrb[3].mxu0 }
 0x1fa   :  { %v594_v38 = vpop.f32.mrb[0].mxu1 }
 0x1fb   :  { %v9873_v47 = vpop.f32.mrb[1].mxu1  ;;  %v595_v13 = vadd.f32 %v8697_v9, %v594_v38  ;;  %v14344_v38 = vpack.c.bf16 %v14294_v7, %v14289_v5 }
 0x1fc   :  { %v14336_v47 = vpack.c.bf16 %v14255_v61, %v14250_v58 }
 0x1fd   :  { %16245 = vst [vmem:[#allocation15_spill] sm:$0xff] %v14344_v38 }
 0x1fe   :  { %v1000_v20 = vpop.f32.mrb[4].mxu0  ;;  %16243 = vst [vmem:[#allocation13_spill] sm:$0xff] %v14336_v47 }
 0x1ff   :  { %v9928_v11 = vpop.f32.mrb[5].mxu0 }
 0x202   :  { %v685_v57 = vpop.f32.mrb[2].mxu1 }
 0x203   :  { %v686_v1 = vadd.f32 %v685_v57, %v595_v13  ;;  %v9884_v53 = vpop.f32.mrb[3].mxu1  ;;  %v1499_v57 = vld [vmem:[%s16086_s4 + $0xc0] sm:$0xff] }
 0x204   :  { %v1533_v19 = vmul.f32 %v1532_v35, %v1499_v57 }
 0x206   :  { %v1535_v3 = vrot.slane %v1533_v19, 5 }
 0x20a   :  { %v765_v42 = vpop.f32.mrb[4].mxu1 }
 0x20b   :  { %v766_v39 = vadd.f32 %v765_v42, %v686_v1  ;;  %v9895_v30 = vpop.f32.mrb[5].mxu1  ;;  %v1511_v42 = vstv %s8701_s28 }
 0x20c   :  { %v1505_v30 = vmul.f32 %v1504_v56, %v1499_v57  ;;  %v1512_v55 = vmul.f32 %v1511_v42, %v1499_v57  ;;  %v1543_v56 = vlaneseq }
 0x20d   :  { %v843_v11 = vadd.f32 %v842_v62, %v766_v39  ;;  %v1501_v39 = vstv %s8699_s27 }
 0x20e   :  { %v1502_v62 = vmul.f32 %v1501_v39, %v1499_v57  ;;  %v1507_v1 = vrot.slane %v1505_v30, 1  ;;  %v14351_v6 = vshrl.u32 %v1543_v56, 7 }
 0x210   :  { %v16109_v39 = vsub.s32 0, %v14351_v6 }
 0x212   :  { %v925_v9 = vpop.f32.mrb[6].mxu1 }
 0x213   :  { %v926_v29 = vadd.f32 %v925_v9, %v843_v11  ;;  %v9917_v13 = vpop.f32.mrb[7].mxu1  ;;  %v1518_v11 = vstv %s8702_s6 }
 0x214   :  { %v1519_v9 = vmul.f32 %v1518_v11, %v1499_v57  ;;  %v1525_v13 = vstv %s8703_s7  ;;  %v16248_v11 = vand.u32 4294901760, %v14153_v16  ;;  %v16254_v16 = vand.u32 4294901760, %v14192_v31  ;;  %v1548_v31 = vld [vmem:[%s16086_s4 + $0x20] sm:$0xff] }
 0x215   :  { %v14346_v53 = vadd.f32 %v1000_v20, %v926_v29  ;;  %v1509_v29 = vadd.f32 %v1507_v1, %v1502_v62  ;;  %v1514_v20 = vrot.slane %v1512_v55, 2  ;;  %v1526_v36 = vmul.f32 %v1525_v13, %v1499_v57  ;;  %v8698_v55 = vld [vmem:[%s16086_s4 + $0xb8] ss:$0 sm:$0xff] }
 0x216   :  { %v1521_v44 = vrot.slane %v1519_v9, 3  ;;  %v16247_v1 = vmov 0.0|0.0   ;;  %v16251_v9 = vand.u32 4294901760, %v14172_v22  ;;  %v16252_v13 = vand.u32 4294901760, %v14177_v23  ;;  %v34_v22 = vld [vmem:[%s16083_s1 + $0x8] sm:$0xff] }
 0x217   :  { %v1516_v45 = vadd.f32 %v1514_v20, %v1509_v29  ;;  %v1528_v26 = vrot.slane %v1526_v36, 4  ;;  %v16249_v29 = vand.u32 4294901760, %v14158_v17  ;;  %v16255_v17 = vand.u32 4294901760, %v14197_v32  ;;  %v1549_v32 = vld [vmem:[%s16086_s4 + $0x28] sm:$0xff] }
 0x218   :  { %v14439_v56 = vpack.c.bf16 %v16252_v13, %v16251_v9  ;;  %v16257_v23 = vand.u32 4294901760, %v14212_v40  ;;  %v16260_v40 = vand.u32 4294901760, %v14229_v50  ;;  %v16267_v13 = vand.u32 4294901760, %v14277_v2 }
 0x219   :  { %v1523_v27 = vadd.f32 %v1521_v44, %v1516_v45  ;;  %v14431_v20 = vpack.c.bf16 %v16249_v29, %v16248_v11 }
 0x21a   :  { %16253 = vst [vmem:[#allocation17_spill] sm:$0xff] %v14439_v56 }
 0x21b   :  { %v1530_v18 = vadd.f32 %v1528_v26, %v1523_v27  ;;  %v16246_v27 = vmov 0.0   ;;  %16250 = vst [vmem:[#allocation16_spill] sm:$0xff] %v14431_v20 }
 0x21d   :  { %v1537_v30 = vadd.f32 %v1535_v3, %v1530_v18 }
 0x21f   :  { %v14361_v44 = vrot.slane %v1537_v30, %v16109_v39  ;;  %v14449_v30 = vpack.c.bf16 %v16255_v17, %v16254_v16 }
 0x221   :  { %16256 = vst [vmem:[#allocation18_spill] sm:$0xff] %v14449_v30 }
 0x242   :  { %v1494_v42 = vpop.f32.mrb[8].mxu1 }
 0x243   :  { %v14357_v62 = vadd.f32 %v8698_v55, %v1494_v42  ;;  %v9994_v35 = vpop.f32.mrb[9].mxu1  ;;  %v16258_v55 = vand.u32 4294901760, %v14217_v41  ;;  %v16261_v41 = vand.u32 4294901760, %v14234_v51  ;;  %v16266_v51 = vand.u32 4294901760, %v14272_v63 }
 0x244   :  { %v1542_v35 = vadd.f32 %v14346_v53, %v34_v22  ;;  %v16264_v53 = vand.u32 4294901760, %v14255_v61  ;;  %v16269_v61 = vand.u32 4294901760, %v14289_v5 }
 0x245   :  { %v16108_v26 = vmax.f32 %v14357_v62, 0.0  ;;  %v14460_v42 = vpack.c.bf16 %v16258_v55, %v16257_v23  ;;  %v14492_v16 = vpack.c.bf16 %v16267_v13, %v16266_v51  ;;  %v16270_v23 = vand.u32 4294901760, %v14294_v7 }
 0x247   :  { %v1547_v3 = vsub.f32 %v14361_v44, %v16108_v26  ;;  %16259 = vst [vmem:[#allocation19_spill] sm:$0xff] %v14460_v42  ;;  %16268 = vst [vmem:[#allocation22_spill] sm:$0xff] %v14492_v16  ;;  %v14500_v55 = vpack.c.bf16 %v16270_v23, %v16269_v61 }
 0x249   :  { %v14367_v18 = vand.u32 4294901760, %v1547_v3  ;;  %16271 = vst [vmem:[#allocation23_spill] sm:$0xff] %v14500_v55 }
 0x24b   :  { %v1648_v19 = vsub.f32 %v1547_v3, %v14367_v18  ;;  %10203 = vmatmul.mubr.f32.vlgmr.msra.gmra.mrb[6].mxu0 %v14367_v18  ;;  %v14475_v3 = vpack.c.bf16 %v16261_v41, %v16260_v40 }
 0x24c   :  { %10279 = vmatprep.mubr.msk.f32.mxu0 %vm13809_vm0, %v16246_v27 }
 0x24d   :  { %v1649_v36 = vand.u32 4294901760, %v1648_v19  ;;  %16262 = vst [vmem:[#allocation20_spill] sm:$0xff] %v14475_v3 }
 0x24f   :  { %v1650_v45 = vsub.f32 %v1648_v19, %v1649_v36 }
 0x251   :  { %v1651_v57 = vand.u32 4294901760, %v1650_v45  ;;  %v2208_v45 = vsel %vm42_vm1, %v1542_v35, 0 }
 0x252   :  { %v2277_v9 = vand.u32 4294901760, %v2208_v45 }
 0x253   :  { %10028 = vmatmul.mubr.f32.vlgmr.msra.gmra.mrb[10].mxu1 %v1651_v57  ;;  %v16263_v57 = vand.u32 4294901760, %v14250_v58 }
 0x254   :  { %12253 = vmatpush3.bf16.msra.mxu1 %v14181_v28  ;;  %10062 = vmatprep.mubr.msk.f32.mxu1 %vm13809_vm0, %v16246_v27  ;;  %v2278_v58 = vsub.f32 %v2208_v45, %v2277_v9 }
 0x255   :  { %12254 = vmatprep.subr.bf16.mxu1 %v16247_v1  ;;  %v14484_v11 = vpack.c.bf16 %v16264_v53, %v16263_v57 }
 0x256   :  { %v2279_v63 = vand.u32 4294901760, %v2278_v58 }
 0x257   :  { %16265 = vst [vmem:[#allocation21_spill] sm:$0xff] %v14484_v11 }
 0x258   :  { %12256 = vmatpush3.bf16.msra.mxu1 %v14201_v37  ;;  %v2280_v41 = vsub.f32 %v2278_v58, %v2279_v63 }
 0x259   :  { %12257 = vmatprep.subr.bf16.mxu1 %v16247_v1 }
 0x25a   :  { %v2281_v7 = vand.u32 4294901760, %v2280_v41  ;;  %v14580_v41 = vld [vmem:[%s16085_s3 + $0x58] sm:$0xff] }
 0x25c   :  { %12259 = vmatpush3.bf16.msra.mxu1 %v14221_v46 }
 0x25d   :  { %12260 = vmatprep.subr.bf16.mxu1 %v16247_v1 }
 0x260   :  { %12262 = vmatpush3.bf16.msra.mxu1 %v14257_v21 }
 0x261   :  { %12263 = vmatprep.subr.bf16.mxu1 %v16247_v1 }
 0x264   :  { %12265 = vmatpush3.bf16.msra.mxu1 %v14261_v33 }
 0x265   :  { %12266 = vmatprep.subr.bf16.mxu1 %v16247_v1 }
 0x268   :  { %12268 = vmatpush3.bf16.msra.mxu1 %v14281_v43 }
 0x269   :  { %12269 = vmatprep.subr.bf16.mxu1 %v16247_v1 }
 0x26c   :  { %12271 = vmatpush3.bf16.msra.mxu1 %v14307_v12 }
 0x26d   :  { %12272 = vmatprep.subr.bf16.mxu1 %v16247_v1 }
 0x270   :  { %12274 = vmatpush3.bf16.msra.mxu1 %v14309_v60 }
 0x271   :  { %12275 = vmatprep.subr.bf16.mxu1 %v16247_v1 }
 0x273   :  { %10063 = vmatmul.mubr.f32.vlgmr.msra.gmra.mrb[12].mxu1 %v14367_v18 }
 0x274   :  { %12277 = vmatpush3.bf16.msra.mxu1 %v14313_v24  ;;  %10097 = vmatprep.mubr.msk.f32.mxu1 %vm13809_vm0, %v16246_v27 }
 0x275   :  { %12278 = vmatprep.subr.bf16.mxu1 %v16247_v1 }
 0x278   :  { %12280 = vmatpush3.bf16.msra.mxu1 %v14317_v25 }
 0x279   :  { %12281 = vmatprep.subr.bf16.mxu1 %v16247_v1 }
 0x27c   :  { %12283 = vmatpush3.bf16.msra.mxu1 %v14321_v34 }
 0x27d   :  { %12284 = vmatprep.subr.bf16.mxu1 %v16247_v1 }
 0x280   :  { %12286 = vmatpush3.bf16.msra.mxu1 %v14325_v8 }
 0x281   :  { %12287 = vmatprep.subr.bf16.mxu1 %v16247_v1 }
 0x284   :  { %12289 = vmatpush3.bf16.msra.mxu1 %v14332_v14 }
 0x285   :  { %12290 = vmatprep.subr.bf16.mxu1 %v16247_v1 }
 0x288   :  { %12292 = vmatpush3.bf16.msra.mxu1 %v14336_v47 }
 0x289   :  { %12293 = vmatprep.subr.bf16.mxu1 %v16247_v1 }
 0x28c   :  { %12295 = vmatpush3.bf16.msra.mxu1 %v14340_v52 }
 0x28d   :  { %12296 = vmatprep.subr.bf16.mxu1 %v16247_v1 }
 0x290   :  { %12298 = vmatpush3.bf16.msra.mxu1 %v14344_v38 }
 0x291   :  { %12299 = vmatprep.subr.bf16.mxu1 %v16247_v1 }
 0x293   :  { %10098 = vmatmul.mubr.f32.vlgmr.msra.gmra.mrb[14].mxu1 %v1648_v19  ;;  %v2211_v19 = vand.u32 4294901760, %v1548_v31 }
 0x294   :  { %12301 = vmatpush3.bf16.msra.mxu1 %v14013_v48  ;;  %10132 = vmatprep.mubr.msk.f32.mxu1 %vm13809_vm0, %v16246_v27 }
 0x295   :  { %12302 = vmatprep.subr.bf16.mxu1 %v16247_v1  ;;  %v2289_v29 = vsub.f32 %v1548_v31, %v2211_v19 }
 0x297   :  { %v2290_v17 = vand.u32 4294901760, %v2289_v29 }
 0x298   :  { %12304 = vmatpush3.bf16.msra.mxu1 %v14020_v49 }
 0x299   :  { %12305 = vmatprep.subr.bf16.mxu1 %v16247_v1  ;;  %v2291_v31 = vsub.f32 %v2289_v29, %v2290_v17 }
 0x29b   :  { %v2292_v35 = vand.u32 4294901760, %v2291_v31  ;;  %v2692_v31 = vld [vmem:[%s16085_s3 + $0x40] sm:$0xff] }
 0x29c   :  { %12307 = vmatpush3.bf16.msra.mxu1 %v14042_v54 }
 0x29d   :  { %12308 = vmatprep.subr.bf16.mxu1 %v16247_v1 }
 0x2a0   :  { %12310 = vmatpush3.bf16.msra.mxu1 %v14064_v59 }
 0x2a1   :  { %12311 = vmatprep.subr.bf16.mxu1 %v16247_v1 }
 0x2a4   :  { %12313 = vmatpush3.bf16.msra.mxu1 %v14086_v0 }
 0x2a5   :  { %12314 = vmatprep.subr.bf16.mxu1 %v16247_v1 }
 0x2a8   :  { %12316 = vmatpush3.bf16.msra.mxu1 %v14098_v4 }
 0x2a9   :  { %12317 = vmatprep.subr.bf16.mxu1 %v16247_v1 }
 0x2ac   :  { %12319 = vmatpush3.bf16.msra.mxu1 %v14123_v10 }
 0x2ad   :  { %12320 = vmatprep.subr.bf16.mxu1 %v16247_v1 }
 0x2b0   :  { %12322 = vmatpush3.bf16.msra.mxu1 %v14145_v15 }
 0x2b1   :  { %12323 = vmatprep.subr.bf16.mxu1 %v16247_v1 }
 0x2b3   :  { %10133 = vmatmul.mubr.f32.vlgmr.msra.gmra.mrb[16].mxu1 %v1649_v36  ;;  %v2214_v36 = vand.u32 4294901760, %v1549_v32 }
 0x2b4   :  { %12325 = vmatpush3.bf16.msra.mxu1 %v14431_v20  ;;  %10167 = vmatprep.mubr.msk.f32.mxu1 %vm13809_vm0, %v16246_v27 }
 0x2b5   :  { %12326 = vmatprep.subr.bf16.mxu1 %v16247_v1  ;;  %v2296_v50 = vsub.f32 %v1549_v32, %v2214_v36  ;;  %v12372_v2 = vpack.c.bf16 %v2214_v36, %v2211_v19 }
 0x2b7   :  { %v2297_v22 = vand.u32 4294901760, %v2296_v50  ;;  %v12378_v19 = vpack.c.bf16 %v2296_v50, %v2289_v29  ;;  %v2688_v29 = vld [vmem:[%s16085_s3 + $0x20] sm:$0xff] }
 0x2b8   :  { %12328 = vmatpush3.bf16.msra.mxu1 %v14439_v56 }
 0x2b9   :  { %12329 = vmatprep.subr.bf16.mxu1 %v16247_v1  ;;  %v2298_v32 = vsub.f32 %v2296_v50, %v2297_v22  ;;  %v2689_v50 = vld [vmem:[%s16085_s3 + $0x28] sm:$0xff] }
 0x2ba   :  { %v2708_v51 = vand.u32 4294901760, %v2689_v50 }
 0x2bb   :  { %v2299_v40 = vand.u32 4294901760, %v2298_v32  ;;  %v2693_v32 = vld [vmem:[%s16085_s3 + $0x48] sm:$0xff] }
 0x2bc   :  { %12331 = vmatpush3.bf16.msra.mxu1 %v14449_v30  ;;  %v14625_v30 = vld [vmem:[%s16085_s3 + $0x88] sm:$0xff] }
 0x2bd   :  { %12332 = vmatprep.subr.bf16.mxu1 %v16247_v1  ;;  %v12375_v5 = vpack.c.bf16 %v2299_v40, %v2292_v35  ;;  %v14575_v40 = vld [vmem:[%s16085_s3 + $0x50] sm:$0xff]  ;;  %v16140_v20 = vand.u32 4294901760, %v14625_v30 }
 0x2c0   :  { %12334 = vmatpush3.bf16.msra.mxu1 %v14460_v42  ;;  %v14620_v42 = vld [vmem:[%s16085_s3 + $0x80] sm:$0xff] }
 0x2c1   :  { %12335 = vmatprep.subr.bf16.mxu1 %v16247_v1  ;;  %v16141_v56 = vand.u32 4294901760, %v14620_v42 }
 0x2c4   :  { %12337 = vmatpush3.bf16.msra.mxu1 %v14475_v3 }
 0x2c5   :  { %12338 = vmatprep.subr.bf16.mxu1 %v16247_v1 }
 0x2c8   :  { %12340 = vmatpush3.bf16.msra.mxu1 %v14484_v11 }
 0x2c9   :  { %12341 = vmatprep.subr.bf16.mxu1 %v16247_v1 }
 0x2cc   :  { %12343 = vmatpush3.bf16.msra.mxu1 %v14492_v16  ;;  %v14612_v16 = vld [vmem:[%s16085_s3 + $0x78] sm:$0xff] }
 0x2cd   :  { %12344 = vmatprep.subr.bf16.mxu1 %v16247_v1  ;;  %v16142_v3 = vand.u32 4294901760, %v14612_v16 }
 0x2d0   :  { %12346 = vmatpush3.bf16.msra.mxu1 %v14500_v55  ;;  %v14607_v55 = vld [vmem:[%s16085_s3 + $0x70] sm:$0xff] }
 0x2d1   :  { %12371 = vmatprep.subr.bf16.mxu1 %v16247_v1  ;;  %v16143_v11 = vand.u32 4294901760, %v14607_v55 }
 0x2d3   :  { %10168 = vmatmul.mubr.f32.vlgmr.msra.gmra.mrb[18].mxu1 %v14367_v18  ;;  %v12384_v18 = vpack.c.bf16 %v2297_v22, %v2290_v17  ;;  %v2690_v17 = vld [vmem:[%s16085_s3 + $0x30] sm:$0xff]  ;;  %v2691_v22 = vld [vmem:[%s16085_s3 + $0x38] sm:$0xff] }
 0x2d4   :  { %12373 = vmatpush3.bf16.msra.mxu1 %v12372_v2  ;;  %10209 = vmatprep.mubr.msk.f32.mxu1 %vm13809_vm0, %v16246_v27  ;;  %v2714_v61 = vand.u32 4294901760, %v2691_v22 }
 0x2d5   :  { %12374 = vmatprep.subr.bf16.mxu1 %v16247_v1 }
 0x2d7   :  { %10210 = vmatmul.mubr.f32.vlgmr.msra.gmra.mrb[20].mxu1 %v2281_v7  ;;  %v2726_v7 = vand.u32 4294901760, %v14580_v41 }
 0x2d8   :  { %12376 = vmatpush3.bf16.msra.mxu1 %v12375_v5  ;;  %10216 = vmatprep.mubr.msk.f32.mxu1 %vm13809_vm0, %v16246_v27  ;;  %v2723_v5 = vand.u32 4294901760, %v14575_v40 }
 0x2d9   :  { %12377 = vmatprep.subr.bf16.mxu1 %v16247_v1 }
 0x2db   :  { %10217 = vmatmul.mubr.f32.vlgmr.msra.gmra.mrb[22].mxu1 %v2277_v9 }
 0x2dc   :  { %12379 = vmatpush3.bf16.msra.mxu1 %v12378_v19  ;;  %10223 = vmatprep.mubr.msk.f32.mxu1 %vm13809_vm0, %v16246_v27  ;;  %v14586_v19 = vpack.c.bf16 %v2726_v7, %v2723_v5 }
 0x2dd   :  { %12380 = vmatprep.subr.bf16.mxu1 %v16247_v1 }
 0x2de   :  { %16272 = vst [vmem:[#allocation24_spill] sm:$0xff] %v14586_v19 }
 0x2df   :  { %10224 = vmatmul.mubr.f32.vlgmr.msra.gmra.mrb[24].mxu1 %v2278_v58  ;;  %v2711_v58 = vand.u32 4294901760, %v2690_v17 }
 0x2e0   :  { %12382 = vmatpush3.bf16.msra.mxu1 %v12372_v2  ;;  %10230 = vmatprep.mubr.msk.f32.mxu1 %vm13809_vm0, %v16246_v27 }
 0x2e1   :  { %12383 = vmatprep.subr.bf16.mxu1 %v16247_v1  ;;  %v14560_v23 = vpack.c.bf16 %v2714_v61, %v2711_v58 }
 0x2e3   :  { %10231 = vmatmul.mubr.f32.vlgmr.msra.gmra.mrb[26].mxu1 %v2279_v63  ;;  %v2717_v63 = vand.u32 4294901760, %v2692_v31 }
 0x2e4   :  { %12385 = vmatpush3.bf16.msra.mxu1 %v12384_v18  ;;  %10237 = vmatprep.mubr.msk.f32.mxu1 %vm13809_vm0, %v16246_v27  ;;  %v14591_v18 = vld [vmem:[%s16085_s3 + $0x60] sm:$0xff] }
 0x2e5   :  { %12386 = vmatprep.subr.bf16.mxu1 %v16247_v1 }
 0x2e7   :  { %10238 = vmatmul.mubr.f32.vlgmr.msra.gmra.mrb[28].mxu1 %v2277_v9 }
 0x2e8   :  { %12388 = vmatpush3.bf16.msra.mxu1 %v12372_v2  ;;  %10244 = vmatprep.mubr.msk.f32.mxu1 %vm13809_vm0, %v16246_v27  ;;  %v2720_v2 = vand.u32 4294901760, %v2693_v32 }
 0x2e9   :  { %12533 = vmatprep.subr.bf16.mxu1 %v16247_v1 }
 0x2ea   :  { %v14570_v35 = vpack.c.bf16 %v2720_v2, %v2717_v63 }
 0x2eb   :  { %10245 = vmatmul.mubr.f32.vlgmr.msra.gmra.mrb[30].mxu1 %v2277_v9  ;;  %v2705_v9 = vand.u32 4294901760, %v2688_v29 }
 0x2ec   :  { %12535 = vmatpush3.bf16.msra.mxu1 %v14013_v48  ;;  %10489 = vmatprep.mubr.msk.f32.mxu1 %vm13809_vm0, %v16246_v27 }
 0x2ed   :  { %12536 = vmatprep.subr.bf16.mxu1 %v16247_v1  ;;  %v14550_v13 = vpack.c.bf16 %v2708_v51, %v2705_v9 }
 0x2ef   :  { %12391 = vmatpush3.bf16.msra.mxu0 %v14550_v13 }
 0x2f0   :  { %12538 = vmatpush3.bf16.msra.mxu1 %v14020_v49  ;;  %12392 = vmatprep.subr.bf16.mxu0 %v16247_v1 }
 0x2f1   :  { %12539 = vmatprep.subr.bf16.mxu1 %v16247_v1 }
 0x2f3   :  { %12394 = vmatpush3.bf16.msra.mxu0 %v14560_v23 }
 0x2f4   :  { %12541 = vmatpush3.bf16.msra.mxu1 %v14042_v54  ;;  %12395 = vmatprep.subr.bf16.mxu0 %v16247_v1 }
 0x2f5   :  { %12542 = vmatprep.subr.bf16.mxu1 %v16247_v1 }
 0x2f7   :  { %12397 = vmatpush3.bf16.msra.mxu0 %v14570_v35 }
 0x2f8   :  { %12544 = vmatpush3.bf16.msra.mxu1 %v14064_v59  ;;  %12398 = vmatprep.subr.bf16.mxu0 %v16247_v1  ;;  %v14646_v59 = vsub.f32 %v2688_v29, %v2705_v9 }
 0x2f9   :  { %12545 = vmatprep.subr.bf16.mxu1 %v16247_v1 }
 0x2fa   :  { %v16153_v29 = vand.u32 4294901760, %v14646_v59 }
 0x2fb   :  { %12400 = vmatpush3.bf16.msra.mxu0 %v14586_v19  ;;  %v14648_v19 = vsub.f32 %v2689_v50, %v2708_v51 }
 0x2fc   :  { %12547 = vmatpush3.bf16.msra.mxu1 %v14086_v0  ;;  %12401 = vmatprep.subr.bf16.mxu0 %v16247_v1  ;;  %v2799_v51 = vsub.f32 %v14646_v59, %v16153_v29 }
 0x2fd   :  { %12548 = vmatprep.subr.bf16.mxu1 %v16247_v1  ;;  %v16152_v50 = vand.u32 4294901760, %v14648_v19 }
 0x300   :  { %12550 = vmatpush3.bf16.msra.mxu1 %v14098_v4 }
 0x301   :  { %12551 = vmatprep.subr.bf16.mxu1 %v16247_v1 }
 0x304   :  { %12553 = vmatpush3.bf16.msra.mxu1 %v14123_v10 }
 0x305   :  { %12554 = vmatprep.subr.bf16.mxu1 %v16247_v1 }
 0x308   :  { %12556 = vmatpush3.bf16.msra.mxu1 %v14145_v15  ;;  %v14634_v15 = vpack.c.bf16 %v16142_v3, %v16143_v11  ;;  %v14678_v3 = vsub.f32 %v2690_v17, %v2711_v58  ;;  %v14680_v11 = vsub.f32 %v2691_v22, %v2714_v61  ;;  %v14694_v22 = vsub.f32 %v2692_v31, %v2717_v63 }
 0x309   :  { %12557 = vmatprep.subr.bf16.mxu1 %v16247_v1  ;;  %v14696_v58 = vsub.f32 %v2693_v32, %v2720_v2  ;;  %v14709_v31 = vsub.f32 %v14575_v40, %v2723_v5  ;;  %v14712_v32 = vsub.f32 %v14580_v41, %v2726_v7 }
 0x30a   :  { %16274 = vst [vmem:[#allocation26_spill] sm:$0xff] %v14634_v15  ;;  %16277 = vst [vmem:[#allocation29_spill] sm:$0xff] %v14694_v22 }
 0x30b   :  { %16278 = vst [vmem:[#allocation30_spill] sm:$0xff] %v14696_v58  ;;  %v16155_v29 = vand.u32 4294901760, %v14696_v58  ;;  %16279 = vst [vmem:[#allocation31_spill] sm:$0xff] %v14709_v31 }
 0x30c   :  { %16280 = vst [vmem:[#allocation32_spill] sm:$0xff] %v14712_v32 }
 0x31e   :  { %v14542_v36 = vpop.f32.mrb[6].mxu0 }
 0x31f   :  { %v10204_v45 = vpop.f32.mrb[7].mxu0 }
 0x320   :  { %v14596_v45 = vld [vmem:[%s16085_s3 + $0x68] sm:$0xff] }
 0x321   :  { %v2732_v26 = vand.u32 4294901760, %v14596_v45 }
 0x323   :  { %v14725_v40 = vsub.f32 %v14596_v45, %v2732_v26 }
 0x325   :  { %16282 = vst [vmem:[#allocation34_spill] sm:$0xff] %v14725_v40 }
 0x326   :  { %v1653_v57 = vpop.f32.mrb[10].mxu1 }
 0x327   :  { %v10029_v53 = vpop.f32.mrb[11].mxu1 }
 0x328   :  { %v2729_v53 = vand.u32 4294901760, %v14591_v18 }
 0x32a   :  { %v14602_v39 = vpack.c.bf16 %v2732_v26, %v2729_v53  ;;  %v16283_v26 = vand.u32 4294901760, %v14607_v55 }
 0x32c   :  { %16273 = vst [vmem:[#allocation25_spill] sm:$0xff] %v14602_v39  ;;  %12403 = vmatpush3.bf16.msra.mxu0 %v14602_v39  ;;  %v14643_v39 = vpack.c.bf16 %v16140_v20, %v16141_v56  ;;  %v2806_v56 = vsub.f32 %v14648_v19, %v16152_v50  ;;  %v14741_v45 = vsub.f32 %v14607_v55, %v16283_v26 }
 0x32d   :  { %12404 = vmatprep.subr.bf16.mxu0 %v16247_v1 }
 0x32e   :  { %16275 = vst [vmem:[#allocation27_spill] sm:$0xff] %v14643_v39  ;;  %16284 = vst [vmem:[#allocation35_spill] sm:$0xff] %v14741_v45 }
 0x330   :  { %12406 = vmatpush3.bf16.msra.mxu0 %v14634_v15  ;;  %v2807_v15 = vand.u32 4294901760, %v2806_v56 }
 0x331   :  { %12407 = vmatprep.subr.bf16.mxu0 %v16247_v1 }
 0x334   :  { %12409 = vmatpush3.bf16.msra.mxu0 %v14643_v39  ;;  %v2800_v39 = vand.u32 4294901760, %v2799_v51  ;;  %v16159_v51 = vand.u32 4294901760, %v14694_v22 }
 0x335   :  { %12410 = vmatprep.subr.bf16.mxu0 %v16247_v1 }
 0x336   :  { %v14686_v54 = vpack.c.bf16 %v2807_v15, %v2800_v39  ;;  %v2827_v39 = vsub.f32 %v14694_v22, %v16159_v51 }
 0x338   :  { %v2828_v63 = vand.u32 4294901760, %v2827_v39 }
 0x346   :  { %v1804_v10 = vpop.f32.mrb[12].mxu1 }
 0x347   :  { %v14636_v4 = vadd.f32 %v1804_v10, %v1653_v57  ;;  %v10064_v0 = vpop.f32.mrb[13].mxu1  ;;  %v14653_v10 = vld [vmem:[%s16085_s3 + $0x90] sm:$0xff] }
 0x348   :  { %v14658_v0 = vld [vmem:[%s16085_s3 + $0x98] sm:$0xff]  ;;  %v16149_v57 = vand.u32 4294901760, %v14653_v10  ;;  %s1538_s3 = sld [smem:[#allocation2]] }
 0x349   :  { %v16148_v20 = vand.u32 4294901760, %v14658_v0 }
 0x34b   :  { %v14670_v9 = vpack.c.bf16 %v16148_v20, %v16149_v57  ;;  %v16164_v20 = vand.u32 4294901760, %v14678_v3  ;;  %v16154_v57 = vand.u32 4294901760, %v14680_v11 }
 0x34d   :  { %16276 = vst [vmem:[#allocation28_spill] sm:$0xff] %v14670_v9  ;;  %12412 = vmatpush3.bf16.msra.mxu0 %v14670_v9  ;;  %v2813_v50 = vsub.f32 %v14678_v3, %v16164_v20  ;;  %v2820_v17 = vsub.f32 %v14680_v11, %v16154_v57  ;;  %v2834_v57 = vsub.f32 %v14696_v58, %v16155_v29 }
 0x34e   :  { %12413 = vmatprep.subr.bf16.mxu0 %v16247_v1  ;;  %v14722_v29 = vsub.f32 %v14591_v18, %v2729_v53  ;;  %v16285_v53 = vand.u32 4294901760, %v14612_v16 }
 0x34f   :  { %v2814_v56 = vand.u32 4294901760, %v2813_v50  ;;  %v2821_v61 = vand.u32 4294901760, %v2820_v17  ;;  %v2835_v2 = vand.u32 4294901760, %v2834_v57  ;;  %v16158_v50 = vand.u32 4294901760, %v14709_v31 }
 0x350   :  { %v16156_v17 = vand.u32 4294901760, %v14712_v32  ;;  %16281 = vst [vmem:[#allocation33_spill] sm:$0xff] %v14722_v29  ;;  %v16157_v7 = vand.u32 4294901760, %v14722_v29  ;;  %v16161_v57 = vand.u32 4294901760, %v14725_v40 }
 0x351   :  { %v14700_v15 = vpack.c.bf16 %v2821_v61, %v2814_v56  ;;  %v14716_v56 = vpack.c.bf16 %v2835_v2, %v2828_v63  ;;  %v2841_v61 = vsub.f32 %v14709_v31, %v16158_v50  ;;  %v14746_v2 = vsub.f32 %v14612_v16, %v16285_v53 }
 0x352   :  { %v2848_v41 = vsub.f32 %v14712_v32, %v16156_v17  ;;  %v2855_v63 = vsub.f32 %v14722_v29, %v16157_v7  ;;  %v2862_v18 = vsub.f32 %v14725_v40, %v16161_v57  ;;  %v16160_v7 = vand.u32 4294901760, %v14741_v45 }
 0x353   :  { %v2842_v5 = vand.u32 4294901760, %v2841_v61  ;;  %16286 = vst [vmem:[#allocation36_spill] sm:$0xff] %v14746_v2  ;;  %v16162_v50 = vand.u32 4294901760, %v14746_v2  ;;  %v16287_v16 = vand.u32 4294901760, %v14620_v42 }
 0x354   :  { %v2849_v39 = vand.u32 4294901760, %v2848_v41  ;;  %v2856_v41 = vand.u32 4294901760, %v2855_v63  ;;  %v2863_v17 = vand.u32 4294901760, %v2862_v18  ;;  %v2869_v55 = vsub.f32 %v14741_v45, %v16160_v7 }
 0x355   :  { %v2876_v26 = vsub.f32 %v14746_v2, %v16162_v50 }
 0x356   :  { %v14748_v61 = vpack.c.bf16 %v2849_v39, %v2842_v5  ;;  %v14752_v51 = vpack.c.bf16 %v2863_v17, %v2856_v41  ;;  %v14763_v5 = vsub.f32 %v14620_v42, %v16287_v16  ;;  %v16289_v39 = vand.u32 4294901760, %v14625_v30 }
 0x357   :  { %v2870_v17 = vand.u32 4294901760, %v2869_v55  ;;  %v2877_v18 = vand.u32 4294901760, %v2876_v26  ;;  %v16291_v42 = vand.u32 4294901760, %v14653_v10 }
 0x358   :  { %16288 = vst [vmem:[#allocation37_spill] sm:$0xff] %v14763_v5  ;;  %v14768_v63 = vsub.f32 %v14625_v30, %v16289_v39  ;;  %v16163_v53 = vand.u32 4294901760, %v14763_v5  ;;  %v16293_v30 = vand.u32 4294901760, %v14658_v0 }
 0x359   :  { %v14772_v57 = vpack.c.bf16 %v2877_v18, %v2870_v17  ;;  %v14780_v16 = vsub.f32 %v14653_v10, %v16291_v42 }
 0x35a   :  { %16290 = vst [vmem:[#allocation38_spill] sm:$0xff] %v14768_v63  ;;  %v16169_v41 = vand.u32 4294901760, %v14768_v63  ;;  %v2883_v50 = vsub.f32 %v14763_v5, %v16163_v53  ;;  %v14785_v55 = vsub.f32 %v14658_v0, %v16293_v30 }
 0x35b   :  { %16292 = vst [vmem:[#allocation39_spill] sm:$0xff] %v14780_v16  ;;  %v16168_v53 = vand.u32 4294901760, %v14780_v16 }
 0x35c   :  { %16294 = vst [vmem:[#allocation40_spill] sm:$0xff] %v14785_v55  ;;  %v2890_v17 = vsub.f32 %v14768_v63, %v16169_v41  ;;  %v2884_v18 = vand.u32 4294901760, %v2883_v50  ;;  %v16167_v20 = vand.u32 4294901760, %v14785_v55  ;;  %v14805_v50 = vpack.c.bf16 %v14648_v19, %v14646_v59 }
 0x35d   :  { %v2897_v10 = vsub.f32 %v14780_v16, %v16168_v53  ;;  %v14833_v53 = vpack.c.bf16 %v14785_v55, %v14780_v16  ;;  %v1540_v16 = vstv %s1538_s3 }
 0x35e   :  { %v2891_v9 = vand.u32 4294901760, %v2890_v17  ;;  %v2904_v0 = vsub.f32 %v14785_v55, %v16167_v20  ;;  %v14813_v17 = vpack.c.bf16 %v14696_v58, %v14694_v22  ;;  %v14829_v20 = vpack.c.bf16 %v14768_v63, %v14763_v5  ;;  %v1539_v55 = vld [vmem:[%s16086_s4 + $0xb0] sm:$0x1]  ;;  %s13811_s4 = smov 16  }
 0x35f   :  { %16298 = vst [vmem:[#allocation44_spill] sm:$0xff] %v14833_v53 }
 0x360   :  { %v2905_v42 = vand.u32 4294901760, %v2904_v0  ;;  %v14825_v0 = vpack.c.bf16 %v14746_v2, %v14741_v45  ;;  %16297 = vst [vmem:[#allocation43_spill] sm:$0xff] %v14829_v20 }
 0x362   :  { %16296 = vst [vmem:[#allocation42_spill] sm:$0xff] %v14825_v0 }
 0x366   :  { %v1908_v7 = vpop.f32.mrb[14].mxu1 }
 0x367   :  { %v1909_v26 = vadd.f32 %v1908_v7, %v14636_v4  ;;  %v10099_v39 = vpop.f32.mrb[15].mxu1  ;;  %v14799_v4 = vpack.c.bf16 %v2891_v9, %v2884_v18  ;;  %v2898_v7 = vand.u32 4294901760, %v2897_v10  ;;  %v14817_v9 = vpack.c.bf16 %v14712_v32, %v14709_v31 }
 0x368   :  { %v14809_v39 = vpack.c.bf16 %v14680_v11, %v14678_v3  ;;  %v14821_v18 = vpack.c.bf16 %v14725_v40, %v14722_v29 }
 0x369   :  { %v14801_v30 = vpack.c.bf16 %v2905_v42, %v2898_v7 }
 0x36a   :  { %16295 = vst [vmem:[#allocation41_spill] sm:$0xff] %v14821_v18 }
 0x386   :  { %v1997_v10 = vpop.f32.mrb[16].mxu1 }
 0x387   :  { %v1998_v7 = vadd.f32 %v1997_v10, %v1909_v26  ;;  %v10134_v42 = vpop.f32.mrb[17].mxu1 }
 0x3a6   :  { %v2116_v41 = vpop.f32.mrb[18].mxu1 }
 0x3a7   :  { %v2117_v32 = vadd.f32 %v2116_v41, %v1998_v7  ;;  %v10169_v31 = vpop.f32.mrb[19].mxu1  ;;  %v1541_v7 = vmul.f32 %v1540_v16, %v1539_v55 }
 0x3a9   :  { %v2204_v40 = vadd.f32 %v14542_v36, %v2117_v32 }
 0x3aa   :  { %v2283_v29 = vpop.f32.mrb[20].mxu1 }
 0x3ab   :  { %v2284_v58 = vadd.f32 %v2283_v29, %v2204_v40  ;;  %v10211_v22 = vpop.f32.mrb[21].mxu1 }
 0x3ac   :  { %v16299_v22 = vsub.s32 0, %v14351_v6 }
 0x3ae   :  { %v2364_v2 = vpop.f32.mrb[22].mxu1  ;;  %v2672_v40 = vrot.slane %v1541_v7, %v16299_v22 }
 0x3af   :  { %v2365_v26 = vadd.f32 %v2364_v2, %v2284_v58  ;;  %v10218_v10 = vpop.f32.mrb[23].mxu1 }
 0x3b2   :  { %v2440_v42 = vpop.f32.mrb[24].mxu1 }
 0x3b3   :  { %v2441_v45 = vadd.f32 %v2440_v42, %v2365_v26  ;;  %v10225_v63 = vpop.f32.mrb[25].mxu1 }
 0x3b6   :  { %v2515_v5 = vpop.f32.mrb[26].mxu1 }
 0x3b7   :  { %v2516_v41 = vadd.f32 %v2515_v5, %v2441_v45  ;;  %v10232_v31 = vpop.f32.mrb[27].mxu1  ;;  %v16300_v5 = vmax.f32 %v14357_v62, 0.0 }
 0x3ba   :  { %v2592_v36 = vpop.f32.mrb[28].mxu1 }
 0x3bb   :  { %v2593_v32 = vadd.f32 %v2592_v36, %v2516_v41  ;;  %v10239_v29 = vpop.f32.mrb[29].mxu1 }
 0x3be   :  { %v2665_v58 = vpop.f32.mrb[30].mxu1 }
 0x3bf   :  { %v2666_v2 = vadd.f32 %v2665_v58, %v2593_v32  ;;  %v10246_v10 = vpop.f32.mrb[31].mxu1 }
 0x3c1   :  { %v14841_v26 = vadd.f32 %v2672_v40, %v2666_v2 }
 0x3c3   :  { %v2674_v63 = vsub.f32 %v14361_v44, %v14841_v26  ;;  %v2676_v42 = vsub.f32 %v14841_v26, %v14361_v44 }
 0x3c5   :  { %v14847_v45 = vmax.f32 %v2674_v63, 0.0  ;;  %v16301_v63 = vld [vmem:[#allocation5_spill] sm:$0xff] }
 0x3c7   :  { %v3345_v16 = vsub.f32 %v16300_v5, %v14847_v45  ;;  %v2677_v6 = vadd.f32 %v2676_v42, %v14847_v45  ;;  %v16302_v42 = vld [vmem:[#allocation24_spill] sm:$0xff]  ;;  %v16303_v5 = vld [vmem:[#allocation6_spill] sm:$0xff] }
 0x3c9   :  { %v3346_v55 = vmul.f32 %v3345_v16, %v3345_v16  ;;  %v14853_v41 = vand.u32 4294901760, %v2677_v6  ;;  %v3368_v31 = vsub.f32 %v3345_v16, %v2677_v6  ;;  %v2678_v29 = vmul.f32 %v2677_v6, %v2677_v6  ;;  %v16304_v16 = vld [vmem:[#allocation25_spill] sm:$0xff] }
 0x3cb   :  { %3347 = vadd.xlane.f32.xlu0 %v3346_v55  ;;  %v14855_v7 = vand.u32 4294901760, %v3368_v31  ;;  %v14858_v36 = vsub.f32 %v2677_v6, %v14853_v41  ;;  %v16305_v6 = vld [vmem:[#allocation7_spill] sm:$0xff]  ;;  %v16306_v55 = vld [vmem:[#allocation26_spill] sm:$0xff] }
 0x3cd   :  { %v14861_v32 = vsub.f32 %v3368_v31, %v14855_v7  ;;  %v16183_v22 = vand.u32 4294901760, %v14858_v36  ;;  %v16307_v31 = vld [vmem:[#allocation8_spill] sm:$0xff] }
 0x3cf   :  { %2679 = vadd.xlane.f32.xlu0 %v2678_v29  ;;  %v2788_v62 = vsub.f32 %v14858_v36, %v16183_v22  ;;  %v16182_v40 = vand.u32 4294901760, %v14861_v32  ;;  %v16308_v29 = vld [vmem:[#allocation27_spill] sm:$0xff]  ;;  %v16314_v22 = vld [vmem:[#allocation10_spill] sm:$0xff] }
 0x3d1   :  { %v2789_v58 = vand.u32 4294901760, %v2788_v62  ;;  %v3453_v2 = vsub.f32 %v14861_v32, %v16182_v40  ;;  %v16309_v62 = vld [vmem:[#allocation9_spill] sm:$0xff] }
 0x3d3   :  { %10280 = vmatmul.mubr.f32.vlgmr.msra.gmra.mrb[8].mxu0 %v2789_v58  ;;  %v3454_v10 = vand.u32 4294901760, %v3453_v2  ;;  %v16310_v58 = vld [vmem:[#allocation28_spill] sm:$0xff]  ;;  %v16311_v2 = vand.u32 4294901760, %v14646_v59 }
 0x3d4   :  { %12415 = vmatpush3.bf16.msra.mxu0 %v14686_v54  ;;  %10314 = vmatprep.mubr.msk.f32.mxu0 %vm13809_vm0, %v16246_v27 }
 0x3d5   :  { %10490 = vmatmul.mubr.f32.vlgmr.msra.gmra.mrb[32].mxu1 %v3454_v10  ;;  %12416 = vmatprep.subr.bf16.mxu0 %v16247_v1  ;;  %v16312_v10 = vand.u32 4294901760, %v14648_v19  ;;  %v16319_v19 = vand.u32 4294901760, %v14861_v32 }
 0x3d6   :  { %12559 = vmatpush3.bf16.msra.mxu1 %v14181_v28  ;;  %10524 = vmatprep.mubr.msk.f32.mxu1 %vm13809_vm0, %v16246_v27 }
 0x3d7   :  { %12560 = vmatprep.subr.bf16.mxu1 %v16247_v1  ;;  %v14984_v40 = vpack.c.bf16 %v16312_v10, %v16311_v2  ;;  %v16327_v2 = vld [vmem:[#allocation31_spill] sm:$0xff] }
 0x3d8   :  { %12418 = vmatpush3.bf16.msra.mxu0 %v14700_v15  ;;  %v16328_v10 = vand.u32 4294901760, %v16327_v2  ;;  %v16338_v2 = vld [vmem:[#allocation19_spill] sm:$0xff] }
 0x3d9   :  { %12419 = vmatprep.subr.bf16.mxu0 %v16247_v1  ;;  %16313 = vst [vmem:[#allocation5_spill] sm:$0xff] %v14984_v40 }
 0x3da   :  { %12562 = vmatpush3.bf16.msra.mxu1 %v14201_v37 }
 0x3db   :  { %12563 = vmatprep.subr.bf16.mxu1 %v16247_v1 }
 0x3dc   :  { %12421 = vmatpush3.bf16.msra.mxu0 %v14716_v56 }
 0x3dd   :  { %12422 = vmatprep.subr.bf16.mxu0 %v16247_v1 }
 0x3de   :  { %12565 = vmatpush3.bf16.msra.mxu1 %v14221_v46 }
 0x3df   :  { %12566 = vmatprep.subr.bf16.mxu1 %v16247_v1 }
 0x3e0   :  { %12424 = vmatpush3.bf16.msra.mxu0 %v14748_v61 }
 0x3e1   :  { %12425 = vmatprep.subr.bf16.mxu0 %v16247_v1 }
 0x3e2   :  { %12568 = vmatpush3.bf16.msra.mxu1 %v14257_v21 }
 0x3e3   :  { %12569 = vmatprep.subr.bf16.mxu1 %v16247_v1 }
 0x3e4   :  { %12427 = vmatpush3.bf16.msra.mxu0 %v14752_v51 }
 0x3e5   :  { %12428 = vmatprep.subr.bf16.mxu0 %v16247_v1 }
 0x3e6   :  { %12571 = vmatpush3.bf16.msra.mxu1 %v14261_v33 }
 0x3e7   :  { %12572 = vmatprep.subr.bf16.mxu1 %v16247_v1 }
 0x3e8   :  { %12430 = vmatpush3.bf16.msra.mxu0 %v14772_v57 }
 0x3e9   :  { %12431 = vmatprep.subr.bf16.mxu0 %v16247_v1 }
 0x3ea   :  { %12574 = vmatpush3.bf16.msra.mxu1 %v14281_v43 }
 0x3eb   :  { %12575 = vmatprep.subr.bf16.mxu1 %v16247_v1 }
 0x3ec   :  { %12433 = vmatpush3.bf16.msra.mxu0 %v14799_v4 }
 0x3ed   :  { %12434 = vmatprep.subr.bf16.mxu0 %v16247_v1 }
 0x3ee   :  { %12577 = vmatpush3.bf16.msra.mxu1 %v14307_v12 }
 0x3ef   :  { %12578 = vmatprep.subr.bf16.mxu1 %v16247_v1 }
 0x3f0   :  { %12436 = vmatpush3.bf16.msra.mxu0 %v14801_v30 }
 0x3f1   :  { %12437 = vmatprep.subr.bf16.mxu0 %v16247_v1 }
 0x3f2   :  { %12580 = vmatpush3.bf16.msra.mxu1 %v14309_v60 }
 0x3f3   :  { %10315 = vmatmul.mubr.f32.vlgmr.msra.gmra.mrb[8].mxu0 %v14853_v41  ;;  %12581 = vmatprep.subr.bf16.mxu1 %v16247_v1 }
 0x3f4   :  { %12439 = vmatpush3.bf16.msra.mxu0 %v14805_v50  ;;  %10349 = vmatprep.mubr.msk.f32.mxu0 %vm13809_vm0, %v16246_v27 }
 0x3f5   :  { %10525 = vmatmul.mubr.f32.vlgmr.msra.gmra.mrb[34].mxu1 %v14855_v7  ;;  %12440 = vmatprep.subr.bf16.mxu0 %v16247_v1 }
 0x3f6   :  { %12583 = vmatpush3.bf16.msra.mxu1 %v14313_v24  ;;  %10559 = vmatprep.mubr.msk.f32.mxu1 %vm13809_vm0, %v16246_v27 }
 0x3f7   :  { %12584 = vmatprep.subr.bf16.mxu1 %v16247_v1 }
 0x3f8   :  { %12442 = vmatpush3.bf16.msra.mxu0 %v14809_v39 }
 0x3f9   :  { %12443 = vmatprep.subr.bf16.mxu0 %v16247_v1 }
 0x3fa   :  { %12586 = vmatpush3.bf16.msra.mxu1 %v14317_v25 }
 0x3fb   :  { %12587 = vmatprep.subr.bf16.mxu1 %v16247_v1 }
 0x3fc   :  { %12445 = vmatpush3.bf16.msra.mxu0 %v14813_v17 }
 0x3fd   :  { %12446 = vmatprep.subr.bf16.mxu0 %v16247_v1 }
 0x3fe   :  { %12589 = vmatpush3.bf16.msra.mxu1 %v14321_v34 }
 0x3ff   :  { %12590 = vmatprep.subr.bf16.mxu1 %v16247_v1 }
 0x400   :  { %12448 = vmatpush3.bf16.msra.mxu0 %v14817_v9 }
 0x401   :  { %12449 = vmatprep.subr.bf16.mxu0 %v16247_v1 }
 0x402   :  { %12592 = vmatpush3.bf16.msra.mxu1 %v14325_v8 }
 0x403   :  { %12593 = vmatprep.subr.bf16.mxu1 %v16247_v1 }
 0x404   :  { %12451 = vmatpush3.bf16.msra.mxu0 %v14821_v18 }
 0x405   :  { %12452 = vmatprep.subr.bf16.mxu0 %v16247_v1 }
 0x406   :  { %12595 = vmatpush3.bf16.msra.mxu1 %v14332_v14 }
 0x407   :  { %12596 = vmatprep.subr.bf16.mxu1 %v16247_v1 }
 0x408   :  { %12454 = vmatpush3.bf16.msra.mxu0 %v14825_v0 }
 0x409   :  { %12455 = vmatprep.subr.bf16.mxu0 %v16247_v1 }
 0x40a   :  { %12598 = vmatpush3.bf16.msra.mxu1 %v14336_v47 }
 0x40b   :  { %12599 = vmatprep.subr.bf16.mxu1 %v16247_v1 }
 0x40c   :  { %12457 = vmatpush3.bf16.msra.mxu0 %v14829_v20 }
 0x40d   :  { %12458 = vmatprep.subr.bf16.mxu0 %v16247_v1 }
 0x40e   :  { %12601 = vmatpush3.bf16.msra.mxu1 %v14340_v52  ;;  %v16317_v52 = vand.u32 4294901760, %v14680_v11 }
 0x40f   :  { %12602 = vmatprep.subr.bf16.mxu1 %v16247_v1 }
 0x410   :  { %12460 = vmatpush3.bf16.msra.mxu0 %v14833_v53  ;;  %v16316_v53 = vand.u32 4294901760, %v14678_v3  ;;  %v16323_v3 = vld [vmem:[#allocation30_spill] sm:$0xff] }
 0x411   :  { %12461 = vmatprep.subr.bf16.mxu0 %v16247_v1  ;;  %v16324_v11 = vand.u32 4294901760, %v16323_v3 }
 0x412   :  { %12604 = vmatpush3.bf16.msra.mxu1 %v14344_v38  ;;  %v16315_v38 = vand.u32 4294901760, %v14858_v36  ;;  %v14996_v59 = vpack.c.bf16 %v16317_v52, %v16316_v53 }
 0x413   :  { %10350 = vmatmul.mubr.f32.vlgmr.msra.gmra.mrb[8].mxu0 %v14858_v36  ;;  %12605 = vmatprep.subr.bf16.mxu1 %v16247_v1  ;;  %v16320_v36 = vld [vmem:[#allocation16_spill] sm:$0xff] }
 0x414   :  { %12463 = vmatpush3.bf16.msra.mxu0 %v14550_v13  ;;  %10384 = vmatprep.mubr.msk.f32.mxu0 %vm13809_vm0, %v16246_v27  ;;  %16318 = vst [vmem:[#allocation24_spill] sm:$0xff] %v14996_v59 }
 0x415   :  { %10560 = vmatmul.mubr.f32.vlgmr.msra.gmra.mrb[36].mxu1 %v14861_v32  ;;  %12464 = vmatprep.subr.bf16.mxu0 %v16247_v1  ;;  %v16326_v32 = vld [vmem:[#allocation17_spill] sm:$0xff] }
 0x416   :  { %12607 = vmatpush3.bf16.msra.mxu1 %v14013_v48  ;;  %10594 = vmatprep.mubr.msk.f32.mxu1 %vm13809_vm0, %v16246_v27 }
 0x417   :  { %12608 = vmatprep.subr.bf16.mxu1 %v16247_v1 }
 0x418   :  { %12466 = vmatpush3.bf16.msra.mxu0 %v14560_v23 }
 0x419   :  { %12467 = vmatprep.subr.bf16.mxu0 %v16247_v1 }
 0x41a   :  { %12610 = vmatpush3.bf16.msra.mxu1 %v14020_v49 }
 0x41b   :  { %12611 = vmatprep.subr.bf16.mxu1 %v16247_v1 }
 0x41c   :  { %12469 = vmatpush3.bf16.msra.mxu0 %v14570_v35 }
 0x41d   :  { %12470 = vmatprep.subr.bf16.mxu0 %v16247_v1 }
 0x41e   :  { %12613 = vmatpush3.bf16.msra.mxu1 %v16301_v63 }
 0x41f   :  { %12614 = vmatprep.subr.bf16.mxu1 %v16247_v1 }
 0x420   :  { %12472 = vmatpush3.bf16.msra.mxu0 %v16302_v42 }
 0x421   :  { %12473 = vmatprep.subr.bf16.mxu0 %v16247_v1 }
 0x422   :  { %12616 = vmatpush3.bf16.msra.mxu1 %v16303_v5 }
 0x423   :  { %12617 = vmatprep.subr.bf16.mxu1 %v16247_v1 }
 0x424   :  { %12475 = vmatpush3.bf16.msra.mxu0 %v16304_v16 }
 0x425   :  { %12476 = vmatprep.subr.bf16.mxu0 %v16247_v1 }
 0x426   :  { %12619 = vmatpush3.bf16.msra.mxu1 %v16305_v6 }
 0x427   :  { %12620 = vmatprep.subr.bf16.mxu1 %v16247_v1 }
 0x428   :  { %12478 = vmatpush3.bf16.msra.mxu0 %v16306_v55 }
 0x429   :  { %12479 = vmatprep.subr.bf16.mxu0 %v16247_v1 }
 0x42a   :  { %12622 = vmatpush3.bf16.msra.mxu1 %v16307_v31 }
 0x42b   :  { %12623 = vmatprep.subr.bf16.mxu1 %v16247_v1 }
 0x42c   :  { %12481 = vmatpush3.bf16.msra.mxu0 %v16308_v29 }
 0x42d   :  { %12482 = vmatprep.subr.bf16.mxu0 %v16247_v1 }
 0x42e   :  { %12625 = vmatpush3.bf16.msra.mxu1 %v16309_v62 }
 0x42f   :  { %12626 = vmatprep.subr.bf16.mxu1 %v16247_v1 }
 0x430   :  { %12484 = vmatpush3.bf16.msra.mxu0 %v16310_v58 }
 0x431   :  { %12485 = vmatprep.subr.bf16.mxu0 %v16247_v1 }
 0x432   :  { %12628 = vmatpush3.bf16.msra.mxu1 %v16314_v22 }
 0x433   :  { %10385 = vmatmul.mubr.f32.vlgmr.msra.gmra.mrb[8].mxu0 %v16315_v38  ;;  %12629 = vmatprep.subr.bf16.mxu1 %v16247_v1  ;;  %v16321_v38 = vld [vmem:[#allocation29_spill] sm:$0xff] }
 0x434   :  { %12487 = vmatpush3.bf16.msra.mxu0 %v14984_v40  ;;  %10419 = vmatprep.mubr.msk.f32.mxu0 %vm13809_vm0, %v16246_v27  ;;  %v16322_v52 = vand.u32 4294901760, %v16321_v38  ;;  %v16332_v38 = vld [vmem:[#allocation18_spill] sm:$0xff] }
 0x435   :  { %10595 = vmatmul.mubr.f32.vlgmr.msra.gmra.mrb[38].mxu1 %v16319_v19  ;;  %12488 = vmatprep.subr.bf16.mxu0 %v16247_v1  ;;  %v16329_v19 = vld [vmem:[#allocation32_spill] sm:$0xff] }
 0x436   :  { %12631 = vmatpush3.bf16.msra.mxu1 %v16320_v36  ;;  %10629 = vmatprep.mubr.msk.f32.mxu1 %vm13809_vm0, %v16246_v27  ;;  %v15012_v53 = vpack.c.bf16 %v16324_v11, %v16322_v52  ;;  %v16330_v36 = vand.u32 4294901760, %v16329_v19  ;;  %v16333_v52 = vld [vmem:[#allocation33_spill] sm:$0xff]  ;;  %v16335_v11 = vld [vmem:[#allocation34_spill] sm:$0xff]  ;;  %v16341_v19 = vld [vmem:[#allocation36_spill] sm:$0xff] }
 0x437   :  { %12632 = vmatprep.subr.bf16.mxu1 %v16247_v1  ;;  %v16334_v3 = vand.u32 4294901760, %v16333_v52  ;;  %v16344_v52 = vld [vmem:[#allocation20_spill] sm:$0xff] }
 0x438   :  { %12490 = vmatpush3.bf16.msra.mxu0 %v14996_v59  ;;  %16325 = vst [vmem:[#allocation29_spill] sm:$0xff] %v15012_v53  ;;  %v15022_v40 = vpack.c.bf16 %v16330_v36, %v16328_v10  ;;  %v16339_v36 = vld [vmem:[#allocation35_spill] sm:$0xff] }
 0x439   :  { %12491 = vmatprep.subr.bf16.mxu0 %v16247_v1  ;;  %v16340_v10 = vand.u32 4294901760, %v16339_v36  ;;  %v16350_v36 = vld [vmem:[#allocation21_spill] sm:$0xff] }
 0x43a   :  { %12634 = vmatpush3.bf16.msra.mxu1 %v16326_v32  ;;  %16331 = vst [vmem:[#allocation30_spill] sm:$0xff] %v15022_v40  ;;  %v16336_v32 = vand.u32 4294901760, %v16335_v11  ;;  %v16347_v11 = vld [vmem:[#allocation38_spill] sm:$0xff] }
 0x43b   :  { %12635 = vmatprep.subr.bf16.mxu1 %v16247_v1 }
 0x43c   :  { %12493 = vmatpush3.bf16.msra.mxu0 %v15012_v53  ;;  %v15032_v59 = vpack.c.bf16 %v16336_v32, %v16334_v3  ;;  %v16345_v32 = vld [vmem:[#allocation37_spill] sm:$0xff] }
 0x43d   :  { %12494 = vmatprep.subr.bf16.mxu0 %v16247_v1  ;;  %v16346_v3 = vand.u32 4294901760, %v16345_v32  ;;  %v16356_v32 = vld [vmem:[#allocation22_spill] sm:$0xff] }
 0x43e   :  { %12637 = vmatpush3.bf16.msra.mxu1 %v16332_v38  ;;  %16337 = vst [vmem:[#allocation31_spill] sm:$0xff] %v15032_v59  ;;  %v16342_v38 = vand.u32 4294901760, %v16341_v19  ;;  %v16353_v19 = vld [vmem:[#allocation40_spill] sm:$0xff] }
 0x43f   :  { %12638 = vmatprep.subr.bf16.mxu1 %v16247_v1 }
 0x440   :  { %12496 = vmatpush3.bf16.msra.mxu0 %v15022_v40  ;;  %v15042_v53 = vpack.c.bf16 %v16342_v38, %v16340_v10  ;;  %v16351_v38 = vld [vmem:[#allocation39_spill] sm:$0xff] }
 0x441   :  { %12497 = vmatprep.subr.bf16.mxu0 %v16247_v1  ;;  %v16352_v10 = vand.u32 4294901760, %v16351_v38 }
 0x442   :  { %12640 = vmatpush3.bf16.msra.mxu1 %v16338_v2  ;;  %16343 = vst [vmem:[#allocation32_spill] sm:$0xff] %v15042_v53  ;;  %v16348_v2 = vand.u32 4294901760, %v16347_v11 }
 0x443   :  { %12641 = vmatprep.subr.bf16.mxu1 %v16247_v1 }
 0x444   :  { %12499 = vmatpush3.bf16.msra.mxu0 %v15032_v59  ;;  %v15052_v40 = vpack.c.bf16 %v16348_v2, %v16346_v3  ;;  %v16357_v2 = vld [vmem:[#allocation23_spill] sm:$0xff] }
 0x445   :  { %12500 = vmatprep.subr.bf16.mxu0 %v16247_v1 }
 0x446   :  { %12643 = vmatpush3.bf16.msra.mxu1 %v16344_v52  ;;  %16349 = vst [vmem:[#allocation33_spill] sm:$0xff] %v15052_v40  ;;  %v16354_v52 = vand.u32 4294901760, %v16353_v19 }
 0x447   :  { %12644 = vmatprep.subr.bf16.mxu1 %v16247_v1 }
 0x448   :  { %12502 = vmatpush3.bf16.msra.mxu0 %v15042_v53  ;;  %v15062_v59 = vpack.c.bf16 %v16354_v52, %v16352_v10 }
 0x449   :  { %12503 = vmatprep.subr.bf16.mxu0 %v16247_v1 }
 0x44a   :  { %12646 = vmatpush3.bf16.msra.mxu1 %v16350_v36  ;;  %16355 = vst [vmem:[#allocation34_spill] sm:$0xff] %v15062_v59 }
 0x44b   :  { %12647 = vmatprep.subr.bf16.mxu1 %v16247_v1 }
 0x44c   :  { %12505 = vmatpush3.bf16.msra.mxu0 %v15052_v40 }
 0x44d   :  { %12506 = vmatprep.subr.bf16.mxu0 %v16247_v1 }
 0x44e   :  { %12649 = vmatpush3.bf16.msra.mxu1 %v16356_v32 }
 0x44f   :  { %12650 = vmatprep.subr.bf16.mxu1 %v16247_v1 }
 0x450   :  { %12508 = vmatpush3.bf16.msra.mxu0 %v15062_v59 }
 0x451   :  { %12509 = vmatprep.subr.bf16.mxu0 %v16247_v1 }
 0x452   :  { %12652 = vmatpush3.bf16.msra.mxu1 %v16357_v2 }
 0x453   :  { %10420 = vmatmul.mubr.f32.vlgmr.msra.gmra.mrb[8].mxu0 %v14853_v41  ;;  %12653 = vmatprep.subr.bf16.mxu1 %v16247_v1 }
 0x454   :  { %12511 = vmatpush3.bf16.msra.mxu0 %v14550_v13  ;;  %10454 = vmatprep.mubr.msk.f32.mxu0 %vm13809_vm0, %v16246_v27 }
 0x455   :  { %10630 = vmatmul.mubr.f32.vlgmr.msra.gmra.mrb[40].mxu1 %v14855_v7  ;;  %12512 = vmatprep.subr.bf16.mxu0 %v16247_v1 }
 0x456   :  { %12655 = vmatpush3.bf16.msra.mxu1 %v14013_v48  ;;  %10664 = vmatprep.mubr.msk.f32.mxu1 %vm13809_vm0, %v16246_v27 }
 0x457   :  { %12656 = vmatprep.subr.bf16.mxu1 %v16247_v1 }
 0x458   :  { %12514 = vmatpush3.bf16.msra.mxu0 %v14560_v23 }
 0x459   :  { %12515 = vmatprep.subr.bf16.mxu0 %v16247_v1 }
 0x45a   :  { %12658 = vmatpush3.bf16.msra.mxu1 %v14020_v49 }
 0x45b   :  { %12659 = vmatprep.subr.bf16.mxu1 %v16247_v1 }
 0x45c   :  { %12517 = vmatpush3.bf16.msra.mxu0 %v14570_v35 }
 0x45d   :  { %12518 = vmatprep.subr.bf16.mxu0 %v16247_v1 }
 0x45e   :  { %12661 = vmatpush3.bf16.msra.mxu1 %v16301_v63 }
 0x45f   :  { %12662 = vmatprep.subr.bf16.mxu1 %v16247_v1 }
 0x460   :  { %12520 = vmatpush3.bf16.msra.mxu0 %v16302_v42 }
 0x461   :  { %12521 = vmatprep.subr.bf16.mxu0 %v16247_v1 }
 0x462   :  { %12664 = vmatpush3.bf16.msra.mxu1 %v16303_v5 }
 0x463   :  { %12665 = vmatprep.subr.bf16.mxu1 %v16247_v1 }
 0x464   :  { %12523 = vmatpush3.bf16.msra.mxu0 %v16304_v16 }
 0x465   :  { %12524 = vmatprep.subr.bf16.mxu0 %v16247_v1 }
 0x466   :  { %12667 = vmatpush3.bf16.msra.mxu1 %v16305_v6 }
 0x467   :  { %12668 = vmatprep.subr.bf16.mxu1 %v16247_v1 }
 0x468   :  { %12526 = vmatpush3.bf16.msra.mxu0 %v16306_v55 }
 0x469   :  { %12527 = vmatprep.subr.bf16.mxu0 %v16247_v1 }
 0x46a   :  { %12670 = vmatpush3.bf16.msra.mxu1 %v16307_v31 }
 0x46b   :  { %12671 = vmatprep.subr.bf16.mxu1 %v16247_v1 }
 0x46c   :  { %12529 = vmatpush3.bf16.msra.mxu0 %v16308_v29 }
 0x46d   :  { %12530 = vmatprep.subr.bf16.mxu0 %v16247_v1 }
 0x46e   :  { %12673 = vmatpush3.bf16.msra.mxu1 %v16309_v62 }
 0x46f   :  { %12674 = vmatprep.subr.bf16.mxu1 %v16247_v1 }
 0x470   :  { %12532 = vmatpush3.bf16.msra.mxu0 %v16310_v58 }
 0x471   :  { %12677 = vmatprep.subr.bf16.mxu0 %v16247_v1 }
 0x472   :  { %12676 = vmatpush3.bf16.msra.mxu1 %v16314_v22 }
 0x473   :  { %10455 = vmatmul.mubr.f32.vlgmr.msra.gmra.mrb[8].mxu0 %v14853_v41  ;;  %12821 = vmatprep.subr.bf16.mxu1 %v16247_v1 }
 0x474   :  { %12679 = vmatpush3.bf16.msra.mxu0 %v14550_v13  ;;  %10699 = vmatprep.mubr.msk.f32.mxu0 %vm13809_vm0, %v16246_v27 }
 0x475   :  { %10665 = vmatmul.mubr.f32.vlgmr.msra.gmra.mrb[42].mxu1 %v14855_v7  ;;  %12680 = vmatprep.subr.bf16.mxu0 %v16247_v1 }
 0x476   :  { %12823 = vmatpush3.bf16.msra.mxu1 %v14013_v48  ;;  %10909 = vmatprep.mubr.msk.f32.mxu1 %vm13809_vm0, %v16246_v27 }
 0x477   :  { %12824 = vmatprep.subr.bf16.mxu1 %v16247_v1 }
 0x478   :  { %12682 = vmatpush3.bf16.msra.mxu0 %v14560_v23 }
 0x479   :  { %12683 = vmatprep.subr.bf16.mxu0 %v16247_v1 }
 0x47a   :  { %12826 = vmatpush3.bf16.msra.mxu1 %v14020_v49 }
 0x47b   :  { %12827 = vmatprep.subr.bf16.mxu1 %v16247_v1 }
 0x47c   :  { %12685 = vmatpush3.bf16.msra.mxu0 %v14570_v35 }
 0x47d   :  { %12686 = vmatprep.subr.bf16.mxu0 %v16247_v1 }
 0x47e   :  { %12829 = vmatpush3.bf16.msra.mxu1 %v16301_v63 }
 0x47f   :  { %12830 = vmatprep.subr.bf16.mxu1 %v16247_v1 }
 0x480   :  { %12688 = vmatpush3.bf16.msra.mxu0 %v16302_v42 }
 0x481   :  { %12689 = vmatprep.subr.bf16.mxu0 %v16247_v1 }
 0x482   :  { %12832 = vmatpush3.bf16.msra.mxu1 %v16303_v5 }
 0x483   :  { %12833 = vmatprep.subr.bf16.mxu1 %v16247_v1 }
 0x484   :  { %12691 = vmatpush3.bf16.msra.mxu0 %v16304_v16 }
 0x485   :  { %12692 = vmatprep.subr.bf16.mxu0 %v16247_v1 }
 0x486   :  { %12835 = vmatpush3.bf16.msra.mxu1 %v16305_v6 }
 0x487   :  { %12836 = vmatprep.subr.bf16.mxu1 %v16247_v1 }
 0x488   :  { %12694 = vmatpush3.bf16.msra.mxu0 %v16306_v55 }
 0x489   :  { %12695 = vmatprep.subr.bf16.mxu0 %v16247_v1 }
 0x48a   :  { %12838 = vmatpush3.bf16.msra.mxu1 %v16307_v31 }
 0x48b   :  { %12839 = vmatprep.subr.bf16.mxu1 %v16247_v1 }
 0x48c   :  { %12697 = vmatpush3.bf16.msra.mxu0 %v16308_v29 }
 0x48d   :  { %12698 = vmatprep.subr.bf16.mxu0 %v16247_v1 }
 0x48e   :  { %12841 = vmatpush3.bf16.msra.mxu1 %v16309_v62 }
 0x48f   :  { %12842 = vmatprep.subr.bf16.mxu1 %v16247_v1 }
 0x490   :  { %12700 = vmatpush3.bf16.msra.mxu0 %v16310_v58 }
 0x491   :  { %12701 = vmatprep.subr.bf16.mxu0 %v16247_v1 }
 0x492   :  { %12844 = vmatpush3.bf16.msra.mxu1 %v16314_v22 }
 0x493   :  { %12845 = vmatprep.subr.bf16.mxu1 %v16247_v1 }
 0x4a8   :  { %v3456_v41 = vpop.f32.mrb[32].mxu1 }
 0x4a9   :  { %v10491_v7 = vpop.f32.mrb[33].mxu1 }
 0x4c8   :  { %v3607_v52 = vpop.f32.mrb[34].mxu1 }
 0x4c9   :  { %v3608_v3 = vadd.f32 %v3607_v52, %v3456_v41  ;;  %v10526_v11 = vpop.f32.mrb[35].mxu1 }
 0x4e8   :  { %v3711_v38 = vpop.f32.mrb[36].mxu1 }
 0x4e9   :  { %v3712_v10 = vadd.f32 %v3711_v38, %v3608_v3  ;;  %v10561_v19 = vpop.f32.mrb[37].mxu1 }
 0x4ea   :  { %v16359_v19 = vld [vmem:[#allocation44_spill] sm:$0xff] }
 0x508   :  { %v3800_v2 = vpop.f32.mrb[38].mxu1 }
 0x509   :  { %v3801_v59 = vadd.f32 %v3800_v2, %v3712_v10  ;;  %v10596_v32 = vpop.f32.mrb[39].mxu1  ;;  %v16358_v10 = vld [vmem:[#allocation14_spill] sm:$0xff] }
 0x528   :  { %v3919_v40 = vpop.f32.mrb[40].mxu1 }
 0x529   :  { %v3920_v36 = vadd.f32 %v3919_v40, %v3801_v59  ;;  %v10631_v53 = vpop.f32.mrb[41].mxu1 }
 0x546   :  { %v3341_v58 = vpop.f32.mrb[8].mxu0 }
 0x547   :  { %v3356_v62 = vmul.f32 %v3341_v58, %v3341_v58  ;;  %v10456_v29 = vpop.f32.mrb[9].mxu0 }
 0x548   :  { %v4006_v22 = vpop.f32.mrb[42].mxu1 }
 0x549   :  { %v4007_v31 = vadd.f32 %v4006_v22, %v3920_v36  ;;  %v10666_v55 = vpop.f32.mrb[43].mxu1  ;;  %v3357_v7 = vsel %vm42_vm1, %v3356_v62, 0.0 }
 0x54a   :  { %3358 = vadd.xlane.f32.xlu0 %v3357_v7  ;;  %v16360_v7 = vld [vmem:[#allocation15_spill] sm:$0xff] }
 0x54b   :  { %v15149_v41 = vadd.f32 %v4007_v31, %v14841_v26 }
 0x54d   :  { %v4011_v52 = vsub.f32 %v14361_v44, %v15149_v41  ;;  %v4013_v32 = vsub.f32 %v15149_v41, %v14361_v44 }
 0x54f   :  { %v15155_v40 = vmax.f32 %v4011_v52, 0.0  ;;  %v16361_v52 = vld [vmem:[#allocation26_spill] sm:$0xff] }
 0x551   :  { %v4666_v29 = vsub.f32 %v14847_v45, %v15155_v40  ;;  %v4014_v22 = vadd.f32 %v4013_v32, %v15155_v40  ;;  %v16362_v32 = vld [vmem:[#allocation8_spill] sm:$0xff] }
 0x553   :  { %v4667_v55 = vmul.f32 %v4666_v29, %v4666_v29  ;;  %v15160_v58 = vand.u32 4294901760, %v4014_v22  ;;  %v4689_v62 = vsub.f32 %v4666_v29, %v4014_v22  ;;  %v4015_v53 = vmul.f32 %v4014_v22, %v4014_v22  ;;  %v16363_v29 = vld [vmem:[#allocation27_spill] sm:$0xff] }
 0x555   :  { %4668 = vadd.xlane.f32.xlu1 %v4667_v55  ;;  %v15162_v26 = vand.u32 4294901760, %v4689_v62  ;;  %v15165_v31 = vsub.f32 %v4014_v22, %v15160_v58  ;;  %v16364_v22 = vld [vmem:[#allocation9_spill] sm:$0xff]  ;;  %v16365_v55 = vld [vmem:[#allocation28_spill] sm:$0xff] }
 0x557   :  { %v15168_v59 = vsub.f32 %v4689_v62, %v15162_v26  ;;  %v4108_v36 = vand.u32 4294901760, %v15165_v31  ;;  %v16366_v62 = vld [vmem:[#allocation10_spill] sm:$0xff] }
 0x559   :  { %4016 = vadd.xlane.f32.xlu1 %v4015_v53  ;;  %v4109_v45 = vsub.f32 %v15165_v31, %v4108_v36  ;;  %v4773_v2 = vand.u32 4294901760, %v15168_v59  ;;  %v16367_v53 = vld [vmem:[#allocation5_spill] sm:$0xff] }
 0x55b   :  { %v4110_v3 = vand.u32 4294901760, %v4109_v45  ;;  %v4774_v11 = vsub.f32 %v15168_v59, %v4773_v2  ;;  %v16368_v45 = vld [vmem:[#allocation16_spill] sm:$0xff] }
 0x55d   :  { %10700 = vmatmul.mubr.f32.vlgmr.msra.gmra.mrb[10].mxu0 %v4110_v3  ;;  %v4775_v38 = vand.u32 4294901760, %v4774_v11  ;;  %v16371_v3 = vld [vmem:[#allocation29_spill] sm:$0xff]  ;;  %v16374_v11 = vld [vmem:[#allocation19_spill] sm:$0xff] }
 0x55e   :  { %12703 = vmatpush3.bf16.msra.mxu0 %v14686_v54  ;;  %10734 = vmatprep.mubr.msk.f32.mxu0 %vm13809_vm0, %v16246_v27 }
 0x55f   :  { %10910 = vmatmul.mubr.f32.vlgmr.msra.gmra.mrb[44].mxu1 %v4775_v38  ;;  %12704 = vmatprep.subr.bf16.mxu0 %v16247_v1  ;;  %v16375_v38 = vld [vmem:[#allocation31_spill] sm:$0xff] }
 0x560   :  { %12847 = vmatpush3.bf16.msra.mxu1 %v14181_v28  ;;  %10944 = vmatprep.mubr.msk.f32.mxu1 %vm13809_vm0, %v16246_v27 }
 0x561   :  { %12848 = vmatprep.subr.bf16.mxu1 %v16247_v1 }
 0x562   :  { %12706 = vmatpush3.bf16.msra.mxu0 %v14700_v15 }
 0x563   :  { %12707 = vmatprep.subr.bf16.mxu0 %v16247_v1 }
 0x564   :  { %12850 = vmatpush3.bf16.msra.mxu1 %v14201_v37 }
 0x565   :  { %12851 = vmatprep.subr.bf16.mxu1 %v16247_v1 }
 0x566   :  { %12709 = vmatpush3.bf16.msra.mxu0 %v14716_v56 }
 0x567   :  { %12710 = vmatprep.subr.bf16.mxu0 %v16247_v1 }
 0x568   :  { %12853 = vmatpush3.bf16.msra.mxu1 %v14221_v46 }
 0x569   :  { %12854 = vmatprep.subr.bf16.mxu1 %v16247_v1 }
 0x56a   :  { %12712 = vmatpush3.bf16.msra.mxu0 %v14748_v61 }
 0x56b   :  { %12713 = vmatprep.subr.bf16.mxu0 %v16247_v1 }
 0x56c   :  { %12856 = vmatpush3.bf16.msra.mxu1 %v14257_v21 }
 0x56d   :  { %12857 = vmatprep.subr.bf16.mxu1 %v16247_v1 }
 0x56e   :  { %12715 = vmatpush3.bf16.msra.mxu0 %v14752_v51 }
 0x56f   :  { %12716 = vmatprep.subr.bf16.mxu0 %v16247_v1 }
 0x570   :  { %12859 = vmatpush3.bf16.msra.mxu1 %v14261_v33 }
 0x571   :  { %12860 = vmatprep.subr.bf16.mxu1 %v16247_v1 }
 0x572   :  { %12718 = vmatpush3.bf16.msra.mxu0 %v14772_v57 }
 0x573   :  { %12719 = vmatprep.subr.bf16.mxu0 %v16247_v1 }
 0x574   :  { %12862 = vmatpush3.bf16.msra.mxu1 %v14281_v43 }
 0x575   :  { %12863 = vmatprep.subr.bf16.mxu1 %v16247_v1 }
 0x576   :  { %12721 = vmatpush3.bf16.msra.mxu0 %v14799_v4 }
 0x577   :  { %12722 = vmatprep.subr.bf16.mxu0 %v16247_v1 }
 0x578   :  { %12865 = vmatpush3.bf16.msra.mxu1 %v14307_v12 }
 0x579   :  { %12866 = vmatprep.subr.bf16.mxu1 %v16247_v1 }
 0x57a   :  { %12724 = vmatpush3.bf16.msra.mxu0 %v14801_v30 }
 0x57b   :  { %12725 = vmatprep.subr.bf16.mxu0 %v16247_v1 }
 0x57c   :  { %12868 = vmatpush3.bf16.msra.mxu1 %v14309_v60 }
 0x57d   :  { %10735 = vmatmul.mubr.f32.vlgmr.msra.gmra.mrb[10].mxu0 %v15160_v58  ;;  %12869 = vmatprep.subr.bf16.mxu1 %v16247_v1 }
 0x57e   :  { %12727 = vmatpush3.bf16.msra.mxu0 %v14805_v50  ;;  %10769 = vmatprep.mubr.msk.f32.mxu0 %vm13809_vm0, %v16246_v27 }
 0x57f   :  { %10945 = vmatmul.mubr.f32.vlgmr.msra.gmra.mrb[46].mxu1 %v15162_v26  ;;  %12728 = vmatprep.subr.bf16.mxu0 %v16247_v1 }
 0x580   :  { %12871 = vmatpush3.bf16.msra.mxu1 %v14313_v24  ;;  %10979 = vmatprep.mubr.msk.f32.mxu1 %vm13809_vm0, %v16246_v27 }
 0x581   :  { %12872 = vmatprep.subr.bf16.mxu1 %v16247_v1 }
 0x582   :  { %12730 = vmatpush3.bf16.msra.mxu0 %v14809_v39 }
 0x583   :  { %12731 = vmatprep.subr.bf16.mxu0 %v16247_v1 }
 0x584   :  { %12874 = vmatpush3.bf16.msra.mxu1 %v14317_v25 }
 0x585   :  { %12875 = vmatprep.subr.bf16.mxu1 %v16247_v1 }
 0x586   :  { %12733 = vmatpush3.bf16.msra.mxu0 %v14813_v17 }
 0x587   :  { %12734 = vmatprep.subr.bf16.mxu0 %v16247_v1 }
 0x588   :  { %12877 = vmatpush3.bf16.msra.mxu1 %v14321_v34 }
 0x589   :  { %12878 = vmatprep.subr.bf16.mxu1 %v16247_v1 }
 0x58a   :  { %12736 = vmatpush3.bf16.msra.mxu0 %v14817_v9 }
 0x58b   :  { %12737 = vmatprep.subr.bf16.mxu0 %v16247_v1 }
 0x58c   :  { %12880 = vmatpush3.bf16.msra.mxu1 %v14325_v8 }
 0x58d   :  { %12881 = vmatprep.subr.bf16.mxu1 %v16247_v1 }
 0x58e   :  { %12739 = vmatpush3.bf16.msra.mxu0 %v14821_v18 }
 0x58f   :  { %12740 = vmatprep.subr.bf16.mxu0 %v16247_v1 }
 0x590   :  { %12883 = vmatpush3.bf16.msra.mxu1 %v14332_v14 }
 0x591   :  { %12884 = vmatprep.subr.bf16.mxu1 %v16247_v1 }
 0x592   :  { %12742 = vmatpush3.bf16.msra.mxu0 %v14825_v0 }
 0x593   :  { %12743 = vmatprep.subr.bf16.mxu0 %v16247_v1 }
 0x594   :  { %12886 = vmatpush3.bf16.msra.mxu1 %v14336_v47 }
 0x595   :  { %12887 = vmatprep.subr.bf16.mxu1 %v16247_v1 }
 0x596   :  { %12745 = vmatpush3.bf16.msra.mxu0 %v14829_v20 }
 0x597   :  { %12746 = vmatprep.subr.bf16.mxu0 %v16247_v1 }
 0x598   :  { %12889 = vmatpush3.bf16.msra.mxu1 %v16358_v10 }
 0x599   :  { %12890 = vmatprep.subr.bf16.mxu1 %v16247_v1 }
 0x59a   :  { %12748 = vmatpush3.bf16.msra.mxu0 %v16359_v19 }
 0x59b   :  { %12749 = vmatprep.subr.bf16.mxu0 %v16247_v1 }
 0x59c   :  { %12892 = vmatpush3.bf16.msra.mxu1 %v16360_v7 }
 0x59d   :  { %10770 = vmatmul.mubr.f32.vlgmr.msra.gmra.mrb[10].mxu0 %v15165_v31  ;;  %12893 = vmatprep.subr.bf16.mxu1 %v16247_v1  ;;  %v16369_v31 = vld [vmem:[#allocation24_spill] sm:$0xff] }
 0x59e   :  { %12751 = vmatpush3.bf16.msra.mxu0 %v14550_v13  ;;  %10804 = vmatprep.mubr.msk.f32.mxu0 %vm13809_vm0, %v16246_v27 }
 0x59f   :  { %10980 = vmatmul.mubr.f32.vlgmr.msra.gmra.mrb[48].mxu1 %v15168_v59  ;;  %12752 = vmatprep.subr.bf16.mxu0 %v16247_v1  ;;  %v16372_v59 = vld [vmem:[#allocation18_spill] sm:$0xff] }
 0x5a0   :  { %12895 = vmatpush3.bf16.msra.mxu1 %v14013_v48  ;;  %11014 = vmatprep.mubr.msk.f32.mxu1 %vm13809_vm0, %v16246_v27 }
 0x5a1   :  { %12896 = vmatprep.subr.bf16.mxu1 %v16247_v1 }
 0x5a2   :  { %12754 = vmatpush3.bf16.msra.mxu0 %v14560_v23 }
 0x5a3   :  { %12755 = vmatprep.subr.bf16.mxu0 %v16247_v1 }
 0x5a4   :  { %12898 = vmatpush3.bf16.msra.mxu1 %v14020_v49 }
 0x5a5   :  { %12899 = vmatprep.subr.bf16.mxu1 %v16247_v1 }
 0x5a6   :  { %12757 = vmatpush3.bf16.msra.mxu0 %v14570_v35 }
 0x5a7   :  { %12758 = vmatprep.subr.bf16.mxu0 %v16247_v1 }
 0x5a8   :  { %12901 = vmatpush3.bf16.msra.mxu1 %v16301_v63 }
 0x5a9   :  { %12902 = vmatprep.subr.bf16.mxu1 %v16247_v1 }
 0x5aa   :  { %12760 = vmatpush3.bf16.msra.mxu0 %v16302_v42 }
 0x5ab   :  { %12761 = vmatprep.subr.bf16.mxu0 %v16247_v1 }
 0x5ac   :  { %12904 = vmatpush3.bf16.msra.mxu1 %v16303_v5 }
 0x5ad   :  { %12905 = vmatprep.subr.bf16.mxu1 %v16247_v1 }
 0x5ae   :  { %12763 = vmatpush3.bf16.msra.mxu0 %v16304_v16 }
 0x5af   :  { %12764 = vmatprep.subr.bf16.mxu0 %v16247_v1 }
 0x5b0   :  { %12907 = vmatpush3.bf16.msra.mxu1 %v16305_v6 }
 0x5b1   :  { %12908 = vmatprep.subr.bf16.mxu1 %v16247_v1 }
 0x5b2   :  { %12766 = vmatpush3.bf16.msra.mxu0 %v16361_v52 }
 0x5b3   :  { %12767 = vmatprep.subr.bf16.mxu0 %v16247_v1 }
 0x5b4   :  { %12910 = vmatpush3.bf16.msra.mxu1 %v16362_v32 }
 0x5b5   :  { %12911 = vmatprep.subr.bf16.mxu1 %v16247_v1 }
 0x5b6   :  { %12769 = vmatpush3.bf16.msra.mxu0 %v16363_v29 }
 0x5b7   :  { %12770 = vmatprep.subr.bf16.mxu0 %v16247_v1 }
 0x5b8   :  { %12913 = vmatpush3.bf16.msra.mxu1 %v16364_v22 }
 0x5b9   :  { %12914 = vmatprep.subr.bf16.mxu1 %v16247_v1 }
 0x5ba   :  { %12772 = vmatpush3.bf16.msra.mxu0 %v16365_v55 }
 0x5bb   :  { %12773 = vmatprep.subr.bf16.mxu0 %v16247_v1 }
 0x5bc   :  { %12916 = vmatpush3.bf16.msra.mxu1 %v16366_v62 }
 0x5bd   :  { %10805 = vmatmul.mubr.f32.vlgmr.msra.gmra.mrb[10].mxu0 %v4108_v36  ;;  %12917 = vmatprep.subr.bf16.mxu1 %v16247_v1  ;;  %v16370_v36 = vld [vmem:[#allocation17_spill] sm:$0xff] }
 0x5be   :  { %12775 = vmatpush3.bf16.msra.mxu0 %v16367_v53  ;;  %10839 = vmatprep.mubr.msk.f32.mxu0 %vm13809_vm0, %v16246_v27 }
 0x5bf   :  { %11015 = vmatmul.mubr.f32.vlgmr.msra.gmra.mrb[50].mxu1 %v4773_v2  ;;  %12776 = vmatprep.subr.bf16.mxu0 %v16247_v1  ;;  %v16373_v2 = vld [vmem:[#allocation30_spill] sm:$0xff] }
 0x5c0   :  { %12919 = vmatpush3.bf16.msra.mxu1 %v16368_v45  ;;  %11049 = vmatprep.mubr.msk.f32.mxu1 %vm13809_vm0, %v16246_v27 }
 0x5c1   :  { %12920 = vmatprep.subr.bf16.mxu1 %v16247_v1 }
 0x5c2   :  { %12778 = vmatpush3.bf16.msra.mxu0 %v16369_v31 }
 0x5c3   :  { %12779 = vmatprep.subr.bf16.mxu0 %v16247_v1 }
 0x5c4   :  { %12922 = vmatpush3.bf16.msra.mxu1 %v16370_v36  ;;  %v16376_v36 = vld [vmem:[#allocation20_spill] sm:$0xff] }
 0x5c5   :  { %12923 = vmatprep.subr.bf16.mxu1 %v16247_v1 }
 0x5c6   :  { %12781 = vmatpush3.bf16.msra.mxu0 %v16371_v3  ;;  %v16377_v3 = vld [vmem:[#allocation32_spill] sm:$0xff] }
 0x5c7   :  { %12782 = vmatprep.subr.bf16.mxu0 %v16247_v1 }
 0x5c8   :  { %12925 = vmatpush3.bf16.msra.mxu1 %v16372_v59  ;;  %v16378_v59 = vld [vmem:[#allocation21_spill] sm:$0xff] }
 0x5c9   :  { %12926 = vmatprep.subr.bf16.mxu1 %v16247_v1 }
 0x5ca   :  { %12784 = vmatpush3.bf16.msra.mxu0 %v16373_v2  ;;  %v16379_v2 = vld [vmem:[#allocation33_spill] sm:$0xff] }
 0x5cb   :  { %12785 = vmatprep.subr.bf16.mxu0 %v16247_v1 }
 0x5cc   :  { %12928 = vmatpush3.bf16.msra.mxu1 %v16374_v11  ;;  %v16380_v11 = vld [vmem:[#allocation22_spill] sm:$0xff] }
 0x5cd   :  { %12929 = vmatprep.subr.bf16.mxu1 %v16247_v1 }
 0x5ce   :  { %12787 = vmatpush3.bf16.msra.mxu0 %v16375_v38  ;;  %v16381_v38 = vld [vmem:[#allocation34_spill] sm:$0xff] }
 0x5cf   :  { %12788 = vmatprep.subr.bf16.mxu0 %v16247_v1 }
 0x5d0   :  { %12931 = vmatpush3.bf16.msra.mxu1 %v16376_v36  ;;  %v16382_v36 = vld [vmem:[#allocation23_spill] sm:$0xff] }
 0x5d1   :  { %12932 = vmatprep.subr.bf16.mxu1 %v16247_v1 }
 0x5d2   :  { %12790 = vmatpush3.bf16.msra.mxu0 %v16377_v3 }
 0x5d3   :  { %12791 = vmatprep.subr.bf16.mxu0 %v16247_v1 }
 0x5d4   :  { %12934 = vmatpush3.bf16.msra.mxu1 %v16378_v59 }
 0x5d5   :  { %12935 = vmatprep.subr.bf16.mxu1 %v16247_v1 }
 0x5d6   :  { %12793 = vmatpush3.bf16.msra.mxu0 %v16379_v2 }
 0x5d7   :  { %12794 = vmatprep.subr.bf16.mxu0 %v16247_v1 }
 0x5d8   :  { %12937 = vmatpush3.bf16.msra.mxu1 %v16380_v11 }
 0x5d9   :  { %12938 = vmatprep.subr.bf16.mxu1 %v16247_v1 }
 0x5da   :  { %12796 = vmatpush3.bf16.msra.mxu0 %v16381_v38 }
 0x5db   :  { %12797 = vmatprep.subr.bf16.mxu0 %v16247_v1 }
 0x5dc   :  { %12940 = vmatpush3.bf16.msra.mxu1 %v16382_v36 }
 0x5dd   :  { %10840 = vmatmul.mubr.f32.vlgmr.msra.gmra.mrb[10].mxu0 %v15160_v58  ;;  %12941 = vmatprep.subr.bf16.mxu1 %v16247_v1 }
 0x5de   :  { %12799 = vmatpush3.bf16.msra.mxu0 %v14550_v13  ;;  %10874 = vmatprep.mubr.msk.f32.mxu0 %vm13809_vm0, %v16246_v27 }
 0x5df   :  { %11050 = vmatmul.mubr.f32.vlgmr.msra.gmra.mrb[52].mxu1 %v15162_v26  ;;  %12800 = vmatprep.subr.bf16.mxu0 %v16247_v1 }
 0x5e0   :  { %12943 = vmatpush3.bf16.msra.mxu1 %v14013_v48  ;;  %11084 = vmatprep.mubr.msk.f32.mxu1 %vm13809_vm0, %v16246_v27 }
 0x5e1   :  { %12944 = vmatprep.subr.bf16.mxu1 %v16247_v1 }
 0x5e2   :  { %12802 = vmatpush3.bf16.msra.mxu0 %v14560_v23 }
 0x5e3   :  { %12803 = vmatprep.subr.bf16.mxu0 %v16247_v1 }
 0x5e4   :  { %12946 = vmatpush3.bf16.msra.mxu1 %v14020_v49 }
 0x5e5   :  { %12947 = vmatprep.subr.bf16.mxu1 %v16247_v1 }
 0x5e6   :  { %12805 = vmatpush3.bf16.msra.mxu0 %v14570_v35 }
 0x5e7   :  { %12806 = vmatprep.subr.bf16.mxu0 %v16247_v1 }
 0x5e8   :  { %12949 = vmatpush3.bf16.msra.mxu1 %v16301_v63 }
 0x5e9   :  { %12950 = vmatprep.subr.bf16.mxu1 %v16247_v1 }
 0x5ea   :  { %12808 = vmatpush3.bf16.msra.mxu0 %v16302_v42 }
 0x5eb   :  { %12809 = vmatprep.subr.bf16.mxu0 %v16247_v1 }
 0x5ec   :  { %12952 = vmatpush3.bf16.msra.mxu1 %v16303_v5 }
 0x5ed   :  { %12953 = vmatprep.subr.bf16.mxu1 %v16247_v1 }
 0x5ee   :  { %12811 = vmatpush3.bf16.msra.mxu0 %v16304_v16 }
 0x5ef   :  { %12812 = vmatprep.subr.bf16.mxu0 %v16247_v1 }
 0x5f0   :  { %12955 = vmatpush3.bf16.msra.mxu1 %v16305_v6 }
 0x5f1   :  { %12956 = vmatprep.subr.bf16.mxu1 %v16247_v1 }
 0x5f2   :  { %12814 = vmatpush3.bf16.msra.mxu0 %v16361_v52 }
 0x5f3   :  { %12815 = vmatprep.subr.bf16.mxu0 %v16247_v1 }
 0x5f4   :  { %12958 = vmatpush3.bf16.msra.mxu1 %v16362_v32 }
 0x5f5   :  { %12959 = vmatprep.subr.bf16.mxu1 %v16247_v1 }
 0x5f6   :  { %12817 = vmatpush3.bf16.msra.mxu0 %v16363_v29 }
 0x5f7   :  { %12818 = vmatprep.subr.bf16.mxu0 %v16247_v1 }
 0x5f8   :  { %12961 = vmatpush3.bf16.msra.mxu1 %v16364_v22 }
 0x5f9   :  { %12962 = vmatprep.subr.bf16.mxu1 %v16247_v1 }
 0x5fa   :  { %12820 = vmatpush3.bf16.msra.mxu0 %v16365_v55 }
 0x5fb   :  { %12965 = vmatprep.subr.bf16.mxu0 %v16247_v1 }
 0x5fc   :  { %12964 = vmatpush3.bf16.msra.mxu1 %v16366_v62 }
 0x5fd   :  { %10875 = vmatmul.mubr.f32.vlgmr.msra.gmra.mrb[10].mxu0 %v15160_v58  ;;  %13109 = vmatprep.subr.bf16.mxu1 %v16247_v1 }
 0x5fe   :  { %12967 = vmatpush3.bf16.msra.mxu0 %v14550_v13  ;;  %11119 = vmatprep.mubr.msk.f32.mxu0 %vm13809_vm0, %v16246_v27 }
 0x5ff   :  { %11085 = vmatmul.mubr.f32.vlgmr.msra.gmra.mrb[54].mxu1 %v15162_v26  ;;  %12968 = vmatprep.subr.bf16.mxu0 %v16247_v1 }
 0x600   :  { %13111 = vmatpush3.bf16.msra.mxu1 %v14013_v48  ;;  %11329 = vmatprep.mubr.msk.f32.mxu1 %vm13809_vm0, %v16246_v27 }
 0x601   :  { %13112 = vmatprep.subr.bf16.mxu1 %v16247_v1 }
 0x602   :  { %12970 = vmatpush3.bf16.msra.mxu0 %v14560_v23 }
 0x603   :  { %12971 = vmatprep.subr.bf16.mxu0 %v16247_v1 }
 0x604   :  { %13114 = vmatpush3.bf16.msra.mxu1 %v14020_v49 }
 0x605   :  { %13115 = vmatprep.subr.bf16.mxu1 %v16247_v1 }
 0x606   :  { %12973 = vmatpush3.bf16.msra.mxu0 %v14570_v35 }
 0x607   :  { %12974 = vmatprep.subr.bf16.mxu0 %v16247_v1 }
 0x608   :  { %13117 = vmatpush3.bf16.msra.mxu1 %v16301_v63 }
 0x609   :  { %13118 = vmatprep.subr.bf16.mxu1 %v16247_v1 }
 0x60a   :  { %12976 = vmatpush3.bf16.msra.mxu0 %v16302_v42 }
 0x60b   :  { %12977 = vmatprep.subr.bf16.mxu0 %v16247_v1 }
 0x60c   :  { %13120 = vmatpush3.bf16.msra.mxu1 %v16303_v5 }
 0x60d   :  { %13121 = vmatprep.subr.bf16.mxu1 %v16247_v1 }
 0x60e   :  { %12979 = vmatpush3.bf16.msra.mxu0 %v16304_v16 }
 0x60f   :  { %12980 = vmatprep.subr.bf16.mxu0 %v16247_v1 }
 0x610   :  { %13123 = vmatpush3.bf16.msra.mxu1 %v16305_v6 }
 0x611   :  { %13124 = vmatprep.subr.bf16.mxu1 %v16247_v1 }
 0x612   :  { %12982 = vmatpush3.bf16.msra.mxu0 %v16361_v52 }
 0x613   :  { %12983 = vmatprep.subr.bf16.mxu0 %v16247_v1 }
 0x614   :  { %13126 = vmatpush3.bf16.msra.mxu1 %v16362_v32 }
 0x615   :  { %13127 = vmatprep.subr.bf16.mxu1 %v16247_v1 }
 0x616   :  { %12985 = vmatpush3.bf16.msra.mxu0 %v16363_v29 }
 0x617   :  { %12986 = vmatprep.subr.bf16.mxu0 %v16247_v1 }
 0x618   :  { %13129 = vmatpush3.bf16.msra.mxu1 %v16364_v22 }
 0x619   :  { %13130 = vmatprep.subr.bf16.mxu1 %v16247_v1 }
 0x61a   :  { %12988 = vmatpush3.bf16.msra.mxu0 %v16365_v55 }
 0x61b   :  { %12989 = vmatprep.subr.bf16.mxu0 %v16247_v1 }
 0x61c   :  { %13132 = vmatpush3.bf16.msra.mxu1 %v16366_v62 }
 0x61d   :  { %13133 = vmatprep.subr.bf16.mxu1 %v16247_v1 }
 0x632   :  { %v4777_v58 = vpop.f32.mrb[44].mxu1 }
 0x633   :  { %v10911_v26 = vpop.f32.mrb[45].mxu1 }
 0x652   :  { %v4928_v36 = vpop.f32.mrb[46].mxu1 }
 0x653   :  { %v4929_v38 = vadd.f32 %v4928_v36, %v4777_v58  ;;  %v10946_v11 = vpop.f32.mrb[47].mxu1  ;;  %v16384_v58 = vld [vmem:[#allocation25_spill] sm:$0xff] }
 0x672   :  { %v5032_v2 = vpop.f32.mrb[48].mxu1 }
 0x673   :  { %v5033_v59 = vadd.f32 %v5032_v2, %v4929_v38  ;;  %v10981_v3 = vpop.f32.mrb[49].mxu1  ;;  %v16383_v38 = vld [vmem:[#allocation6_spill] sm:$0xff] }
 0x692   :  { %v5121_v31 = vpop.f32.mrb[50].mxu1 }
 0x693   :  { %v5122_v45 = vadd.f32 %v5121_v31, %v5033_v59  ;;  %v11016_v53 = vpop.f32.mrb[51].mxu1 }
 0x6b2   :  { %v5240_v22 = vpop.f32.mrb[52].mxu1 }
 0x6b3   :  { %v5241_v29 = vadd.f32 %v5240_v22, %v5122_v45  ;;  %v11051_v55 = vpop.f32.mrb[53].mxu1 }
 0x6d0   :  { %v4662_v32 = vpop.f32.mrb[10].mxu0 }
 0x6d1   :  { %v4677_v52 = vmul.f32 %v4662_v32, %v4662_v32  ;;  %v10876_v6 = vpop.f32.mrb[11].mxu0 }
 0x6d2   :  { %v5327_v62 = vpop.f32.mrb[54].mxu1 }
 0x6d3   :  { %v5328_v16 = vadd.f32 %v5327_v62, %v5241_v29  ;;  %v11086_v5 = vpop.f32.mrb[55].mxu1  ;;  %v4678_v26 = vsel %vm42_vm1, %v4677_v52, 0.0 }
 0x6d4   :  { %4679 = vadd.xlane.f32.xlu1 %v4678_v26  ;;  %v16385_v26 = vld [vmem:[#allocation7_spill] sm:$0xff] }
 0x6d5   :  { %v15408_v36 = vadd.f32 %v5328_v16, %v15149_v41 }
 0x6d7   :  { %v5332_v3 = vsub.f32 %v14361_v44, %v15408_v36  ;;  %v5334_v22 = vsub.f32 %v15408_v36, %v14361_v44 }
 0x6d9   :  { %v15412_v31 = vmax.f32 %v5332_v3, 0.0  ;;  %v16386_v3 = vld [vmem:[#allocation26_spill] sm:$0xff] }
 0x6db   :  { %v5335_v32 = vadd.f32 %v5334_v22, %v15412_v31  ;;  %v5987_v6 = vsub.f32 %v15155_v40, %v15412_v31  ;;  %v16387_v22 = vld [vmem:[#allocation8_spill] sm:$0xff] }
 0x6dd   :  { %v15419_v5 = vand.u32 4294901760, %v5335_v32  ;;  %v5988_v52 = vmul.f32 %v5987_v6, %v5987_v6  ;;  %v6010_v29 = vsub.f32 %v5987_v6, %v5335_v32  ;;  %v5336_v62 = vmul.f32 %v5335_v32, %v5335_v32  ;;  %v16389_v6 = vld [vmem:[#allocation9_spill] sm:$0xff] }
 0x6df   :  { %v15421_v55 = vand.u32 4294901760, %v6010_v29  ;;  %5989 = vadd.xlane.f32.xlu0 %v5988_v52  ;;  %v15424_v16 = vsub.f32 %v5335_v32, %v15419_v5  ;;  %v16388_v32 = vld [vmem:[#allocation27_spill] sm:$0xff]  ;;  %v16390_v52 = vld [vmem:[#allocation28_spill] sm:$0xff] }
 0x6e1   :  { %v15427_v41 = vsub.f32 %v6010_v29, %v15421_v55  ;;  %v5429_v53 = vand.u32 4294901760, %v15424_v16  ;;  %v16391_v29 = vld [vmem:[#allocation10_spill] sm:$0xff] }
 0x6e3   :  { %5337 = vadd.xlane.f32.xlu0 %v5336_v62  ;;  %v5430_v40 = vsub.f32 %v15424_v16, %v5429_v53  ;;  %v6094_v45 = vand.u32 4294901760, %v15427_v41  ;;  %v16392_v62 = vld [vmem:[#allocation5_spill] sm:$0xff] }
 0x6e5   :  { %v5431_v59 = vand.u32 4294901760, %v5430_v40  ;;  %v6095_v2 = vsub.f32 %v15427_v41, %v6094_v45  ;;  %v16393_v40 = vld [vmem:[#allocation16_spill] sm:$0xff] }
 0x6e7   :  { %11120 = vmatmul.mubr.f32.vlgmr.msra.gmra.mrb[12].mxu0 %v5431_v59  ;;  %v6096_v11 = vand.u32 4294901760, %v6095_v2  ;;  %v16395_v59 = vld [vmem:[#allocation17_spill] sm:$0xff] }
 0x6e8   :  { %12991 = vmatpush3.bf16.msra.mxu0 %v14686_v54  ;;  %11154 = vmatprep.mubr.msk.f32.mxu0 %vm13809_vm0, %v16246_v27 }
 0x6e9   :  { %11330 = vmatmul.mubr.f32.vlgmr.msra.gmra.mrb[56].mxu1 %v6096_v11  ;;  %12992 = vmatprep.subr.bf16.mxu0 %v16247_v1  ;;  %v16399_v11 = vld [vmem:[#allocation30_spill] sm:$0xff] }
 0x6ea   :  { %13135 = vmatpush3.bf16.msra.mxu1 %v14181_v28  ;;  %11364 = vmatprep.mubr.msk.f32.mxu1 %vm13809_vm0, %v16246_v27 }
 0x6eb   :  { %13136 = vmatprep.subr.bf16.mxu1 %v16247_v1 }
 0x6ec   :  { %12994 = vmatpush3.bf16.msra.mxu0 %v14700_v15 }
 0x6ed   :  { %12995 = vmatprep.subr.bf16.mxu0 %v16247_v1 }
 0x6ee   :  { %13138 = vmatpush3.bf16.msra.mxu1 %v14201_v37 }
 0x6ef   :  { %13139 = vmatprep.subr.bf16.mxu1 %v16247_v1 }
 0x6f0   :  { %12997 = vmatpush3.bf16.msra.mxu0 %v14716_v56 }
 0x6f1   :  { %12998 = vmatprep.subr.bf16.mxu0 %v16247_v1 }
 0x6f2   :  { %13141 = vmatpush3.bf16.msra.mxu1 %v14221_v46 }
 0x6f3   :  { %13142 = vmatprep.subr.bf16.mxu1 %v16247_v1 }
 0x6f4   :  { %13000 = vmatpush3.bf16.msra.mxu0 %v14748_v61 }
 0x6f5   :  { %13001 = vmatprep.subr.bf16.mxu0 %v16247_v1 }
 0x6f6   :  { %13144 = vmatpush3.bf16.msra.mxu1 %v14257_v21 }
 0x6f7   :  { %13145 = vmatprep.subr.bf16.mxu1 %v16247_v1 }
 0x6f8   :  { %13003 = vmatpush3.bf16.msra.mxu0 %v14752_v51 }
 0x6f9   :  { %13004 = vmatprep.subr.bf16.mxu0 %v16247_v1 }
 0x6fa   :  { %13147 = vmatpush3.bf16.msra.mxu1 %v14261_v33 }
 0x6fb   :  { %13148 = vmatprep.subr.bf16.mxu1 %v16247_v1 }
 0x6fc   :  { %13006 = vmatpush3.bf16.msra.mxu0 %v14772_v57 }
 0x6fd   :  { %13007 = vmatprep.subr.bf16.mxu0 %v16247_v1 }
 0x6fe   :  { %13150 = vmatpush3.bf16.msra.mxu1 %v14281_v43 }
 0x6ff   :  { %13151 = vmatprep.subr.bf16.mxu1 %v16247_v1 }
 0x700   :  { %13009 = vmatpush3.bf16.msra.mxu0 %v14799_v4 }
 0x701   :  { %13010 = vmatprep.subr.bf16.mxu0 %v16247_v1 }
 0x702   :  { %13153 = vmatpush3.bf16.msra.mxu1 %v14307_v12 }
 0x703   :  { %13154 = vmatprep.subr.bf16.mxu1 %v16247_v1 }
 0x704   :  { %13012 = vmatpush3.bf16.msra.mxu0 %v14801_v30 }
 0x705   :  { %13013 = vmatprep.subr.bf16.mxu0 %v16247_v1 }
 0x706   :  { %13156 = vmatpush3.bf16.msra.mxu1 %v14309_v60 }
 0x707   :  { %11155 = vmatmul.mubr.f32.vlgmr.msra.gmra.mrb[12].mxu0 %v15419_v5  ;;  %13157 = vmatprep.subr.bf16.mxu1 %v16247_v1 }
 0x708   :  { %13015 = vmatpush3.bf16.msra.mxu0 %v14805_v50  ;;  %11189 = vmatprep.mubr.msk.f32.mxu0 %vm13809_vm0, %v16246_v27 }
 0x709   :  { %11365 = vmatmul.mubr.f32.vlgmr.msra.gmra.mrb[58].mxu1 %v15421_v55  ;;  %13016 = vmatprep.subr.bf16.mxu0 %v16247_v1 }
 0x70a   :  { %13159 = vmatpush3.bf16.msra.mxu1 %v14313_v24  ;;  %11399 = vmatprep.mubr.msk.f32.mxu1 %vm13809_vm0, %v16246_v27 }
 0x70b   :  { %13160 = vmatprep.subr.bf16.mxu1 %v16247_v1 }
 0x70c   :  { %13018 = vmatpush3.bf16.msra.mxu0 %v14809_v39 }
 0x70d   :  { %13019 = vmatprep.subr.bf16.mxu0 %v16247_v1 }
 0x70e   :  { %13162 = vmatpush3.bf16.msra.mxu1 %v14317_v25 }
 0x70f   :  { %13163 = vmatprep.subr.bf16.mxu1 %v16247_v1 }
 0x710   :  { %13021 = vmatpush3.bf16.msra.mxu0 %v14813_v17 }
 0x711   :  { %13022 = vmatprep.subr.bf16.mxu0 %v16247_v1 }
 0x712   :  { %13165 = vmatpush3.bf16.msra.mxu1 %v14321_v34 }
 0x713   :  { %13166 = vmatprep.subr.bf16.mxu1 %v16247_v1 }
 0x714   :  { %13024 = vmatpush3.bf16.msra.mxu0 %v14817_v9 }
 0x715   :  { %13025 = vmatprep.subr.bf16.mxu0 %v16247_v1 }
 0x716   :  { %13168 = vmatpush3.bf16.msra.mxu1 %v14325_v8 }
 0x717   :  { %13169 = vmatprep.subr.bf16.mxu1 %v16247_v1 }
 0x718   :  { %13027 = vmatpush3.bf16.msra.mxu0 %v14821_v18 }
 0x719   :  { %13028 = vmatprep.subr.bf16.mxu0 %v16247_v1 }
 0x71a   :  { %13171 = vmatpush3.bf16.msra.mxu1 %v14332_v14 }
 0x71b   :  { %13172 = vmatprep.subr.bf16.mxu1 %v16247_v1 }
 0x71c   :  { %13030 = vmatpush3.bf16.msra.mxu0 %v14825_v0 }
 0x71d   :  { %13031 = vmatprep.subr.bf16.mxu0 %v16247_v1 }
 0x71e   :  { %13174 = vmatpush3.bf16.msra.mxu1 %v14336_v47 }
 0x71f   :  { %13175 = vmatprep.subr.bf16.mxu1 %v16247_v1 }
 0x720   :  { %13033 = vmatpush3.bf16.msra.mxu0 %v14829_v20 }
 0x721   :  { %13034 = vmatprep.subr.bf16.mxu0 %v16247_v1 }
 0x722   :  { %13177 = vmatpush3.bf16.msra.mxu1 %v16358_v10 }
 0x723   :  { %13178 = vmatprep.subr.bf16.mxu1 %v16247_v1 }
 0x724   :  { %13036 = vmatpush3.bf16.msra.mxu0 %v16359_v19  ;;  %v16409_v19 = vld [vmem:[#allocation23_spill] sm:$0xff] }
 0x725   :  { %13037 = vmatprep.subr.bf16.mxu0 %v16247_v1 }
 0x726   :  { %13180 = vmatpush3.bf16.msra.mxu1 %v16360_v7 }
 0x727   :  { %11190 = vmatmul.mubr.f32.vlgmr.msra.gmra.mrb[12].mxu0 %v15424_v16  ;;  %13181 = vmatprep.subr.bf16.mxu1 %v16247_v1  ;;  %v16394_v16 = vld [vmem:[#allocation24_spill] sm:$0xff] }
 0x728   :  { %13039 = vmatpush3.bf16.msra.mxu0 %v14550_v13  ;;  %11224 = vmatprep.mubr.msk.f32.mxu0 %vm13809_vm0, %v16246_v27 }
 0x729   :  { %11400 = vmatmul.mubr.f32.vlgmr.msra.gmra.mrb[60].mxu1 %v15427_v41  ;;  %13040 = vmatprep.subr.bf16.mxu0 %v16247_v1  ;;  %v16396_v41 = vld [vmem:[#allocation29_spill] sm:$0xff] }
 0x72a   :  { %13183 = vmatpush3.bf16.msra.mxu1 %v14013_v48  ;;  %11434 = vmatprep.mubr.msk.f32.mxu1 %vm13809_vm0, %v16246_v27 }
 0x72b   :  { %13184 = vmatprep.subr.bf16.mxu1 %v16247_v1 }
 0x72c   :  { %13042 = vmatpush3.bf16.msra.mxu0 %v14560_v23 }
 0x72d   :  { %13043 = vmatprep.subr.bf16.mxu0 %v16247_v1 }
 0x72e   :  { %13186 = vmatpush3.bf16.msra.mxu1 %v14020_v49 }
 0x72f   :  { %13187 = vmatprep.subr.bf16.mxu1 %v16247_v1 }
 0x730   :  { %13045 = vmatpush3.bf16.msra.mxu0 %v14570_v35 }
 0x731   :  { %13046 = vmatprep.subr.bf16.mxu0 %v16247_v1 }
 0x732   :  { %13189 = vmatpush3.bf16.msra.mxu1 %v16301_v63 }
 0x733   :  { %13190 = vmatprep.subr.bf16.mxu1 %v16247_v1 }
 0x734   :  { %13048 = vmatpush3.bf16.msra.mxu0 %v16302_v42 }
 0x735   :  { %13049 = vmatprep.subr.bf16.mxu0 %v16247_v1 }
 0x736   :  { %13192 = vmatpush3.bf16.msra.mxu1 %v16383_v38 }
 0x737   :  { %13193 = vmatprep.subr.bf16.mxu1 %v16247_v1 }
 0x738   :  { %13051 = vmatpush3.bf16.msra.mxu0 %v16384_v58 }
 0x739   :  { %13052 = vmatprep.subr.bf16.mxu0 %v16247_v1 }
 0x73a   :  { %13195 = vmatpush3.bf16.msra.mxu1 %v16385_v26 }
 0x73b   :  { %13196 = vmatprep.subr.bf16.mxu1 %v16247_v1 }
 0x73c   :  { %13054 = vmatpush3.bf16.msra.mxu0 %v16386_v3 }
 0x73d   :  { %13055 = vmatprep.subr.bf16.mxu0 %v16247_v1 }
 0x73e   :  { %13198 = vmatpush3.bf16.msra.mxu1 %v16387_v22 }
 0x73f   :  { %13199 = vmatprep.subr.bf16.mxu1 %v16247_v1 }
 0x740   :  { %13057 = vmatpush3.bf16.msra.mxu0 %v16388_v32 }
 0x741   :  { %13058 = vmatprep.subr.bf16.mxu0 %v16247_v1 }
 0x742   :  { %13201 = vmatpush3.bf16.msra.mxu1 %v16389_v6 }
 0x743   :  { %13202 = vmatprep.subr.bf16.mxu1 %v16247_v1 }
 0x744   :  { %13060 = vmatpush3.bf16.msra.mxu0 %v16390_v52 }
 0x745   :  { %13061 = vmatprep.subr.bf16.mxu0 %v16247_v1 }
 0x746   :  { %13204 = vmatpush3.bf16.msra.mxu1 %v16391_v29 }
 0x747   :  { %11225 = vmatmul.mubr.f32.vlgmr.msra.gmra.mrb[12].mxu0 %v5429_v53  ;;  %13205 = vmatprep.subr.bf16.mxu1 %v16247_v1  ;;  %v15563_v53 = vpop.xlane.xlu0 %3347 }
 0x748   :  { %13063 = vmatpush3.bf16.msra.mxu0 %v16392_v62  ;;  %11259 = vmatprep.mubr.msk.f32.mxu0 %vm13809_vm0, %v16246_v27  ;;  %v16407_v62 = vld [vmem:[#allocation22_spill] sm:$0xff]  ;;  %vm3351_vm4 = vcmp.eq.f32.partialorder %v15563_v53, inf  ;;  %vm3353_vm9 = vcmp.eq.f32.partialorder %v15563_v53, 0.0 }
 0x749   :  { %11435 = vmatmul.mubr.f32.vlgmr.msra.gmra.mrb[62].mxu1 %v6094_v45  ;;  %13064 = vmatprep.subr.bf16.mxu0 %v16247_v1  ;;  %v16397_v45 = vld [vmem:[#allocation18_spill] sm:$0xff] }
 0x74a   :  { %13207 = vmatpush3.bf16.msra.mxu1 %v16393_v40  ;;  %11469 = vmatprep.mubr.msk.f32.mxu1 %vm13809_vm0, %v16246_v27  ;;  %v15576_v40 = vpop.xlane.xlu1 %4668 }
 0x74b   :  { %13208 = vmatprep.subr.bf16.mxu1 %v16247_v1  ;;  %v15571_v2 = vpop.xlane.xlu0 %2679  ;;  %vm4672_vm5 = vcmp.eq.f32.partialorder %v15576_v40, inf  ;;  %v4675_v14 = vand.u32 2147483648, %v15576_v40  ;;  %vm4674_vm10 = vcmp.eq.f32.partialorder %v15576_v40, 0.0 }
 0x74c   :  { %13066 = vmatpush3.bf16.msra.mxu0 %v16394_v16  ;;  %16398 = vst [vmem:[#allocation35_spill] sm:$0xff] %v15571_v2  ;;  %v16400_v16 = vld [vmem:[#allocation19_spill] sm:$0xff]  ;;  %v16403_v2 = vld [vmem:[#allocation32_spill] sm:$0xff] }
 0x74d   :  { %13067 = vmatprep.subr.bf16.mxu0 %v16247_v1 }
 0x74e   :  { %13210 = vmatpush3.bf16.msra.mxu1 %v16395_v59 }
 0x74f   :  { %13211 = vmatprep.subr.bf16.mxu1 %v16247_v1  ;;  %v3359_v59 = vpop.xlane.xlu0 %3358 }
 0x750   :  { %13069 = vmatpush3.bf16.msra.mxu0 %v16396_v41  ;;  %v16401_v41 = vld [vmem:[#allocation31_spill] sm:$0xff]  ;;  %13763 = vrsqrt.f32 %v3359_v59  ;;  %vm3362_vm3 = vcmp.eq.f32.partialorder %v3359_v59, inf  ;;  %v3365_v20 = vand.u32 2147483648, %v3359_v59  ;;  %vm3364_vm6 = vcmp.eq.f32.partialorder %v3359_v59, 0.0 }
 0x751   :  { %13070 = vmatprep.subr.bf16.mxu0 %v16247_v1  ;;  %13765 = vrsqrt.f32 %v15563_v53 }
 0x752   :  { %13213 = vmatpush3.bf16.msra.mxu1 %v16397_v45  ;;  %v16402_v45 = vld [vmem:[#allocation20_spill] sm:$0xff]  ;;  %13767 = vrsqrt.f32 %v15576_v40 }
 0x753   :  { %13214 = vmatprep.subr.bf16.mxu1 %v16247_v1 }
 0x754   :  { %13072 = vmatpush3.bf16.msra.mxu0 %v16399_v11  ;;  %v16405_v11 = vld [vmem:[#allocation21_spill] sm:$0xff] }
 0x755   :  { %13073 = vmatprep.subr.bf16.mxu0 %v16247_v1 }
 0x756   :  { %13216 = vmatpush3.bf16.msra.mxu1 %v16400_v16  ;;  %v15586_v16 = vpop.xlane.xlu1 %4016 }
 0x757   :  { %13217 = vmatprep.subr.bf16.mxu1 %v16247_v1  ;;  %16404 = vst [vmem:[#allocation36_spill] sm:$0xff] %v15586_v16 }
 0x758   :  { %13075 = vmatpush3.bf16.msra.mxu0 %v16401_v41  ;;  %v16406_v41 = vld [vmem:[#allocation33_spill] sm:$0xff] }
 0x759   :  { %13076 = vmatprep.subr.bf16.mxu0 %v16247_v1 }
 0x75a   :  { %13219 = vmatpush3.bf16.msra.mxu1 %v16402_v45  ;;  %v13764_v7 = vpop.eup %13763 }
 0x75b   :  { %13220 = vmatprep.subr.bf16.mxu1 %v16247_v1  ;;  %v13766_v16 = vpop.eup %13765 }
 0x75c   :  { %13078 = vmatpush3.bf16.msra.mxu0 %v16403_v2  ;;  %v16408_v2 = vld [vmem:[#allocation34_spill] sm:$0xff] }
 0x75d   :  { %13079 = vmatprep.subr.bf16.mxu0 %v16247_v1 }
 0x75e   :  { %13222 = vmatpush3.bf16.msra.mxu1 %v16405_v11  ;;  %v13768_v11 = vpop.eup %13767 }
 0x75f   :  { %13223 = vmatprep.subr.bf16.mxu1 %v16247_v1 }
 0x760   :  { %13081 = vmatpush3.bf16.msra.mxu0 %v16406_v41  ;;  %v3361_v41 = vmul.f32 %v13764_v7, %v3359_v59 }
 0x761   :  { %v4680_v45 = vpop.xlane.xlu1 %4679  ;;  %13082 = vmatprep.subr.bf16.mxu0 %v16247_v1 }
 0x762   :  { %13225 = vmatpush3.bf16.msra.mxu1 %v16407_v62  ;;  %13769 = vrsqrt.f32 %v4680_v45  ;;  %v3350_v62 = vmul.f32 %v13766_v16, %v15563_v53  ;;  %v3363_v16 = vsel %vm3362_vm3, %v3359_v59, %v3361_v41  ;;  %vm4683_vm7 = vcmp.eq.f32.partialorder %v4680_v45, inf }
 0x763   :  { %13226 = vmatprep.subr.bf16.mxu1 %v16247_v1  ;;  %v4686_v0 = vand.u32 2147483648, %v4680_v45  ;;  %vm4685_vm8 = vcmp.eq.f32.partialorder %v4680_v45, 0.0 }
 0x764   :  { %13084 = vmatpush3.bf16.msra.mxu0 %v16408_v2  ;;  %v4671_v2 = vmul.f32 %v13768_v11, %v15576_v40  ;;  %v3352_v10 = vsel %vm3351_vm4, %v15563_v53, %v3350_v62  ;;  %v3366_v62 = vsel %vm3364_vm6, %v3365_v20, %v3363_v16 }
 0x765   :  { %13085 = vmatprep.subr.bf16.mxu0 %v16247_v1 }
 0x766   :  { %13228 = vmatpush3.bf16.msra.mxu1 %v16409_v19  ;;  %v3354_v19 = vand.u32 2147483648, %v15563_v53  ;;  %v4673_v47 = vsel %vm4672_vm5, %v15576_v40, %v4671_v2 }
 0x767   :  { %11260 = vmatmul.mubr.f32.vlgmr.msra.gmra.mrb[12].mxu0 %v15419_v5  ;;  %13229 = vmatprep.subr.bf16.mxu1 %v16247_v1 }
 0x768   :  { %13087 = vmatpush3.bf16.msra.mxu0 %v14550_v13  ;;  %11294 = vmatprep.mubr.msk.f32.mxu0 %vm13809_vm0, %v16246_v27  ;;  %v3355_v2 = vsel %vm3353_vm9, %v3354_v19, %v3352_v10 }
 0x769   :  { %11470 = vmatmul.mubr.f32.vlgmr.msra.gmra.mrb[64].mxu1 %v15421_v55  ;;  %13088 = vmatprep.subr.bf16.mxu0 %v16247_v1  ;;  %v3367_v18 = vadd.f32 %v3366_v62, %v3355_v2 }
 0x76a   :  { %13231 = vmatpush3.bf16.msra.mxu1 %v14013_v48  ;;  %11504 = vmatprep.mubr.msk.f32.mxu1 %vm13809_vm0, %v16246_v27 }
 0x76b   :  { %13232 = vmatprep.subr.bf16.mxu1 %v16247_v1 }
 0x76c   :  { %v13770_v7 = vpop.eup %13769  ;;  %13090 = vmatpush3.bf16.msra.mxu0 %v14560_v23 }
 0x76d   :  { %v4682_v11 = vmul.f32 %v13770_v7, %v4680_v45  ;;  %13091 = vmatprep.subr.bf16.mxu0 %v16247_v1  ;;  %v4676_v7 = vsel %vm4674_vm10, %v4675_v14, %v4673_v47 }
 0x76e   :  { %13234 = vmatpush3.bf16.msra.mxu1 %v14020_v49 }
 0x76f   :  { %v4684_v41 = vsel %vm4683_vm7, %v4680_v45, %v4682_v11  ;;  %13235 = vmatprep.subr.bf16.mxu1 %v16247_v1 }
 0x770   :  { %13093 = vmatpush3.bf16.msra.mxu0 %v14570_v35  ;;  %v4687_v59 = vsel %vm4685_vm8, %v4686_v0, %v4684_v41 }
 0x771   :  { %13094 = vmatprep.subr.bf16.mxu0 %v16247_v1  ;;  %v4688_v8 = vadd.f32 %v4687_v59, %v4676_v7 }
 0x772   :  { %13237 = vmatpush3.bf16.msra.mxu1 %v16301_v63 }
 0x773   :  { %13238 = vmatprep.subr.bf16.mxu1 %v16247_v1  ;;  %v15629_v20 = vsel %vm8652_vm11, %v3367_v18, %v4688_v8 }
 0x774   :  { %13096 = vmatpush3.bf16.msra.mxu0 %v16302_v42  ;;  %16410 = vst [vmem:[#allocation37_spill] sm:$0xff] %v15629_v20 }
 0x775   :  { %13097 = vmatprep.subr.bf16.mxu0 %v16247_v1 }
 0x776   :  { %13240 = vmatpush3.bf16.msra.mxu1 %v16383_v38 }
 0x777   :  { %13241 = vmatprep.subr.bf16.mxu1 %v16247_v1 }
 0x778   :  { %13099 = vmatpush3.bf16.msra.mxu0 %v16384_v58 }
 0x779   :  { %13100 = vmatprep.subr.bf16.mxu0 %v16247_v1 }
 0x77a   :  { %13243 = vmatpush3.bf16.msra.mxu1 %v16385_v26 }
 0x77b   :  { %13244 = vmatprep.subr.bf16.mxu1 %v16247_v1 }
 0x77c   :  { %13102 = vmatpush3.bf16.msra.mxu0 %v16386_v3 }
 0x77d   :  { %13103 = vmatprep.subr.bf16.mxu0 %v16247_v1 }
 0x77e   :  { %13246 = vmatpush3.bf16.msra.mxu1 %v16387_v22 }
 0x77f   :  { %13247 = vmatprep.subr.bf16.mxu1 %v16247_v1 }
 0x780   :  { %13105 = vmatpush3.bf16.msra.mxu0 %v16388_v32 }
 0x781   :  { %13106 = vmatprep.subr.bf16.mxu0 %v16247_v1 }
 0x782   :  { %13249 = vmatpush3.bf16.msra.mxu1 %v16389_v6 }
 0x783   :  { %13250 = vmatprep.subr.bf16.mxu1 %v16247_v1 }
 0x784   :  { %13108 = vmatpush3.bf16.msra.mxu0 %v16390_v52 }
 0x785   :  { %13253 = vmatprep.subr.bf16.mxu0 %v16247_v1 }
 0x786   :  { %13252 = vmatpush3.bf16.msra.mxu1 %v16391_v29 }
 0x787   :  { %11295 = vmatmul.mubr.f32.vlgmr.msra.gmra.mrb[12].mxu0 %v15419_v5  ;;  %13397 = vmatprep.subr.bf16.mxu1 %v16247_v1 }
 0x788   :  { %13255 = vmatpush3.bf16.msra.mxu0 %v14550_v13  ;;  %11539 = vmatprep.mubr.msk.f32.mxu0 %vm13809_vm0, %v16246_v27 }
 0x789   :  { %11505 = vmatmul.mubr.f32.vlgmr.msra.gmra.mrb[66].mxu1 %v15421_v55  ;;  %13256 = vmatprep.subr.bf16.mxu0 %v16247_v1 }
 0x78a   :  { %13399 = vmatpush3.bf16.msra.mxu1 %v14013_v48  ;;  %11749 = vmatprep.mubr.msk.f32.mxu1 %vm13809_vm0, %v16246_v27 }
 0x78b   :  { %13400 = vmatprep.subr.bf16.mxu1 %v16247_v1 }
 0x78c   :  { %13258 = vmatpush3.bf16.msra.mxu0 %v14560_v23 }
 0x78d   :  { %13259 = vmatprep.subr.bf16.mxu0 %v16247_v1 }
 0x78e   :  { %13402 = vmatpush3.bf16.msra.mxu1 %v14020_v49 }
 0x78f   :  { %13403 = vmatprep.subr.bf16.mxu1 %v16247_v1 }
 0x790   :  { %13261 = vmatpush3.bf16.msra.mxu0 %v14570_v35 }
 0x791   :  { %13262 = vmatprep.subr.bf16.mxu0 %v16247_v1 }
 0x792   :  { %13405 = vmatpush3.bf16.msra.mxu1 %v16301_v63 }
 0x793   :  { %13406 = vmatprep.subr.bf16.mxu1 %v16247_v1 }
 0x794   :  { %13264 = vmatpush3.bf16.msra.mxu0 %v16302_v42 }
 0x795   :  { %13265 = vmatprep.subr.bf16.mxu0 %v16247_v1 }
 0x796   :  { %13408 = vmatpush3.bf16.msra.mxu1 %v16383_v38 }
 0x797   :  { %13409 = vmatprep.subr.bf16.mxu1 %v16247_v1 }
 0x798   :  { %13267 = vmatpush3.bf16.msra.mxu0 %v16384_v58 }
 0x799   :  { %13268 = vmatprep.subr.bf16.mxu0 %v16247_v1 }
 0x79a   :  { %13411 = vmatpush3.bf16.msra.mxu1 %v16385_v26 }
 0x79b   :  { %13412 = vmatprep.subr.bf16.mxu1 %v16247_v1 }
 0x79c   :  { %13270 = vmatpush3.bf16.msra.mxu0 %v16386_v3 }
 0x79d   :  { %13271 = vmatprep.subr.bf16.mxu0 %v16247_v1 }
 0x79e   :  { %13414 = vmatpush3.bf16.msra.mxu1 %v16387_v22 }
 0x79f   :  { %13415 = vmatprep.subr.bf16.mxu1 %v16247_v1 }
 0x7a0   :  { %13273 = vmatpush3.bf16.msra.mxu0 %v16388_v32 }
 0x7a1   :  { %13274 = vmatprep.subr.bf16.mxu0 %v16247_v1 }
 0x7a2   :  { %13417 = vmatpush3.bf16.msra.mxu1 %v16389_v6 }
 0x7a3   :  { %13418 = vmatprep.subr.bf16.mxu1 %v16247_v1 }
 0x7a4   :  { %13276 = vmatpush3.bf16.msra.mxu0 %v16390_v52 }
 0x7a5   :  { %13277 = vmatprep.subr.bf16.mxu0 %v16247_v1 }
 0x7a6   :  { %13420 = vmatpush3.bf16.msra.mxu1 %v16391_v29 }
 0x7a7   :  { %13421 = vmatprep.subr.bf16.mxu1 %v16247_v1 }
 0x7bc   :  { %v6098_v8 = vpop.f32.mrb[56].mxu1 }
 0x7bd   :  { %v11331_v14 = vpop.f32.mrb[57].mxu1 }
 0x7dc   :  { %v6249_v47 = vpop.f32.mrb[58].mxu1 }
 0x7dd   :  { %v6250_v18 = vadd.f32 %v6249_v47, %v6098_v8  ;;  %v11366_v0 = vpop.f32.mrb[59].mxu1 }
 0x7fc   :  { %v6353_v10 = vpop.f32.mrb[60].mxu1 }
 0x7fd   :  { %v6354_v19 = vadd.f32 %v6353_v10, %v6250_v18  ;;  %v11401_v5 = vpop.f32.mrb[61].mxu1 }
 0x81c   :  { %v6442_v55 = vpop.f32.mrb[62].mxu1 }
 0x81d   :  { %v6443_v40 = vadd.f32 %v6442_v55, %v6354_v19  ;;  %v11436_v53 = vpop.f32.mrb[63].mxu1 }
 0x83c   :  { %v6561_v45 = vpop.f32.mrb[64].mxu1 }
 0x83d   :  { %v6562_v16 = vadd.f32 %v6561_v45, %v6443_v40  ;;  %v11471_v11 = vpop.f32.mrb[65].mxu1 }
 0x85a   :  { %v5983_v41 = vpop.f32.mrb[12].mxu0 }
 0x85b   :  { %v5998_v62 = vmul.f32 %v5983_v41, %v5983_v41  ;;  %v11296_v59 = vpop.f32.mrb[13].mxu0 }
 0x85c   :  { %v6648_v2 = vpop.f32.mrb[66].mxu1 }
 0x85d   :  { %v6649_v7 = vadd.f32 %v6648_v2, %v6562_v16  ;;  %v11506_v20 = vpop.f32.mrb[67].mxu1  ;;  %v5999_v14 = vsel %vm42_vm1, %v5998_v62, 0.0  ;;  %v16422_v2 = vld [vmem:[#allocation24_spill] sm:$0xff] }
 0x85e   :  { %6000 = vadd.xlane.f32.xlu1 %v5999_v14  ;;  %v16424_v14 = vld [vmem:[#allocation29_spill] sm:$0xff] }
 0x85f   :  { %v15690_v8 = vadd.f32 %v6649_v7, %v15408_v36  ;;  %v16423_v7 = vld [vmem:[#allocation17_spill] sm:$0xff] }
 0x861   :  { %v6653_v47 = vsub.f32 %v14361_v44, %v15690_v8  ;;  %v6655_v0 = vsub.f32 %v15690_v8, %v14361_v44 }
 0x863   :  { %v15694_v18 = vmax.f32 %v6653_v47, 0.0  ;;  %v16425_v47 = vld [vmem:[#allocation18_spill] sm:$0xff] }
 0x865   :  { %v6656_v10 = vadd.f32 %v6655_v0, %v15694_v18  ;;  %v7308_v19 = vsub.f32 %v15412_v31, %v15694_v18  ;;  %v16426_v0 = vld [vmem:[#allocation30_spill] sm:$0xff] }
 0x867   :  { %v15701_v20 = vand.u32 4294901760, %v6656_v10  ;;  %v7309_v5 = vmul.f32 %v7308_v19, %v7308_v19  ;;  %v7331_v55 = vsub.f32 %v7308_v19, %v6656_v10  ;;  %v6657_v45 = vmul.f32 %v6656_v10, %v6656_v10  ;;  %v16428_v19 = vld [vmem:[#allocation31_spill] sm:$0xff] }
 0x869   :  { %v15703_v40 = vand.u32 4294901760, %v7331_v55  ;;  %7310 = vadd.xlane.f32.xlu1 %v7309_v5  ;;  %v15706_v36 = vsub.f32 %v6656_v10, %v15701_v20  ;;  %v16427_v10 = vld [vmem:[#allocation19_spill] sm:$0xff]  ;;  %v5990_v5 = vpop.xlane.xlu0 %5989 }
 0x86a   :  { %13771 = vrsqrt.f32 %v5990_v5  ;;  %vm5993_vm12 = vcmp.eq.f32.partialorder %v5990_v5, inf  ;;  %vm5995_vm15 = vcmp.eq.f32.partialorder %v5990_v5, 0.0 }
 0x86b   :  { %v15709_v53 = vsub.f32 %v7331_v55, %v15703_v40  ;;  %v6750_v16 = vand.u32 4294901760, %v15706_v36  ;;  %v16429_v55 = vld [vmem:[#allocation20_spill] sm:$0xff] }
 0x86d   :  { %6658 = vadd.xlane.f32.xlu1 %v6657_v45  ;;  %v6751_v31 = vsub.f32 %v15706_v36, %v6750_v16  ;;  %v7415_v11 = vand.u32 4294901760, %v15709_v53  ;;  %v16432_v45 = vld [vmem:[#allocation33_spill] sm:$0xff] }
 0x86f   :  { %v6752_v41 = vand.u32 4294901760, %v6751_v31  ;;  %v7416_v62 = vsub.f32 %v15709_v53, %v7415_v11  ;;  %v16433_v31 = vld [vmem:[#allocation22_spill] sm:$0xff] }
 0x871   :  { %11540 = vmatmul.mubr.f32.vlgmr.msra.gmra.mrb[14].mxu0 %v6752_v41  ;;  %v7417_v59 = vand.u32 4294901760, %v7416_v62  ;;  %v16435_v41 = vld [vmem:[#allocation23_spill] sm:$0xff] }
 0x872   :  { %13279 = vmatpush3.bf16.msra.mxu0 %v14686_v54  ;;  %11574 = vmatprep.mubr.msk.f32.mxu0 %vm13809_vm0, %v16246_v27 }
 0x873   :  { %11750 = vmatmul.mubr.f32.vlgmr.msra.gmra.mrb[68].mxu1 %v7417_v59  ;;  %13280 = vmatprep.subr.bf16.mxu0 %v16247_v1 }
 0x874   :  { %13423 = vmatpush3.bf16.msra.mxu1 %v14181_v28  ;;  %11784 = vmatprep.mubr.msk.f32.mxu1 %vm13809_vm0, %v16246_v27  ;;  %v16411_v28 = vld [vmem:[#allocation11_spill] sm:$0xff]  ;;  %v13772_v62 = vpop.eup %13771 }
 0x875   :  { %13424 = vmatprep.subr.bf16.mxu1 %v16247_v1  ;;  %v5992_v59 = vmul.f32 %v13772_v62, %v5990_v5 }
 0x876   :  { %13282 = vmatpush3.bf16.msra.mxu0 %v14700_v15 }
 0x877   :  { %13283 = vmatprep.subr.bf16.mxu0 %v16247_v1 }
 0x878   :  { %13426 = vmatpush3.bf16.msra.mxu1 %v14201_v37  ;;  %v16412_v37 = vld [vmem:[#allocation41_spill] sm:$0xff] }
 0x879   :  { %13427 = vmatprep.subr.bf16.mxu1 %v16247_v1 }
 0x87a   :  { %13285 = vmatpush3.bf16.msra.mxu0 %v14716_v56 }
 0x87b   :  { %13286 = vmatprep.subr.bf16.mxu0 %v16247_v1 }
 0x87c   :  { %13429 = vmatpush3.bf16.msra.mxu1 %v14221_v46  ;;  %v16413_v46 = vld [vmem:[#allocation12_spill] sm:$0xff] }
 0x87d   :  { %13430 = vmatprep.subr.bf16.mxu1 %v16247_v1 }
 0x87e   :  { %13288 = vmatpush3.bf16.msra.mxu0 %v14748_v61 }
 0x87f   :  { %13289 = vmatprep.subr.bf16.mxu0 %v16247_v1 }
 0x880   :  { %13432 = vmatpush3.bf16.msra.mxu1 %v14257_v21  ;;  %v16414_v21 = vld [vmem:[#allocation42_spill] sm:$0xff] }
 0x881   :  { %13433 = vmatprep.subr.bf16.mxu1 %v16247_v1 }
 0x882   :  { %13291 = vmatpush3.bf16.msra.mxu0 %v14752_v51 }
 0x883   :  { %13292 = vmatprep.subr.bf16.mxu0 %v16247_v1 }
 0x884   :  { %13435 = vmatpush3.bf16.msra.mxu1 %v14261_v33  ;;  %v16415_v33 = vld [vmem:[#allocation13_spill] sm:$0xff] }
 0x885   :  { %13436 = vmatprep.subr.bf16.mxu1 %v16247_v1 }
 0x886   :  { %13294 = vmatpush3.bf16.msra.mxu0 %v14772_v57 }
 0x887   :  { %13295 = vmatprep.subr.bf16.mxu0 %v16247_v1 }
 0x888   :  { %13438 = vmatpush3.bf16.msra.mxu1 %v14281_v43  ;;  %v16416_v43 = vld [vmem:[#allocation43_spill] sm:$0xff] }
 0x889   :  { %13439 = vmatprep.subr.bf16.mxu1 %v16247_v1 }
 0x88a   :  { %13297 = vmatpush3.bf16.msra.mxu0 %v14799_v4 }
 0x88b   :  { %13298 = vmatprep.subr.bf16.mxu0 %v16247_v1 }
 0x88c   :  { %13441 = vmatpush3.bf16.msra.mxu1 %v14307_v12  ;;  %v16417_v12 = vld [vmem:[#allocation14_spill] sm:$0xff] }
 0x88d   :  { %13442 = vmatprep.subr.bf16.mxu1 %v16247_v1 }
 0x88e   :  { %13300 = vmatpush3.bf16.msra.mxu0 %v14801_v30 }
 0x88f   :  { %13301 = vmatprep.subr.bf16.mxu0 %v16247_v1 }
 0x890   :  { %13444 = vmatpush3.bf16.msra.mxu1 %v14309_v60  ;;  %v16418_v60 = vld [vmem:[#allocation44_spill] sm:$0xff] }
 0x891   :  { %11575 = vmatmul.mubr.f32.vlgmr.msra.gmra.mrb[14].mxu0 %v15701_v20  ;;  %13445 = vmatprep.subr.bf16.mxu1 %v16247_v1 }
 0x892   :  { %13303 = vmatpush3.bf16.msra.mxu0 %v14805_v50  ;;  %11609 = vmatprep.mubr.msk.f32.mxu0 %vm13809_vm0, %v16246_v27 }
 0x893   :  { %11785 = vmatmul.mubr.f32.vlgmr.msra.gmra.mrb[70].mxu1 %v15703_v40  ;;  %13304 = vmatprep.subr.bf16.mxu0 %v16247_v1 }
 0x894   :  { %13447 = vmatpush3.bf16.msra.mxu1 %v14313_v24  ;;  %11819 = vmatprep.mubr.msk.f32.mxu1 %vm13809_vm0, %v16246_v27  ;;  %v16419_v24 = vld [vmem:[#allocation15_spill] sm:$0xff] }
 0x895   :  { %13448 = vmatprep.subr.bf16.mxu1 %v16247_v1 }
 0x896   :  { %13306 = vmatpush3.bf16.msra.mxu0 %v14809_v39 }
 0x897   :  { %13307 = vmatprep.subr.bf16.mxu0 %v16247_v1 }
 0x898   :  { %13450 = vmatpush3.bf16.msra.mxu1 %v14317_v25  ;;  %v16420_v25 = vld [vmem:[#allocation5_spill] sm:$0xff] }
 0x899   :  { %13451 = vmatprep.subr.bf16.mxu1 %v16247_v1 }
 0x89a   :  { %13309 = vmatpush3.bf16.msra.mxu0 %v14813_v17 }
 0x89b   :  { %13310 = vmatprep.subr.bf16.mxu0 %v16247_v1 }
 0x89c   :  { %13453 = vmatpush3.bf16.msra.mxu1 %v14321_v34  ;;  %v16421_v34 = vld [vmem:[#allocation16_spill] sm:$0xff] }
 0x89d   :  { %13454 = vmatprep.subr.bf16.mxu1 %v16247_v1 }
 0x89e   :  { %13312 = vmatpush3.bf16.msra.mxu0 %v14817_v9 }
 0x89f   :  { %13313 = vmatprep.subr.bf16.mxu0 %v16247_v1 }
 0x8a0   :  { %13456 = vmatpush3.bf16.msra.mxu1 %v16411_v28 }
 0x8a1   :  { %13457 = vmatprep.subr.bf16.mxu1 %v16247_v1 }
 0x8a2   :  { %13315 = vmatpush3.bf16.msra.mxu0 %v16412_v37 }
 0x8a3   :  { %13316 = vmatprep.subr.bf16.mxu0 %v16247_v1 }
 0x8a4   :  { %13459 = vmatpush3.bf16.msra.mxu1 %v16413_v46 }
 0x8a5   :  { %13460 = vmatprep.subr.bf16.mxu1 %v16247_v1 }
 0x8a6   :  { %13318 = vmatpush3.bf16.msra.mxu0 %v16414_v21 }
 0x8a7   :  { %13319 = vmatprep.subr.bf16.mxu0 %v16247_v1 }
 0x8a8   :  { %13462 = vmatpush3.bf16.msra.mxu1 %v16415_v33  ;;  %v5994_v33 = vsel %vm5993_vm12, %v5990_v5, %v5992_v59 }
 0x8a9   :  { %13463 = vmatprep.subr.bf16.mxu1 %v16247_v1 }
 0x8aa   :  { %13321 = vmatpush3.bf16.msra.mxu0 %v16416_v43 }
 0x8ab   :  { %13322 = vmatprep.subr.bf16.mxu0 %v16247_v1 }
 0x8ac   :  { %13465 = vmatpush3.bf16.msra.mxu1 %v16417_v12 }
 0x8ad   :  { %13466 = vmatprep.subr.bf16.mxu1 %v16247_v1 }
 0x8ae   :  { %13324 = vmatpush3.bf16.msra.mxu0 %v16418_v60 }
 0x8af   :  { %13325 = vmatprep.subr.bf16.mxu0 %v16247_v1 }
 0x8b0   :  { %13468 = vmatpush3.bf16.msra.mxu1 %v16419_v24  ;;  %v5996_v24 = vand.u32 2147483648, %v5990_v5 }
 0x8b1   :  { %11610 = vmatmul.mubr.f32.vlgmr.msra.gmra.mrb[14].mxu0 %v15706_v36  ;;  %13469 = vmatprep.subr.bf16.mxu1 %v16247_v1  ;;  %v16430_v36 = vld [vmem:[#allocation32_spill] sm:$0xff] }
 0x8b2   :  { %13327 = vmatpush3.bf16.msra.mxu0 %v14550_v13  ;;  %11644 = vmatprep.mubr.msk.f32.mxu0 %vm13809_vm0, %v16246_v27 }
 0x8b3   :  { %11820 = vmatmul.mubr.f32.vlgmr.msra.gmra.mrb[72].mxu1 %v15709_v53  ;;  %13328 = vmatprep.subr.bf16.mxu0 %v16247_v1  ;;  %v16431_v53 = vld [vmem:[#allocation21_spill] sm:$0xff] }
 0x8b4   :  { %13471 = vmatpush3.bf16.msra.mxu1 %v14013_v48  ;;  %11854 = vmatprep.mubr.msk.f32.mxu1 %vm13809_vm0, %v16246_v27 }
 0x8b5   :  { %13472 = vmatprep.subr.bf16.mxu1 %v16247_v1 }
 0x8b6   :  { %13330 = vmatpush3.bf16.msra.mxu0 %v14560_v23 }
 0x8b7   :  { %13331 = vmatprep.subr.bf16.mxu0 %v16247_v1 }
 0x8b8   :  { %13474 = vmatpush3.bf16.msra.mxu1 %v14020_v49 }
 0x8b9   :  { %13475 = vmatprep.subr.bf16.mxu1 %v16247_v1 }
 0x8ba   :  { %13333 = vmatpush3.bf16.msra.mxu0 %v14570_v35 }
 0x8bb   :  { %13334 = vmatprep.subr.bf16.mxu0 %v16247_v1 }
 0x8bc   :  { %13477 = vmatpush3.bf16.msra.mxu1 %v16301_v63 }
 0x8bd   :  { %13478 = vmatprep.subr.bf16.mxu1 %v16247_v1 }
 0x8be   :  { %13336 = vmatpush3.bf16.msra.mxu0 %v16302_v42 }
 0x8bf   :  { %13337 = vmatprep.subr.bf16.mxu0 %v16247_v1 }
 0x8c0   :  { %13480 = vmatpush3.bf16.msra.mxu1 %v16383_v38 }
 0x8c1   :  { %13481 = vmatprep.subr.bf16.mxu1 %v16247_v1 }
 0x8c2   :  { %13339 = vmatpush3.bf16.msra.mxu0 %v16384_v58 }
 0x8c3   :  { %13340 = vmatprep.subr.bf16.mxu0 %v16247_v1 }
 0x8c4   :  { %13483 = vmatpush3.bf16.msra.mxu1 %v16385_v26 }
 0x8c5   :  { %13484 = vmatprep.subr.bf16.mxu1 %v16247_v1 }
 0x8c6   :  { %13342 = vmatpush3.bf16.msra.mxu0 %v16386_v3 }
 0x8c7   :  { %13343 = vmatprep.subr.bf16.mxu0 %v16247_v1 }
 0x8c8   :  { %13486 = vmatpush3.bf16.msra.mxu1 %v16387_v22 }
 0x8c9   :  { %13487 = vmatprep.subr.bf16.mxu1 %v16247_v1 }
 0x8ca   :  { %13345 = vmatpush3.bf16.msra.mxu0 %v16388_v32 }
 0x8cb   :  { %13346 = vmatprep.subr.bf16.mxu0 %v16247_v1 }
 0x8cc   :  { %13489 = vmatpush3.bf16.msra.mxu1 %v16389_v6 }
 0x8cd   :  { %13490 = vmatprep.subr.bf16.mxu1 %v16247_v1 }
 0x8ce   :  { %13348 = vmatpush3.bf16.msra.mxu0 %v16390_v52 }
 0x8cf   :  { %13349 = vmatprep.subr.bf16.mxu0 %v16247_v1 }
 0x8d0   :  { %13492 = vmatpush3.bf16.msra.mxu1 %v16391_v29 }
 0x8d1   :  { %11645 = vmatmul.mubr.f32.vlgmr.msra.gmra.mrb[14].mxu0 %v6750_v16  ;;  %13493 = vmatprep.subr.bf16.mxu1 %v16247_v1 }
 0x8d2   :  { %13351 = vmatpush3.bf16.msra.mxu0 %v16420_v25  ;;  %11679 = vmatprep.mubr.msk.f32.mxu0 %vm13809_vm0, %v16246_v27 }
 0x8d3   :  { %11855 = vmatmul.mubr.f32.vlgmr.msra.gmra.mrb[74].mxu1 %v7415_v11  ;;  %13352 = vmatprep.subr.bf16.mxu0 %v16247_v1  ;;  %v16434_v11 = vld [vmem:[#allocation34_spill] sm:$0xff] }
 0x8d4   :  { %13495 = vmatpush3.bf16.msra.mxu1 %v16421_v34  ;;  %11889 = vmatprep.mubr.msk.f32.mxu1 %vm13809_vm0, %v16246_v27 }
 0x8d5   :  { %13496 = vmatprep.subr.bf16.mxu1 %v16247_v1 }
 0x8d6   :  { %13354 = vmatpush3.bf16.msra.mxu0 %v16422_v2 }
 0x8d7   :  { %13355 = vmatprep.subr.bf16.mxu0 %v16247_v1 }
 0x8d8   :  { %13498 = vmatpush3.bf16.msra.mxu1 %v16423_v7  ;;  %v5997_v7 = vsel %vm5995_vm15, %v5996_v24, %v5994_v33 }
 0x8d9   :  { %13499 = vmatprep.subr.bf16.mxu1 %v16247_v1 }
 0x8da   :  { %13357 = vmatpush3.bf16.msra.mxu0 %v16424_v14 }
 0x8db   :  { %13358 = vmatprep.subr.bf16.mxu0 %v16247_v1 }
 0x8dc   :  { %13501 = vmatpush3.bf16.msra.mxu1 %v16425_v47 }
 0x8dd   :  { %13502 = vmatprep.subr.bf16.mxu1 %v16247_v1 }
 0x8de   :  { %13360 = vmatpush3.bf16.msra.mxu0 %v16426_v0 }
 0x8df   :  { %13361 = vmatprep.subr.bf16.mxu0 %v16247_v1 }
 0x8e0   :  { %13504 = vmatpush3.bf16.msra.mxu1 %v16427_v10 }
 0x8e1   :  { %13505 = vmatprep.subr.bf16.mxu1 %v16247_v1 }
 0x8e2   :  { %13363 = vmatpush3.bf16.msra.mxu0 %v16428_v19 }
 0x8e3   :  { %13364 = vmatprep.subr.bf16.mxu0 %v16247_v1 }
 0x8e4   :  { %13507 = vmatpush3.bf16.msra.mxu1 %v16429_v55 }
 0x8e5   :  { %13508 = vmatprep.subr.bf16.mxu1 %v16247_v1 }
 0x8e6   :  { %13366 = vmatpush3.bf16.msra.mxu0 %v16430_v36 }
 0x8e7   :  { %13367 = vmatprep.subr.bf16.mxu0 %v16247_v1 }
 0x8e8   :  { %13510 = vmatpush3.bf16.msra.mxu1 %v16431_v53 }
 0x8e9   :  { %13511 = vmatprep.subr.bf16.mxu1 %v16247_v1 }
 0x8ea   :  { %13369 = vmatpush3.bf16.msra.mxu0 %v16432_v45 }
 0x8eb   :  { %v6001_v16 = vpop.xlane.xlu1 %6000  ;;  %13370 = vmatprep.subr.bf16.mxu0 %v16247_v1 }
 0x8ec   :  { %13513 = vmatpush3.bf16.msra.mxu1 %v16433_v31  ;;  %13773 = vrsqrt.f32 %v6001_v16  ;;  %vm6004_vm13 = vcmp.eq.f32.partialorder %v6001_v16, inf  ;;  %v6007_v12 = vand.u32 2147483648, %v6001_v16  ;;  %vm6006_vm14 = vcmp.eq.f32.partialorder %v6001_v16, 0.0 }
 0x8ed   :  { %13514 = vmatprep.subr.bf16.mxu1 %v16247_v1 }
 0x8ee   :  { %13372 = vmatpush3.bf16.msra.mxu0 %v16434_v11 }
 0x8ef   :  { %13373 = vmatprep.subr.bf16.mxu0 %v16247_v1 }
 0x8f0   :  { %13516 = vmatpush3.bf16.msra.mxu1 %v16435_v41 }
 0x8f1   :  { %11680 = vmatmul.mubr.f32.vlgmr.msra.gmra.mrb[14].mxu0 %v15701_v20  ;;  %13517 = vmatprep.subr.bf16.mxu1 %v16247_v1 }
 0x8f2   :  { %13375 = vmatpush3.bf16.msra.mxu0 %v14550_v13  ;;  %11714 = vmatprep.mubr.msk.f32.mxu0 %vm13809_vm0, %v16246_v27 }
 0x8f3   :  { %11890 = vmatmul.mubr.f32.vlgmr.msra.gmra.mrb[76].mxu1 %v15703_v40  ;;  %13376 = vmatprep.subr.bf16.mxu0 %v16247_v1 }
 0x8f4   :  { %13519 = vmatpush3.bf16.msra.mxu1 %v14013_v48  ;;  %11924 = vmatprep.mubr.msk.f32.mxu1 %vm13809_vm0, %v16246_v27 }
 0x8f5   :  { %13520 = vmatprep.subr.bf16.mxu1 %v16247_v1 }
 0x8f6   :  { %v13774_v28 = vpop.eup %13773  ;;  %13378 = vmatpush3.bf16.msra.mxu0 %v14560_v23 }
 0x8f7   :  { %v6003_v46 = vmul.f32 %v13774_v28, %v6001_v16  ;;  %13379 = vmatprep.subr.bf16.mxu0 %v16247_v1 }
 0x8f8   :  { %13522 = vmatpush3.bf16.msra.mxu1 %v14020_v49  ;;  %v16436_v49 = vld [vmem:[#allocation37_spill] sm:$0xff] }
 0x8f9   :  { %v6005_v34 = vsel %vm6004_vm13, %v6001_v16, %v6003_v46  ;;  %13523 = vmatprep.subr.bf16.mxu1 %v16247_v1 }
 0x8fa   :  { %13381 = vmatpush3.bf16.msra.mxu0 %v14570_v35  ;;  %v6008_v48 = vsel %vm6006_vm14, %v6007_v12, %v6005_v34 }
 0x8fb   :  { %13382 = vmatprep.subr.bf16.mxu0 %v16247_v1  ;;  %v6009_v47 = vadd.f32 %v6008_v48, %v5997_v7 }
 0x8fc   :  { %13525 = vmatpush3.bf16.msra.mxu1 %v16301_v63 }
 0x8fd   :  { %13526 = vmatprep.subr.bf16.mxu1 %v16247_v1  ;;  %v15892_v10 = vsel %vm8654_vm2, %v16436_v49, %v6009_v47 }
 0x8fe   :  { %13384 = vmatpush3.bf16.msra.mxu0 %v16302_v42 }
 0x8ff   :  { %13385 = vmatprep.subr.bf16.mxu0 %v16247_v1 }
 0x900   :  { %13528 = vmatpush3.bf16.msra.mxu1 %v16383_v38 }
 0x901   :  { %13529 = vmatprep.subr.bf16.mxu1 %v16247_v1 }
 0x902   :  { %13387 = vmatpush3.bf16.msra.mxu0 %v16384_v58 }
 0x903   :  { %13388 = vmatprep.subr.bf16.mxu0 %v16247_v1 }
 0x904   :  { %13531 = vmatpush3.bf16.msra.mxu1 %v16385_v26 }
 0x905   :  { %13532 = vmatprep.subr.bf16.mxu1 %v16247_v1 }
 0x906   :  { %13390 = vmatpush3.bf16.msra.mxu0 %v16386_v3 }
 0x907   :  { %13391 = vmatprep.subr.bf16.mxu0 %v16247_v1 }
 0x908   :  { %13534 = vmatpush3.bf16.msra.mxu1 %v16387_v22 }
 0x909   :  { %13535 = vmatprep.subr.bf16.mxu1 %v16247_v1 }
 0x90a   :  { %13393 = vmatpush3.bf16.msra.mxu0 %v16388_v32 }
 0x90b   :  { %13394 = vmatprep.subr.bf16.mxu0 %v16247_v1 }
 0x90c   :  { %13537 = vmatpush3.bf16.msra.mxu1 %v16389_v6 }
 0x90d   :  { %13538 = vmatprep.subr.bf16.mxu1 %v16247_v1 }
 0x90e   :  { %13396 = vmatpush3.bf16.msra.mxu0 %v16390_v52 }
 0x90f   :  { %13541 = vmatprep.subr.bf16.mxu0 %v16247_v1 }
 0x910   :  { %13540 = vmatpush3.bf16.msra.mxu1 %v16391_v29 }
 0x911   :  { %11715 = vmatmul.mubr.f32.vlgmr.msra.gmra.mrb[14].mxu0 %v15701_v20 }
 0x912   :  { %13543 = vmatpush3.bf16.msra.mxu0 %v14550_v13  ;;  %11959 = vmatprep.mubr.msk.f32.mxu0 %vm13809_vm0, %v16246_v27 }
 0x913   :  { %11925 = vmatmul.mubr.f32.vlgmr.msra.gmra.mrb[78].mxu1 %v15703_v40  ;;  %13544 = vmatprep.subr.bf16.mxu0 %v16247_v1 }
 0x916   :  { %13546 = vmatpush3.bf16.msra.mxu0 %v14560_v23 }
 0x917   :  { %13547 = vmatprep.subr.bf16.mxu0 %v16247_v1 }
 0x91a   :  { %13549 = vmatpush3.bf16.msra.mxu0 %v14570_v35 }
 0x91b   :  { %13550 = vmatprep.subr.bf16.mxu0 %v16247_v1 }
 0x91e   :  { %13552 = vmatpush3.bf16.msra.mxu0 %v16302_v42 }
 0x91f   :  { %13553 = vmatprep.subr.bf16.mxu0 %v16247_v1 }
 0x922   :  { %13555 = vmatpush3.bf16.msra.mxu0 %v16384_v58 }
 0x923   :  { %13556 = vmatprep.subr.bf16.mxu0 %v16247_v1 }
 0x926   :  { %13558 = vmatpush3.bf16.msra.mxu0 %v16386_v3 }
 0x927   :  { %13559 = vmatprep.subr.bf16.mxu0 %v16247_v1 }
 0x92a   :  { %13561 = vmatpush3.bf16.msra.mxu0 %v16388_v32 }
 0x92b   :  { %13562 = vmatprep.subr.bf16.mxu0 %v16247_v1 }
 0x92e   :  { %13564 = vmatpush3.bf16.msra.mxu0 %v16390_v52 }
 0x92f   :  { %13565 = vmatprep.subr.bf16.mxu0 %v16247_v1 }
 0x946   :  { %v7419_v63 = vpop.f32.mrb[68].mxu1 }
 0x947   :  { %v11751_v38 = vpop.f32.mrb[69].mxu1 }
 0x966   :  { %v7570_v26 = vpop.f32.mrb[70].mxu1 }
 0x967   :  { %v7571_v22 = vadd.f32 %v7570_v26, %v7419_v63  ;;  %v11786_v6 = vpop.f32.mrb[71].mxu1 }
 0x986   :  { %v7674_v29 = vpop.f32.mrb[72].mxu1 }
 0x987   :  { %v7675_v20 = vadd.f32 %v7674_v29, %v7571_v22  ;;  %v11821_v40 = vpop.f32.mrb[73].mxu1 }
 0x9a6   :  { %v7763_v5 = vpop.f32.mrb[74].mxu1 }
 0x9a7   :  { %v7764_v55 = vadd.f32 %v7763_v5, %v7675_v20  ;;  %v11856_v53 = vpop.f32.mrb[75].mxu1 }
 0x9c6   :  { %v7882_v16 = vpop.f32.mrb[76].mxu1 }
 0x9c7   :  { %v7883_v31 = vadd.f32 %v7882_v16, %v7764_v55  ;;  %v11891_v41 = vpop.f32.mrb[77].mxu1 }
 0x9e4   :  { %v7304_v62 = vpop.f32.mrb[14].mxu0 }
 0x9e5   :  { %v7319_v59 = vmul.f32 %v7304_v62, %v7304_v62  ;;  %v11716_v28 = vpop.f32.mrb[15].mxu0 }
 0x9e6   :  { %v7969_v46 = vpop.f32.mrb[78].mxu1 }
 0x9e7   :  { %v7970_v33 = vadd.f32 %v7969_v46, %v7883_v31  ;;  %v11926_v12 = vpop.f32.mrb[79].mxu1  ;;  %v7320_v24 = vsel %vm42_vm1, %v7319_v59, 0.0 }
 0x9e8   :  { %7321 = vadd.xlane.f32.xlu0 %v7320_v24 }
 0x9e9   :  { %v15934_v34 = vadd.f32 %v7970_v33, %v15690_v8 }
 0x9eb   :  { %v7974_v48 = vsub.f32 %v14361_v44, %v15934_v34  ;;  %v7976_v7 = vsub.f32 %v15934_v34, %v14361_v44  ;;  %v16012_v44 = vpop.xlane.xlu0 %5337 }
 0x9ec   :  { %vm5341_vm9 = vcmp.eq.f32.partialorder %v16012_v44, inf  ;;  %vm5343_vm14 = vcmp.eq.f32.partialorder %v16012_v44, 0.0 }
 0x9ed   :  { %v7975_v47 = vmax.f32 %v7974_v48, 0.0 }
 0x9ef   :  { %v8629_v49 = vsub.f32 %v15694_v18, %v7975_v47  ;;  %v7977_v63 = vadd.f32 %v7976_v7, %v7975_v47 }
 0x9f1   :  { %v8630_v38 = vmul.f32 %v8629_v49, %v8629_v49  ;;  %v15941_v26 = vand.u32 4294901760, %v7977_v63  ;;  %v7978_v6 = vmul.f32 %v7977_v63, %v7977_v63 }
 0x9f3   :  { %8631 = vadd.xlane.f32.xlu0 %v8630_v38  ;;  %v8070_v22 = vsub.f32 %v7977_v63, %v15941_v26 }
 0x9f5   :  { %v8071_v29 = vand.u32 4294901760, %v8070_v22 }
 0x9f7   :  { %7979 = vadd.xlane.f32.xlu0 %v7978_v6  ;;  %v8072_v8 = vsub.f32 %v8070_v22, %v8071_v29 }
 0x9f9   :  { %v8073_v20 = vand.u32 4294901760, %v8072_v8 }
 0x9fb   :  { %11960 = vmatmul.mubr.f32.vlgmr.msra.gmra.mrb[16].mxu0 %v8073_v20 }
 0x9fc   :  { %13567 = vmatpush3.bf16.msra.mxu0 %v14686_v54  ;;  %11994 = vmatprep.mubr.msk.f32.mxu0 %vm13809_vm0, %v16246_v27  ;;  %v7311_v54 = vpop.xlane.xlu1 %7310 }
 0x9fd   :  { %13568 = vmatprep.subr.bf16.mxu0 %v16247_v1  ;;  %13775 = vrsqrt.f32 %v7311_v54  ;;  %vm7314_vm3 = vcmp.eq.f32.partialorder %v7311_v54, inf  ;;  %vm7316_vm6 = vcmp.eq.f32.partialorder %v7311_v54, 0.0 }
 0xa00   :  { %13570 = vmatpush3.bf16.msra.mxu0 %v14700_v15 }
 0xa01   :  { %13571 = vmatprep.subr.bf16.mxu0 %v16247_v1 }
 0xa04   :  { %13573 = vmatpush3.bf16.msra.mxu0 %v14716_v56 }
 0xa05   :  { %13574 = vmatprep.subr.bf16.mxu0 %v16247_v1 }
 0xa07   :  { %v13776_v15 = vpop.eup %13775 }
 0xa08   :  { %13576 = vmatpush3.bf16.msra.mxu0 %v14748_v61  ;;  %v7313_v56 = vmul.f32 %v13776_v15, %v7311_v54 }
 0xa09   :  { %13577 = vmatprep.subr.bf16.mxu0 %v16247_v1 }
 0xa0c   :  { %13579 = vmatpush3.bf16.msra.mxu0 %v14752_v51 }
 0xa0d   :  { %13580 = vmatprep.subr.bf16.mxu0 %v16247_v1 }
 0xa10   :  { %13582 = vmatpush3.bf16.msra.mxu0 %v14772_v57 }
 0xa11   :  { %13583 = vmatprep.subr.bf16.mxu0 %v16247_v1 }
 0xa14   :  { %13585 = vmatpush3.bf16.msra.mxu0 %v14799_v4 }
 0xa15   :  { %13586 = vmatprep.subr.bf16.mxu0 %v16247_v1 }
 0xa18   :  { %13588 = vmatpush3.bf16.msra.mxu0 %v14801_v30  ;;  %v7315_v30 = vsel %vm7314_vm3, %v7311_v54, %v7313_v56 }
 0xa19   :  { %13589 = vmatprep.subr.bf16.mxu0 %v16247_v1 }
 0xa1b   :  { %11995 = vmatmul.mubr.f32.vlgmr.msra.gmra.mrb[16].mxu0 %v15941_v26 }
 0xa1c   :  { %13591 = vmatpush3.bf16.msra.mxu0 %v14805_v50  ;;  %12029 = vmatprep.mubr.msk.f32.mxu0 %vm13809_vm0, %v16246_v27  ;;  %v7317_v50 = vand.u32 2147483648, %v7311_v54 }
 0xa1d   :  { %13592 = vmatprep.subr.bf16.mxu0 %v16247_v1 }
 0xa20   :  { %13594 = vmatpush3.bf16.msra.mxu0 %v14809_v39 }
 0xa21   :  { %13595 = vmatprep.subr.bf16.mxu0 %v16247_v1 }
 0xa24   :  { %13597 = vmatpush3.bf16.msra.mxu0 %v14813_v17 }
 0xa25   :  { %13598 = vmatprep.subr.bf16.mxu0 %v16247_v1 }
 0xa28   :  { %13600 = vmatpush3.bf16.msra.mxu0 %v14817_v9  ;;  %v16437_v9 = vld [vmem:[#allocation35_spill] sm:$0xff] }
 0xa29   :  { %13601 = vmatprep.subr.bf16.mxu0 %v16247_v1  ;;  %vm2683_vm8 = vcmp.eq.f32.partialorder %v16437_v9, inf  ;;  %vm2685_vm15 = vcmp.eq.f32.partialorder %v16437_v9, 0.0 }
 0xa2c   :  { %13603 = vmatpush3.bf16.msra.mxu0 %v16412_v37 }
 0xa2d   :  { %13604 = vmatprep.subr.bf16.mxu0 %v16247_v1 }
 0xa30   :  { %13606 = vmatpush3.bf16.msra.mxu0 %v16414_v21 }
 0xa31   :  { %13607 = vmatprep.subr.bf16.mxu0 %v16247_v1 }
 0xa34   :  { %13609 = vmatpush3.bf16.msra.mxu0 %v16416_v43 }
 0xa35   :  { %13610 = vmatprep.subr.bf16.mxu0 %v16247_v1 }
 0xa38   :  { %13612 = vmatpush3.bf16.msra.mxu0 %v16418_v60 }
 0xa39   :  { %13613 = vmatprep.subr.bf16.mxu0 %v16247_v1 }
 0xa3b   :  { %12030 = vmatmul.mubr.f32.vlgmr.msra.gmra.mrb[16].mxu0 %v8070_v22 }
 0xa3c   :  { %13615 = vmatpush3.bf16.msra.mxu0 %v14550_v13  ;;  %12064 = vmatprep.mubr.msk.f32.mxu0 %vm13809_vm0, %v16246_v27 }
 0xa3d   :  { %13616 = vmatprep.subr.bf16.mxu0 %v16247_v1 }
 0xa40   :  { %13618 = vmatpush3.bf16.msra.mxu0 %v14560_v23 }
 0xa41   :  { %13619 = vmatprep.subr.bf16.mxu0 %v16247_v1 }
 0xa44   :  { %13621 = vmatpush3.bf16.msra.mxu0 %v14570_v35 }
 0xa45   :  { %13622 = vmatprep.subr.bf16.mxu0 %v16247_v1 }
 0xa48   :  { %13624 = vmatpush3.bf16.msra.mxu0 %v16302_v42 }
 0xa49   :  { %13625 = vmatprep.subr.bf16.mxu0 %v16247_v1 }
 0xa4c   :  { %13627 = vmatpush3.bf16.msra.mxu0 %v16384_v58 }
 0xa4d   :  { %13628 = vmatprep.subr.bf16.mxu0 %v16247_v1 }
 0xa50   :  { %13630 = vmatpush3.bf16.msra.mxu0 %v16386_v3 }
 0xa51   :  { %13631 = vmatprep.subr.bf16.mxu0 %v16247_v1 }
 0xa54   :  { %13633 = vmatpush3.bf16.msra.mxu0 %v16388_v32 }
 0xa55   :  { %13634 = vmatprep.subr.bf16.mxu0 %v16247_v1 }
 0xa58   :  { %13636 = vmatpush3.bf16.msra.mxu0 %v16390_v52 }
 0xa59   :  { %13637 = vmatprep.subr.bf16.mxu0 %v16247_v1 }
 0xa5b   :  { %12065 = vmatmul.mubr.f32.vlgmr.msra.gmra.mrb[16].mxu0 %v8071_v29 }
 0xa5c   :  { %13639 = vmatpush3.bf16.msra.mxu0 %v16420_v25  ;;  %12099 = vmatprep.mubr.msk.f32.mxu0 %vm13809_vm0, %v16246_v27 }
 0xa5d   :  { %13640 = vmatprep.subr.bf16.mxu0 %v16247_v1 }
 0xa60   :  { %13642 = vmatpush3.bf16.msra.mxu0 %v16422_v2 }
 0xa61   :  { %13643 = vmatprep.subr.bf16.mxu0 %v16247_v1 }
 0xa64   :  { %13645 = vmatpush3.bf16.msra.mxu0 %v16424_v14  ;;  %v2686_v14 = vand.u32 2147483648, %v16437_v9 }
 0xa65   :  { %13646 = vmatprep.subr.bf16.mxu0 %v16247_v1 }
 0xa68   :  { %13648 = vmatpush3.bf16.msra.mxu0 %v16426_v0 }
 0xa69   :  { %13649 = vmatprep.subr.bf16.mxu0 %v16247_v1 }
 0xa6c   :  { %13651 = vmatpush3.bf16.msra.mxu0 %v16428_v19 }
 0xa6d   :  { %13652 = vmatprep.subr.bf16.mxu0 %v16247_v1 }
 0xa70   :  { %13654 = vmatpush3.bf16.msra.mxu0 %v16430_v36 }
 0xa71   :  { %13655 = vmatprep.subr.bf16.mxu0 %v16247_v1 }
 0xa74   :  { %13657 = vmatpush3.bf16.msra.mxu0 %v16432_v45 }
 0xa75   :  { %v7322_v51 = vpop.xlane.xlu0 %7321  ;;  %13658 = vmatprep.subr.bf16.mxu0 %v16247_v1 }
 0xa76   :  { %13777 = vrsqrt.f32 %v7322_v51  ;;  %vm7325_vm4 = vcmp.eq.f32.partialorder %v7322_v51, inf  ;;  %v7328_v4 = vand.u32 2147483648, %v7322_v51  ;;  %vm7327_vm5 = vcmp.eq.f32.partialorder %v7322_v51, 0.0 }
 0xa77   :  { %13779 = vrsqrt.f32 %v16437_v9 }
 0xa78   :  { %13660 = vmatpush3.bf16.msra.mxu0 %v16434_v11  ;;  %v5344_v11 = vand.u32 2147483648, %v16012_v44 }
 0xa79   :  { %13661 = vmatprep.subr.bf16.mxu0 %v16247_v1 }
 0xa7b   :  { %12100 = vmatmul.mubr.f32.vlgmr.msra.gmra.mrb[16].mxu0 %v15941_v26 }
 0xa7c   :  { %13663 = vmatpush3.bf16.msra.mxu0 %v14550_v13  ;;  %12134 = vmatprep.mubr.msk.f32.mxu0 %vm13809_vm0, %v16246_v27  ;;  %v7318_v13 = vsel %vm7316_vm6, %v7317_v50, %v7315_v30  ;;  %vm8656_vm0 = vcmask 23552   ;;  %vm8664_vm6 = vcmask 39936  }
 0xa7d   :  { %13664 = vmatprep.subr.bf16.mxu0 %v16247_v1 }
 0xa80   :  { %v13778_v57 = vpop.eup %13777  ;;  %13666 = vmatpush3.bf16.msra.mxu0 %v14560_v23 }
 0xa81   :  { %v7324_v61 = vmul.f32 %v13778_v57, %v7322_v51  ;;  %13667 = vmatprep.subr.bf16.mxu0 %v16247_v1 }
 0xa83   :  { %v7326_v39 = vsel %vm7325_vm4, %v7322_v51, %v7324_v61 }
 0xa84   :  { %13669 = vmatpush3.bf16.msra.mxu0 %v14570_v35  ;;  %v7329_v27 = vsel %vm7327_vm5, %v7328_v4, %v7326_v39  ;;  %v16042_v35 = vpop.xlane.xlu0 %8631  ;;  %vm8658_vm5 = vcmask 31744  }
 0xa85   :  { %13670 = vmatprep.subr.bf16.mxu0 %v16247_v1  ;;  %v7330_v17 = vadd.f32 %v7329_v27, %v7318_v13  ;;  %v8638_v29 = vand.u32 2147483648, %v16042_v35 }
 0xa87   :  { %v16031_v23 = vsel %vm8656_vm0, %v15892_v10, %v7330_v17 }
 0xa88   :  { %13672 = vmatpush3.bf16.msra.mxu0 %v16302_v42  ;;  %v6659_v42 = vpop.xlane.xlu1 %6658  ;;  %v7980_v18 = vpop.xlane.xlu0 %7979 }
 0xa89   :  { %13673 = vmatprep.subr.bf16.mxu0 %v16247_v1  ;;  %vm6662_vm10 = vcmp.eq.f32.partialorder %v6659_v42, inf  ;;  %vm7983_vm13 = vcmp.eq.f32.partialorder %v7980_v18, inf  ;;  %v6665_v5 = vand.u32 2147483648, %v6659_v42  ;;  %vm6664_vm3 = vcmp.eq.f32.partialorder %v6659_v42, 0.0 }
 0xa8a   :  { %v7986_v16 = vand.u32 2147483648, %v7980_v18  ;;  %vm7985_vm4 = vcmp.eq.f32.partialorder %v7980_v18, 0.0 }
 0xa8c   :  { %13675 = vmatpush3.bf16.msra.mxu0 %v16384_v58  ;;  %v16438_v58 = vld [vmem:[#allocation36_spill] sm:$0xff] }
 0xa8d   :  { %13676 = vmatprep.subr.bf16.mxu0 %v16247_v1  ;;  %13781 = vrsqrt.f32 %v16438_v58  ;;  %vm4020_vm7 = vcmp.eq.f32.partialorder %v16438_v58, inf  ;;  %v4023_v36 = vand.u32 2147483648, %v16438_v58  ;;  %vm4022_vm12 = vcmp.eq.f32.partialorder %v16438_v58, 0.0 }
 0xa8e   :  { %13783 = vrsqrt.f32 %v16012_v44 }
 0xa8f   :  { %13785 = vrsqrt.f32 %v6659_v42 }
 0xa90   :  { %13678 = vmatpush3.bf16.msra.mxu0 %v16386_v3  ;;  %13787 = vrsqrt.f32 %v7980_v18  ;;  %v13780_v3 = vpop.eup %13779 }
 0xa91   :  { %13679 = vmatprep.subr.bf16.mxu0 %v16247_v1  ;;  %v2682_v43 = vmul.f32 %v13780_v3, %v16437_v9  ;;  %13789 = vrsqrt.f32 %v16042_v35 }
 0xa93   :  { %v2684_v19 = vsel %vm2683_vm8, %v16437_v9, %v2682_v43  ;;  %vm8682_vm8 = vcmask 171008  }
 0xa94   :  { %13681 = vmatpush3.bf16.msra.mxu0 %v16388_v32  ;;  %v2687_v41 = vsel %vm2685_vm15, %v2686_v14, %v2684_v19 }
 0xa95   :  { %13682 = vmatprep.subr.bf16.mxu0 %v16247_v1 }
 0xa97   :  { %v13782_v32 = vpop.eup %13781 }
 0xa98   :  { %13684 = vmatpush3.bf16.msra.mxu0 %v16390_v52  ;;  %v13784_v37 = vpop.eup %13783  ;;  %v4019_v52 = vmul.f32 %v13782_v32, %v16438_v58 }
 0xa99   :  { %v13786_v1 = vpop.eup %13785  ;;  %v5340_v60 = vmul.f32 %v13784_v37, %v16012_v44 }
 0xa9a   :  { %v13788_v21 = vpop.eup %13787  ;;  %v6661_v25 = vmul.f32 %v13786_v1, %v6659_v42  ;;  %v4021_v0 = vsel %vm4020_vm7, %v16438_v58, %v4019_v52 }
 0xa9b   :  { %12135 = vmatmul.mubr.f32.vlgmr.msra.gmra.mrb[16].mxu0 %v15941_v26  ;;  %v7982_v2 = vmul.f32 %v13788_v21, %v7980_v18  ;;  %v5342_v45 = vsel %vm5341_vm9, %v16012_v44, %v5340_v60  ;;  %v4024_v40 = vsel %vm4022_vm12, %v4023_v36, %v4021_v0  ;;  %v13790_v63 = vpop.eup %13789  ;;  %vm8684_vm9 = vcmask 211968  }
 0xa9c   :  { %v6663_v10 = vsel %vm6662_vm10, %v6659_v42, %v6661_v25  ;;  %v5345_v53 = vsel %vm5343_vm14, %v5344_v11, %v5342_v45  ;;  %v8653_v33 = vsel %vm8652_vm11, %v2687_v41, %v4024_v40  ;;  %v8634_v38 = vmul.f32 %v13790_v63, %v16042_v35 }
 0xa9d   :  { %v7984_v55 = vsel %vm7983_vm13, %v7980_v18, %v7982_v2  ;;  %v6666_v62 = vsel %vm6664_vm3, %v6665_v5, %v6663_v10  ;;  %v8655_v12 = vsel %vm8654_vm2, %v8653_v33, %v5345_v53  ;;  %vm8635_vm11 = vcmp.eq.f32.partialorder %v16042_v35, inf }
 0xa9e   :  { %v7987_v46 = vsel %vm7985_vm4, %v7986_v16, %v7984_v55  ;;  %v8657_v48 = vsel %vm8656_vm0, %v8655_v12, %v6666_v62  ;;  %v8636_v6 = vsel %vm8635_vm11, %v16042_v35, %v8634_v38  ;;  %vm8637_vm0 = vcmp.eq.f32.partialorder %v16042_v35, 0.0 }
 0xa9f   :  { %v8659_v7 = vsel %vm8658_vm5, %v8657_v48, %v7987_v46  ;;  %v8639_v54 = vsel %vm8637_vm0, %v8638_v29, %v8636_v6  ;;  %vm8686_vm10 = vcmask 220160   ;;  %vm8688_vm12 = vcmask 228352  }
 0xaa0   :  { %v8665_v47 = vsel %vm8664_vm6, %v8659_v7, 0.0 }
 0xb6e   :  { %v8625_v31 = vpop.f32.mrb[16].mxu0 }
 0xb6f   :  { %v8640_v59 = vmul.f32 %v8625_v31, %v8625_v31  ;;  %v12136_v28 = vpop.f32.mrb[17].mxu0 }
 0xb71   :  { %v8641_v24 = vsel %vm42_vm1, %v8640_v59, 0.0 }
 0xb72   :  { %8642 = vadd.xlane.f32.xlu1 %v8641_v24 }
 0xb76   :  { %8666 = vadd.xlane.f32.xlu1 %v8665_v47 }
 0xb87   :  { %8674 = vrot.lane.b32.xlu1 %v8659_v7, %s13811_s4 }
 0xbff   :  { %v8643_v49 = vpop.xlane.xlu1 %8642 }
 0xc00   :  { %13791 = vrsqrt.f32 %v8643_v49  ;;  %vm8646_vm2 = vcmp.eq.f32.partialorder %v8643_v49, inf  ;;  %v8649_v8 = vand.u32 2147483648, %v8643_v49  ;;  %vm8648_vm7 = vcmp.eq.f32.partialorder %v8643_v49, 0.0 }
 0xc03   :  { %v8667_v57 = vpop.xlane.xlu1 %8666 }
 0xc04   :  { %v8668_v30 = vmul.f32 0.2, %v8667_v57 }
 0xc07   :  { %v8675_v4 = vpop.permute.xlu1 %8674 }
 0xc08   :  { %v8681_v50 = vsel %vm42_vm1, %v15934_v34, %v8675_v4 }
 0xc0a   :  { %v13792_v26 = vpop.eup %13791 }
 0xc0b   :  { %v8645_v22 = vmul.f32 %v13792_v26, %v8643_v49 }
 0xc0d   :  { %v8647_v20 = vsel %vm8646_vm2, %v8643_v49, %v8645_v22 }
 0xc0e   :  { %v8650_v44 = vsel %vm8648_vm7, %v8649_v8, %v8647_v20 }
 0xc0f   :  { %v8651_v51 = vadd.f32 %v8650_v44, %v8639_v54 }
 0xc11   :  { %v8663_v15 = vsel %vm8658_vm5, %v16031_v23, %v8651_v51 }
 0xc12   :  { %v8669_v56 = vsel %vm8664_vm6, %v8663_v15, 0.0 }
 0xc13   :  { %8670 = vadd.xlane.f32.xlu0 %v8669_v56 }
 0xc29   :  { %8678 = vrot.lane.b32.xlu0 %v8663_v15, %s13812_s21 }
 0xca0   :  { %v8671_v61 = vpop.xlane.xlu0 %8670 }
 0xca1   :  { %v8672_v27 = vmul.f32 0.2, %v8671_v61 }
 0xca4   :  { %v8679_v39 = vpop.permute.xlu0 %8678 }
 0xca5   :  { %v8683_v13 = vsel %vm8682_vm8, %v8681_v50, %v8679_v39 }
 0xca6   :  { %v8685_v17 = vsel %vm8684_vm9, %v8683_v13, %v8668_v30 }
 0xca7   :  { %v8687_v23 = vsel %vm8686_vm10, %v8685_v17, %v8672_v27 }
 0xca8   :  { %v8689_v35 = vsel %vm8688_vm12, %v8687_v23, 0.0 }
 0xca9   :  { %8690 = vst [vmem:[%s16087_s5] sm:$0xff] %v8689_v35 }
 0xcaa   :  { %8695 = vsyncpa [#allocation3], 1 }

</bundles_post_ra>
